<compile_context>
chip_gen: v6e
topology: v6e:2x2x1
jax: 0.10.0
libtpu: 0.0.40
codegen_flags: <defaults>
</compile_context>

<pallas_src>
import functools

import jax
import jax.numpy as jnp
from jax.experimental import pallas as pl
from jax.experimental.pallas import tpu as pltpu

LN_EPS = 1e-5      # torch nn.LayerNorm default
NEG_INF = -1e10    # matches masked_fill(mask == 0, -1e10)


def _layer_norm(x, gamma, beta):
    """LayerNorm over the last (hidden) dim, f32."""
    mu = jnp.mean(x, axis=-1, keepdims=True)
    var = jnp.mean((x - mu) ** 2, axis=-1, keepdims=True)
    return (x - mu) * jax.lax.rsqrt(var + LN_EPS) * gamma + beta


def _mha_core(q, k, v, bias, wo_ref, n_heads, head_dim, exact_softmax, need_attn):
    """Multi-head scaled-dot-product attention core, no heads-leading transposes.

    q: [Lq, H] f32 (scale already folded into Wq), k/v: [Lk, H] f32,
    bias: [Lq or 1, Lk] additive f32 mask.
    Returns (proj [Lq, H] f32 — output projection WITHOUT its bias,
             attn [n_heads*Lq, Lk] f32 or None).
    """
    # hoist bf16 casts out of the per-head loop (JAX does not CSE converts)
    q_bf = q.astype(jnp.bfloat16)
    k_bf = k.astype(jnp.bfloat16)
    v_bf = v.astype(jnp.bfloat16)
    dn = (((1,), (1,)), ((), ()))          # contract last dims: qh @ kh^T (trans_b)

    proj = None
    attn_parts = []
    for h in range(n_heads):               # static unroll; slices are zero-cost views
        lo, hi = h * head_dim, (h + 1) * head_dim
        e = jax.lax.dot_general(q_bf[:, lo:hi], k_bf[:, lo:hi], dn,
                                preferred_element_type=jnp.float32)     # [Lq, Lk]
        e = e + bias
        m = jnp.max(e, axis=-1, keepdims=True)
        p = jnp.exp(e - m)
        s = jnp.sum(p, axis=-1, keepdims=True)
        if exact_softmax:                   # returned attention: rows sum to 1 exactly
            attn = p / s
        else:                               # internal-only path: approx recip -> EUP
            attn = p * pl.reciprocal(s, approx=True)
        if need_attn:
            attn_parts.append(attn)
        ctx = jnp.dot(attn.astype(jnp.bfloat16), v_bf[:, lo:hi],
                      preferred_element_type=jnp.float32)               # [Lq, d]
        # per-head slice of the output projection: no lane-concat of contexts
        head_proj = jnp.dot(ctx.astype(jnp.bfloat16), wo_ref[lo:hi, :],
                            preferred_element_type=jnp.float32)         # [Lq, H]
        proj = head_proj if proj is None else proj + head_proj

    attn_all = jnp.concatenate(attn_parts, axis=0) if need_attn else None
    return proj, attn_all


# -----------------------------------------------------------------------------
# Fully fused decoder layer kernel: one grid step == one batch element
# -----------------------------------------------------------------------------
def decoder_layer_kernel(
        trg_ref, enc_ref, tmask_ref, smask_ref,
        wqkv_s_ref, bqkv_s_ref, wo_s_ref, bo_s_ref, g_s_ref, be_s_ref,
        wq_c_ref, bq_c_ref, wkv_c_ref, bkv_c_ref, wo_c_ref, bo_c_ref,
        g_c_ref, be_c_ref,
        w1_ref, b1_ref, w2_ref, b2_ref, g_f_ref, be_f_ref,
        out_ref, attn_ref, *, n_heads, head_dim):
    H = n_heads * head_dim

    x = trg_ref[0]                          # [Lt, H] f32, VMEM-resident all stages
    enc = enc_ref[0]                        # [Ls, H] f32

    # additive mask bias built in-kernel (VPU select) from compact 0/1 masks
    t_bias = jnp.where(tmask_ref[0] != 0.0, jnp.float32(0.0), jnp.float32(NEG_INF))
    s_bias = jnp.where(smask_ref[0] != 0.0, jnp.float32(0.0), jnp.float32(NEG_INF))

    # ---- stage 1: self attention (fused [H,3H] QKV dot) + residual + LN ----
    qkv = jnp.dot(x.astype(jnp.bfloat16), wqkv_s_ref[...],
                  preferred_element_type=jnp.float32) + bqkv_s_ref[...]   # [Lt, 3H]
    proj, _ = _mha_core(qkv[:, :H], qkv[:, H:2 * H], qkv[:, 2 * H:], t_bias,
                        wo_s_ref, n_heads, head_dim,
                        exact_softmax=False, need_attn=False)
    x = _layer_norm(x + proj + bo_s_ref[...], g_s_ref[...], be_s_ref[...])

    # ---- stage 2: cross attention (fused [H,2H] KV dot) + residual + LN ----
    q = jnp.dot(x.astype(jnp.bfloat16), wq_c_ref[...],
                preferred_element_type=jnp.float32) + bq_c_ref[...]       # [Lt, H]
    kv = jnp.dot(enc.astype(jnp.bfloat16), wkv_c_ref[...],
                 preferred_element_type=jnp.float32) + bkv_c_ref[...]     # [Ls, 2H]
    proj, attn = _mha_core(q, kv[:, :H], kv[:, H:], s_bias,
                           wo_c_ref, n_heads, head_dim,
                           exact_softmax=True, need_attn=True)
    attn_ref[0] = attn                       # single [n_heads*Lt, Ls] store
    x = _layer_norm(x + proj + bo_c_ref[...], g_c_ref[...], be_c_ref[...])

    # ---- stage 3: positionwise FF + residual + LN ----
    h1 = jnp.dot(x.astype(jnp.bfloat16), w1_ref[...],
                 preferred_element_type=jnp.float32) + b1_ref[...]        # [Lt, pf]
    h1 = jnp.maximum(h1, 0.0)
    y = jnp.dot(h1.astype(jnp.bfloat16), w2_ref[...],
                preferred_element_type=jnp.float32) + b2_ref[...]         # [Lt, H]
    out_ref[0] = _layer_norm(x + y, g_f_ref[...], be_f_ref[...])


# -----------------------------------------------------------------------------
# Wrapper
# -----------------------------------------------------------------------------
def decoder_layer_forward(trg, enc_src, trg_mask, src_mask, kparams, n_heads):
    """trg [B,Lt,H], enc_src [B,Ls,H], trg_mask [B,1,Lt,Lt], src_mask [B,1,1,Ls]."""
    B, Lt, H = trg.shape
    Ls = enc_src.shape[1]
    head_dim = H // n_heads
    pf = kparams[14].shape[1]               # w1: [H, pf]

    # compact 0/1 masks (free reshapes); additive bias is built in the kernel
    t_mask = trg_mask.reshape(B, Lt, Lt).astype(jnp.float32)
    s_mask = src_mask.reshape(B, 1, Ls).astype(jnp.float32)

    kernel = functools.partial(decoder_layer_kernel,
                               n_heads=n_heads, head_dim=head_dim)

    def cspec(shape):                        # grid-invariant weight/bias block
        return pl.BlockSpec(shape, lambda b, _s=shape: (0,) * len(_s))

    in_specs = [
        pl.BlockSpec((1, Lt, H), lambda b: (b, 0, 0)),
        pl.BlockSpec((1, Ls, H), lambda b: (b, 0, 0)),
        pl.BlockSpec((1, Lt, Lt), lambda b: (b, 0, 0)),
        pl.BlockSpec((1, 1, Ls), lambda b: (b, 0, 0)),
        # self-attention
        cspec((H, 3 * H)), cspec((1, 3 * H)), cspec((H, H)), cspec((1, H)),
        cspec((1, H)), cspec((1, H)),
        # cross-attention
        cspec((H, H)), cspec((1, H)), cspec((H, 2 * H)), cspec((1, 2 * H)),
        cspec((H, H)), cspec((1, H)), cspec((1, H)), cspec((1, H)),
        # feedforward
        cspec((H, pf)), cspec((1, pf)), cspec((pf, H)), cspec((1, H)),
        cspec((1, H)), cspec((1, H)),
    ]
    out_shape = (jax.ShapeDtypeStruct((B, Lt, H), jnp.float32),
                 jax.ShapeDtypeStruct((B, n_heads * Lt, Ls), jnp.float32))
    out_specs = (pl.BlockSpec((1, Lt, H), lambda b: (b, 0, 0)),
                 pl.BlockSpec((1, n_heads * Lt, Ls), lambda b: (b, 0, 0)))

    out, attn = pl.pallas_call(
        kernel,
        out_shape=out_shape,
        grid=(B,),
        in_specs=in_specs,
        out_specs=out_specs,
        compiler_params=pltpu.CompilerParams(dimension_semantics=("parallel",)),
    )(trg, enc_src, t_mask, s_mask, *kparams)

    # free reshape (row-major split of dim 1): [B, n_heads*Lt, Ls] -> [B,nh,Lt,Ls]
    return out, attn.reshape(B, n_heads, Lt, Ls)


# -----------------------------------------------------------------------------
# Parameter init (per-linear, f32) + kernel-layout prep (fused QKV, folded scale)
# -----------------------------------------------------------------------------
def init_params(key, hid_dim, pf_dim):
    keys = jax.random.split(key, 10)

    def lin(k, fan_in, fan_out):
        kw, kb = jax.random.split(k)
        w = jax.random.normal(kw, (fan_in, fan_out), jnp.float32) * 0.05
        b = jax.random.normal(kb, (1, fan_out), jnp.float32) * 0.05
        return w, b

    def mha(ks):
        return {n: lin(k, hid_dim, hid_dim) for n, k in zip("qkvo", ks)}

    def ln():
        return (jnp.ones((1, hid_dim), jnp.float32),
                jnp.zeros((1, hid_dim), jnp.float32))

    return {
        "self_attn": mha(keys[0:4]),
        "enc_attn": mha(keys[4:8]),
        "ff": {"fc1": lin(keys[8], hid_dim, pf_dim),
               "fc2": lin(keys[9], pf_dim, hid_dim)},
        "ln_self": ln(), "ln_enc": ln(), "ln_ff": ln(),
    }


def prepare_kernel_params(params, hid_dim, n_heads):
    """Fuse QKV / KV, fold 1/sqrt(head_dim) into Q, cast MXU operands to bf16."""
    head_dim = hid_dim // n_heads
    inv_scale = 1.0 / float(head_dim) ** 0.5
    bf = lambda w: w.astype(jnp.bfloat16)

    sa, ea, ff = params["self_attn"], params["enc_attn"], params["ff"]
    (wq_s, bq_s), (wk_s, bk_s), (wv_s, bv_s), (wo_s, bo_s) = (sa[n] for n in "qkvo")
    (wq_c, bq_c), (wk_c, bk_c), (wv_c, bv_c), (wo_c, bo_c) = (ea[n] for n in "qkvo")
    (w1, b1), (w2, b2) = ff["fc1"], ff["fc2"]

    wqkv_s = bf(jnp.concatenate([wq_s * inv_scale, wk_s, wv_s], axis=1))
    bqkv_s = jnp.concatenate([bq_s * inv_scale, bk_s, bv_s], axis=1)
    wkv_c = bf(jnp.concatenate([wk_c, wv_c], axis=1))
    bkv_c = jnp.concatenate([bk_c, bv_c], axis=1)

    g_s, be_s = params["ln_self"]
    g_c, be_c = params["ln_enc"]
    g_f, be_f = params["ln_ff"]

    return (wqkv_s, bqkv_s, bf(wo_s), bo_s, g_s, be_s,
            bf(wq_c * inv_scale), bq_c * inv_scale, wkv_c, bkv_c, bf(wo_c), bo_c,
            g_c, be_c,
            bf(w1), b1, bf(w2), b2, g_f, be_f)


if __name__ == "__main__":
    B, Lt, Ls = 2, 16, 16
    hid_dim, n_heads, pf_dim = 128, 4, 256
    assert hid_dim % n_heads == 0

    key = jax.random.PRNGKey(0)
    k_trg, k_enc, k_param = jax.random.split(key, 3)

    trg = jax.random.normal(k_trg, (B, Lt, hid_dim), jnp.float32)
    enc_src = jax.random.normal(k_enc, (B, Ls, hid_dim), jnp.float32)

    # causal target mask [B,1,Lt,Lt]; full source mask [B,1,1,Ls]
    trg_mask = jnp.broadcast_to(
        jnp.tril(jnp.ones((Lt, Lt), jnp.float32))[None, None], (B, 1, Lt, Lt))
    src_mask = jnp.ones((B, 1, 1, Ls), jnp.float32)

    params = init_params(k_param, hid_dim, pf_dim)
    kparams = prepare_kernel_params(params, hid_dim, n_heads)

    fwd = jax.jit(functools.partial(decoder_layer_forward, n_heads=n_heads))
    out, attention = fwd(trg, enc_src, trg_mask, src_mask, kparams)
    out = jax.block_until_ready(out)
    attention = jax.block_until_ready(attention)

    assert out.shape == (B, Lt, hid_dim)
    assert attention.shape == (B, n_heads, Lt, Ls)
    assert bool(jnp.all(jnp.isfinite(out)))
    assert bool(jnp.all(jnp.isfinite(attention)))
    # returned (cross) attention rows must sum to 1 (exact-softmax path)
    assert bool(jnp.all(jnp.abs(jnp.sum(attention, axis=-1) - 1.0) < 1e-4))
    print("KERNEL_OK")
</pallas_src>

<mosaic_0001>
module attributes {stable_mosaic.version = 11 : i64} {
  func.func @decoder_layer_kernel(%arg0: i32, %arg1: memref<1x16x128xf32, #tpu.memory_space<vmem>>, %arg2: memref<1x16x128xf32, #tpu.memory_space<vmem>>, %arg3: memref<1x16x16xf32, #tpu.memory_space<vmem>>, %arg4: memref<1x1x16xf32, #tpu.memory_space<vmem>>, %arg5: memref<128x384xbf16, #tpu.memory_space<vmem>>, %arg6: memref<1x384xf32, #tpu.memory_space<vmem>>, %arg7: memref<128x128xbf16, #tpu.memory_space<vmem>>, %arg8: memref<1x128xf32, #tpu.memory_space<vmem>>, %arg9: memref<1x128xf32, #tpu.memory_space<vmem>>, %arg10: memref<1x128xf32, #tpu.memory_space<vmem>>, %arg11: memref<128x128xbf16, #tpu.memory_space<vmem>>, %arg12: memref<1x128xf32, #tpu.memory_space<vmem>>, %arg13: memref<128x256xbf16, #tpu.memory_space<vmem>>, %arg14: memref<1x256xf32, #tpu.memory_space<vmem>>, %arg15: memref<128x128xbf16, #tpu.memory_space<vmem>>, %arg16: memref<1x128xf32, #tpu.memory_space<vmem>>, %arg17: memref<1x128xf32, #tpu.memory_space<vmem>>, %arg18: memref<1x128xf32, #tpu.memory_space<vmem>>, %arg19: memref<128x256xbf16, #tpu.memory_space<vmem>>, %arg20: memref<1x256xf32, #tpu.memory_space<vmem>>, %arg21: memref<256x128xbf16, #tpu.memory_space<vmem>>, %arg22: memref<1x128xf32, #tpu.memory_space<vmem>>, %arg23: memref<1x128xf32, #tpu.memory_space<vmem>>, %arg24: memref<1x128xf32, #tpu.memory_space<vmem>>, %arg25: memref<1x16x128xf32, #tpu.memory_space<vmem>>, %arg26: memref<1x64x16xf32, #tpu.memory_space<vmem>>) attributes {dimension_semantics = [#tpu.dimension_semantics<parallel>], iteration_bounds = array<i64: 2>, scalar_prefetch = 0 : i64, scratch_operands = 0 : i64, tpu.core_type = #tpu.core_type<tc>, window_params = [{transform_indices = @transform_0, window_bounds = array<i64: 1, 16, 128>}, {transform_indices = @transform_1, window_bounds = array<i64: 1, 16, 128>}, {transform_indices = @transform_2, window_bounds = array<i64: 1, 16, 16>}, {transform_indices = @transform_3, window_bounds = array<i64: 1, 1, 16>}, {pipeline_mode = #tpu.pipeline_mode<synchronous>, transform_indices = @transform_4, window_bounds = array<i64: 128, 384>}, {pipeline_mode = #tpu.pipeline_mode<synchronous>, transform_indices = @transform_5, window_bounds = array<i64: 1, 384>}, {pipeline_mode = #tpu.pipeline_mode<synchronous>, transform_indices = @transform_6, window_bounds = array<i64: 128, 128>}, {pipeline_mode = #tpu.pipeline_mode<synchronous>, transform_indices = @transform_7, window_bounds = array<i64: 1, 128>}, {pipeline_mode = #tpu.pipeline_mode<synchronous>, transform_indices = @transform_8, window_bounds = array<i64: 1, 128>}, {pipeline_mode = #tpu.pipeline_mode<synchronous>, transform_indices = @transform_9, window_bounds = array<i64: 1, 128>}, {pipeline_mode = #tpu.pipeline_mode<synchronous>, transform_indices = @transform_10, window_bounds = array<i64: 128, 128>}, {pipeline_mode = #tpu.pipeline_mode<synchronous>, transform_indices = @transform_11, window_bounds = array<i64: 1, 128>}, {pipeline_mode = #tpu.pipeline_mode<synchronous>, transform_indices = @transform_12, window_bounds = array<i64: 128, 256>}, {pipeline_mode = #tpu.pipeline_mode<synchronous>, transform_indices = @transform_13, window_bounds = array<i64: 1, 256>}, {pipeline_mode = #tpu.pipeline_mode<synchronous>, transform_indices = @transform_14, window_bounds = array<i64: 128, 128>}, {pipeline_mode = #tpu.pipeline_mode<synchronous>, transform_indices = @transform_15, window_bounds = array<i64: 1, 128>}, {pipeline_mode = #tpu.pipeline_mode<synchronous>, transform_indices = @transform_16, window_bounds = array<i64: 1, 128>}, {pipeline_mode = #tpu.pipeline_mode<synchronous>, transform_indices = @transform_17, window_bounds = array<i64: 1, 128>}, {pipeline_mode = #tpu.pipeline_mode<synchronous>, transform_indices = @transform_18, window_bounds = array<i64: 128, 256>}, {pipeline_mode = #tpu.pipeline_mode<synchronous>, transform_indices = @transform_19, window_bounds = array<i64: 1, 256>}, {pipeline_mode = #tpu.pipeline_mode<synchronous>, transform_indices = @transform_20, window_bounds = array<i64: 256, 128>}, {pipeline_mode = #tpu.pipeline_mode<synchronous>, transform_indices = @transform_21, window_bounds = array<i64: 1, 128>}, {pipeline_mode = #tpu.pipeline_mode<synchronous>, transform_indices = @transform_22, window_bounds = array<i64: 1, 128>}, {pipeline_mode = #tpu.pipeline_mode<synchronous>, transform_indices = @transform_23, window_bounds = array<i64: 1, 128>}, {transform_indices = @transform_24, window_bounds = array<i64: 1, 16, 128>}, {transform_indices = @transform_25, window_bounds = array<i64: 1, 64, 16>}]} {
    %c0 = arith.constant 0 : index
    %c0_0 = arith.constant 0 : index
    %c0_1 = arith.constant 0 : index
    %0 = vector.load %arg1[%c0, %c0_0, %c0_1] : memref<1x16x128xf32, #tpu.memory_space<vmem>>, vector<1x16x128xf32>
    %1 = vector.shape_cast %0 : vector<1x16x128xf32> to vector<16x128xf32>
    %c0_2 = arith.constant 0 : index
    %c0_3 = arith.constant 0 : index
    %c0_4 = arith.constant 0 : index
    %2 = vector.load %arg2[%c0_2, %c0_3, %c0_4] : memref<1x16x128xf32, #tpu.memory_space<vmem>>, vector<1x16x128xf32>
    %3 = vector.shape_cast %2 : vector<1x16x128xf32> to vector<16x128xf32>
    %c0_5 = arith.constant 0 : index
    %c0_6 = arith.constant 0 : index
    %c0_7 = arith.constant 0 : index
    %4 = vector.load %arg3[%c0_5, %c0_6, %c0_7] : memref<1x16x16xf32, #tpu.memory_space<vmem>>, vector<1x16x16xf32>
    %5 = vector.shape_cast %4 : vector<1x16x16xf32> to vector<16x16xf32>
    %cst = arith.constant 0.000000e+00 : f32
    %6 = vector.broadcast %cst : f32 to vector<16x16xf32>
    %7 = arith.cmpf one, %5, %6 : vector<16x16xf32>
    %cst_8 = arith.constant 0.000000e+00 : f32
    %cst_9 = arith.constant -1.000000e+10 : f32
    %8 = vector.broadcast %cst_8 : f32 to vector<16x16xf32>
    %9 = vector.broadcast %cst_9 : f32 to vector<16x16xf32>
    %10 = arith.select %7, %8, %9 : vector<16x16xi1>, vector<16x16xf32>
    %c0_10 = arith.constant 0 : index
    %c0_11 = arith.constant 0 : index
    %c0_12 = arith.constant 0 : index
    %11 = vector.load %arg4[%c0_10, %c0_11, %c0_12] : memref<1x1x16xf32, #tpu.memory_space<vmem>>, vector<1x1x16xf32>
    %12 = vector.shape_cast %11 : vector<1x1x16xf32> to vector<1x16xf32>
    %cst_13 = arith.constant 0.000000e+00 : f32
    %13 = vector.broadcast %cst_13 : f32 to vector<1x16xf32>
    %14 = arith.cmpf one, %12, %13 : vector<1x16xf32>
    %cst_14 = arith.constant 0.000000e+00 : f32
    %cst_15 = arith.constant -1.000000e+10 : f32
    %15 = vector.broadcast %cst_14 : f32 to vector<1x16xf32>
    %16 = vector.broadcast %cst_15 : f32 to vector<1x16xf32>
    %17 = arith.select %14, %15, %16 : vector<1x16xi1>, vector<1x16xf32>
    %18 = arith.truncf %1 : vector<16x128xf32> to vector<16x128xbf16>
    %c0_16 = arith.constant 0 : index
    %c0_17 = arith.constant 0 : index
    %19 = vector.load %arg5[%c0_16, %c0_17] : memref<128x384xbf16, #tpu.memory_space<vmem>>, vector<128x384xbf16>
    %cst_18 = arith.constant dense<0.000000e+00> : vector<16x384xf32>
    %20 = tpu.matmul %18, %19, %cst_18 {dimension_numbers = #tpu.dot_dimension_numbers<[1], [0], [0], [1], [0, 0, 1, 1], [], []>} : vector<16x128xbf16>, vector<128x384xbf16>, vector<16x384xf32> -> vector<16x384xf32>
    %c0_19 = arith.constant 0 : index
    %c0_20 = arith.constant 0 : index
    %21 = vector.load %arg6[%c0_19, %c0_20] : memref<1x384xf32, #tpu.memory_space<vmem>>, vector<1x384xf32>
    %22 = vector.broadcast %21 : vector<1x384xf32> to vector<16x384xf32>
    %23 = arith.addf %20, %22 : vector<16x384xf32>
    %24 = vector.extract_strided_slice %23 {offsets = [0, 0], sizes = [16, 128], strides = [1, 1]} : vector<16x384xf32> to vector<16x128xf32>
    %25 = vector.extract_strided_slice %23 {offsets = [0, 128], sizes = [16, 128], strides = [1, 1]} : vector<16x384xf32> to vector<16x128xf32>
    %26 = vector.extract_strided_slice %23 {offsets = [0, 256], sizes = [16, 128], strides = [1, 1]} : vector<16x384xf32> to vector<16x128xf32>
    %27 = arith.truncf %24 : vector<16x128xf32> to vector<16x128xbf16>
    %28 = arith.truncf %25 : vector<16x128xf32> to vector<16x128xbf16>
    %29 = arith.truncf %26 : vector<16x128xf32> to vector<16x128xbf16>
    %30 = vector.extract_strided_slice %27 {offsets = [0, 0], sizes = [16, 32], strides = [1, 1]} : vector<16x128xbf16> to vector<16x32xbf16>
    %31 = vector.extract_strided_slice %28 {offsets = [0, 0], sizes = [16, 32], strides = [1, 1]} : vector<16x128xbf16> to vector<16x32xbf16>
    %cst_21 = arith.constant dense<0.000000e+00> : vector<16x16xf32>
    %32 = tpu.matmul %30, %31, %cst_21 {dimension_numbers = #tpu.dot_dimension_numbers<[1], [1], [0], [0], [0, 0, 1, 0], [], []>} : vector<16x32xbf16>, vector<16x32xbf16>, vector<16x16xf32> -> vector<16x16xf32>
    %33 = arith.addf %32, %10 : vector<16x16xf32>
    %cst_22 = arith.constant dense<0xFF800000> : vector<16xf32>
    %34 = vector.multi_reduction <maximumf>, %33, %cst_22 [1] : vector<16x16xf32> to vector<16xf32>
    %35 = vector.shape_cast %34 : vector<16xf32> to vector<16x1xf32>
    %36 = vector.broadcast %35 : vector<16x1xf32> to vector<16x16xf32>
    %37 = arith.subf %33, %36 : vector<16x16xf32>
    %38 = math.exp %37 : vector<16x16xf32>
    %cst_23 = arith.constant dense<0.000000e+00> : vector<16xf32>
    %39 = vector.multi_reduction <add>, %38, %cst_23 [1] : vector<16x16xf32> to vector<16xf32>
    %40 = vector.shape_cast %39 : vector<16xf32> to vector<16x1xf32>
    %41 = tpu.reciprocal %40 {approx = true} : vector<16x1xf32> -> vector<16x1xf32>
    %42 = vector.broadcast %41 : vector<16x1xf32> to vector<16x16xf32>
    %43 = arith.mulf %38, %42 : vector<16x16xf32>
    %44 = arith.truncf %43 : vector<16x16xf32> to vector<16x16xbf16>
    %45 = vector.extract_strided_slice %29 {offsets = [0, 0], sizes = [16, 32], strides = [1, 1]} : vector<16x128xbf16> to vector<16x32xbf16>
    %cst_24 = arith.constant dense<0.000000e+00> : vector<16x32xf32>
    %46 = tpu.matmul %44, %45, %cst_24 {dimension_numbers = #tpu.dot_dimension_numbers<[1], [0], [0], [1], [0, 0, 1, 1], [], []>} : vector<16x16xbf16>, vector<16x32xbf16>, vector<16x32xf32> -> vector<16x32xf32>
    %47 = arith.truncf %46 : vector<16x32xf32> to vector<16x32xbf16>
    %c0_25 = arith.constant 0 : index
    %c0_26 = arith.constant 0 : index
    %48 = vector.load %arg7[%c0_25, %c0_26] : memref<128x128xbf16, #tpu.memory_space<vmem>>, vector<32x128xbf16>
    %cst_27 = arith.constant dense<0.000000e+00> : vector<16x128xf32>
    %49 = tpu.matmul %47, %48, %cst_27 {dimension_numbers = #tpu.dot_dimension_numbers<[1], [0], [0], [1], [0, 0, 1, 1], [], []>} : vector<16x32xbf16>, vector<32x128xbf16>, vector<16x128xf32> -> vector<16x128xf32>
    %50 = vector.extract_strided_slice %27 {offsets = [0, 32], sizes = [16, 32], strides = [1, 1]} : vector<16x128xbf16> to vector<16x32xbf16>
    %51 = vector.extract_strided_slice %28 {offsets = [0, 32], sizes = [16, 32], strides = [1, 1]} : vector<16x128xbf16> to vector<16x32xbf16>
    %cst_28 = arith.constant dense<0.000000e+00> : vector<16x16xf32>
    %52 = tpu.matmul %50, %51, %cst_28 {dimension_numbers = #tpu.dot_dimension_numbers<[1], [1], [0], [0], [0, 0, 1, 0], [], []>} : vector<16x32xbf16>, vector<16x32xbf16>, vector<16x16xf32> -> vector<16x16xf32>
    %53 = arith.addf %52, %10 : vector<16x16xf32>
    %cst_29 = arith.constant dense<0xFF800000> : vector<16xf32>
    %54 = vector.multi_reduction <maximumf>, %53, %cst_29 [1] : vector<16x16xf32> to vector<16xf32>
    %55 = vector.shape_cast %54 : vector<16xf32> to vector<16x1xf32>
    %56 = vector.broadcast %55 : vector<16x1xf32> to vector<16x16xf32>
    %57 = arith.subf %53, %56 : vector<16x16xf32>
    %58 = math.exp %57 : vector<16x16xf32>
    %cst_30 = arith.constant dense<0.000000e+00> : vector<16xf32>
    %59 = vector.multi_reduction <add>, %58, %cst_30 [1] : vector<16x16xf32> to vector<16xf32>
    %60 = vector.shape_cast %59 : vector<16xf32> to vector<16x1xf32>
    %61 = tpu.reciprocal %60 {approx = true} : vector<16x1xf32> -> vector<16x1xf32>
    %62 = vector.broadcast %61 : vector<16x1xf32> to vector<16x16xf32>
    %63 = arith.mulf %58, %62 : vector<16x16xf32>
    %64 = arith.truncf %63 : vector<16x16xf32> to vector<16x16xbf16>
    %65 = vector.extract_strided_slice %29 {offsets = [0, 32], sizes = [16, 32], strides = [1, 1]} : vector<16x128xbf16> to vector<16x32xbf16>
    %cst_31 = arith.constant dense<0.000000e+00> : vector<16x32xf32>
    %66 = tpu.matmul %64, %65, %cst_31 {dimension_numbers = #tpu.dot_dimension_numbers<[1], [0], [0], [1], [0, 0, 1, 1], [], []>} : vector<16x16xbf16>, vector<16x32xbf16>, vector<16x32xf32> -> vector<16x32xf32>
    %67 = arith.truncf %66 : vector<16x32xf32> to vector<16x32xbf16>
    %c32 = arith.constant 32 : index
    %c0_32 = arith.constant 0 : index
    %68 = vector.load %arg7[%c32, %c0_32] : memref<128x128xbf16, #tpu.memory_space<vmem>>, vector<32x128xbf16>
    %cst_33 = arith.constant dense<0.000000e+00> : vector<16x128xf32>
    %69 = tpu.matmul %67, %68, %cst_33 {dimension_numbers = #tpu.dot_dimension_numbers<[1], [0], [0], [1], [0, 0, 1, 1], [], []>} : vector<16x32xbf16>, vector<32x128xbf16>, vector<16x128xf32> -> vector<16x128xf32>
    %70 = arith.addf %49, %69 : vector<16x128xf32>
    %71 = vector.extract_strided_slice %27 {offsets = [0, 64], sizes = [16, 32], strides = [1, 1]} : vector<16x128xbf16> to vector<16x32xbf16>
    %72 = vector.extract_strided_slice %28 {offsets = [0, 64], sizes = [16, 32], strides = [1, 1]} : vector<16x128xbf16> to vector<16x32xbf16>
    %cst_34 = arith.constant dense<0.000000e+00> : vector<16x16xf32>
    %73 = tpu.matmul %71, %72, %cst_34 {dimension_numbers = #tpu.dot_dimension_numbers<[1], [1], [0], [0], [0, 0, 1, 0], [], []>} : vector<16x32xbf16>, vector<16x32xbf16>, vector<16x16xf32> -> vector<16x16xf32>
    %74 = arith.addf %73, %10 : vector<16x16xf32>
    %cst_35 = arith.constant dense<0xFF800000> : vector<16xf32>
    %75 = vector.multi_reduction <maximumf>, %74, %cst_35 [1] : vector<16x16xf32> to vector<16xf32>
    %76 = vector.shape_cast %75 : vector<16xf32> to vector<16x1xf32>
    %77 = vector.broadcast %76 : vector<16x1xf32> to vector<16x16xf32>
    %78 = arith.subf %74, %77 : vector<16x16xf32>
    %79 = math.exp %78 : vector<16x16xf32>
    %cst_36 = arith.constant dense<0.000000e+00> : vector<16xf32>
    %80 = vector.multi_reduction <add>, %79, %cst_36 [1] : vector<16x16xf32> to vector<16xf32>
    %81 = vector.shape_cast %80 : vector<16xf32> to vector<16x1xf32>
    %82 = tpu.reciprocal %81 {approx = true} : vector<16x1xf32> -> vector<16x1xf32>
    %83 = vector.broadcast %82 : vector<16x1xf32> to vector<16x16xf32>
    %84 = arith.mulf %79, %83 : vector<16x16xf32>
    %85 = arith.truncf %84 : vector<16x16xf32> to vector<16x16xbf16>
    %86 = vector.extract_strided_slice %29 {offsets = [0, 64], sizes = [16, 32], strides = [1, 1]} : vector<16x128xbf16> to vector<16x32xbf16>
    %cst_37 = arith.constant dense<0.000000e+00> : vector<16x32xf32>
    %87 = tpu.matmul %85, %86, %cst_37 {dimension_numbers = #tpu.dot_dimension_numbers<[1], [0], [0], [1], [0, 0, 1, 1], [], []>} : vector<16x16xbf16>, vector<16x32xbf16>, vector<16x32xf32> -> vector<16x32xf32>
    %88 = arith.truncf %87 : vector<16x32xf32> to vector<16x32xbf16>
    %c64 = arith.constant 64 : index
    %c0_38 = arith.constant 0 : index
    %89 = vector.load %arg7[%c64, %c0_38] : memref<128x128xbf16, #tpu.memory_space<vmem>>, vector<32x128xbf16>
    %cst_39 = arith.constant dense<0.000000e+00> : vector<16x128xf32>
    %90 = tpu.matmul %88, %89, %cst_39 {dimension_numbers = #tpu.dot_dimension_numbers<[1], [0], [0], [1], [0, 0, 1, 1], [], []>} : vector<16x32xbf16>, vector<32x128xbf16>, vector<16x128xf32> -> vector<16x128xf32>
    %91 = arith.addf %70, %90 : vector<16x128xf32>
    %92 = vector.extract_strided_slice %27 {offsets = [0, 96], sizes = [16, 32], strides = [1, 1]} : vector<16x128xbf16> to vector<16x32xbf16>
    %93 = vector.extract_strided_slice %28 {offsets = [0, 96], sizes = [16, 32], strides = [1, 1]} : vector<16x128xbf16> to vector<16x32xbf16>
    %cst_40 = arith.constant dense<0.000000e+00> : vector<16x16xf32>
    %94 = tpu.matmul %92, %93, %cst_40 {dimension_numbers = #tpu.dot_dimension_numbers<[1], [1], [0], [0], [0, 0, 1, 0], [], []>} : vector<16x32xbf16>, vector<16x32xbf16>, vector<16x16xf32> -> vector<16x16xf32>
    %95 = arith.addf %94, %10 : vector<16x16xf32>
    %cst_41 = arith.constant dense<0xFF800000> : vector<16xf32>
    %96 = vector.multi_reduction <maximumf>, %95, %cst_41 [1] : vector<16x16xf32> to vector<16xf32>
    %97 = vector.shape_cast %96 : vector<16xf32> to vector<16x1xf32>
    %98 = vector.broadcast %97 : vector<16x1xf32> to vector<16x16xf32>
    %99 = arith.subf %95, %98 : vector<16x16xf32>
    %100 = math.exp %99 : vector<16x16xf32>
    %cst_42 = arith.constant dense<0.000000e+00> : vector<16xf32>
    %101 = vector.multi_reduction <add>, %100, %cst_42 [1] : vector<16x16xf32> to vector<16xf32>
    %102 = vector.shape_cast %101 : vector<16xf32> to vector<16x1xf32>
    %103 = tpu.reciprocal %102 {approx = true} : vector<16x1xf32> -> vector<16x1xf32>
    %104 = vector.broadcast %103 : vector<16x1xf32> to vector<16x16xf32>
    %105 = arith.mulf %100, %104 : vector<16x16xf32>
    %106 = arith.truncf %105 : vector<16x16xf32> to vector<16x16xbf16>
    %107 = vector.extract_strided_slice %29 {offsets = [0, 96], sizes = [16, 32], strides = [1, 1]} : vector<16x128xbf16> to vector<16x32xbf16>
    %cst_43 = arith.constant dense<0.000000e+00> : vector<16x32xf32>
    %108 = tpu.matmul %106, %107, %cst_43 {dimension_numbers = #tpu.dot_dimension_numbers<[1], [0], [0], [1], [0, 0, 1, 1], [], []>} : vector<16x16xbf16>, vector<16x32xbf16>, vector<16x32xf32> -> vector<16x32xf32>
    %109 = arith.truncf %108 : vector<16x32xf32> to vector<16x32xbf16>
    %c96 = arith.constant 96 : index
    %c0_44 = arith.constant 0 : index
    %110 = vector.load %arg7[%c96, %c0_44] : memref<128x128xbf16, #tpu.memory_space<vmem>>, vector<32x128xbf16>
    %cst_45 = arith.constant dense<0.000000e+00> : vector<16x128xf32>
    %111 = tpu.matmul %109, %110, %cst_45 {dimension_numbers = #tpu.dot_dimension_numbers<[1], [0], [0], [1], [0, 0, 1, 1], [], []>} : vector<16x32xbf16>, vector<32x128xbf16>, vector<16x128xf32> -> vector<16x128xf32>
    %112 = arith.addf %91, %111 : vector<16x128xf32>
    %113 = arith.addf %1, %112 : vector<16x128xf32>
    %c0_46 = arith.constant 0 : index
    %c0_47 = arith.constant 0 : index
    %114 = vector.load %arg8[%c0_46, %c0_47] : memref<1x128xf32, #tpu.memory_space<vmem>>, vector<1x128xf32>
    %115 = vector.broadcast %114 : vector<1x128xf32> to vector<16x128xf32>
    %116 = arith.addf %113, %115 : vector<16x128xf32>
    %c0_48 = arith.constant 0 : index
    %c0_49 = arith.constant 0 : index
    %117 = vector.load %arg9[%c0_48, %c0_49] : memref<1x128xf32, #tpu.memory_space<vmem>>, vector<1x128xf32>
    %c0_50 = arith.constant 0 : index
    %c0_51 = arith.constant 0 : index
    %118 = vector.load %arg10[%c0_50, %c0_51] : memref<1x128xf32, #tpu.memory_space<vmem>>, vector<1x128xf32>
    %cst_52 = arith.constant dense<0.000000e+00> : vector<16xf32>
    %119 = vector.multi_reduction <add>, %116, %cst_52 [1] : vector<16x128xf32> to vector<16xf32>
    %120 = vector.shape_cast %119 : vector<16xf32> to vector<16x1xf32>
    %cst_53 = arith.constant 1.280000e+02 : f32
    %121 = vector.broadcast %cst_53 : f32 to vector<16x1xf32>
    %122 = arith.divf %120, %121 : vector<16x1xf32>
    %123 = vector.broadcast %122 : vector<16x1xf32> to vector<16x128xf32>
    %124 = arith.subf %116, %123 : vector<16x128xf32>
    %125 = arith.mulf %124, %124 : vector<16x128xf32>
    %cst_54 = arith.constant dense<0.000000e+00> : vector<16xf32>
    %126 = vector.multi_reduction <add>, %125, %cst_54 [1] : vector<16x128xf32> to vector<16xf32>
    %127 = vector.shape_cast %126 : vector<16xf32> to vector<16x1xf32>
    %cst_55 = arith.constant 1.280000e+02 : f32
    %128 = vector.broadcast %cst_55 : f32 to vector<16x1xf32>
    %129 = arith.divf %127, %128 : vector<16x1xf32>
    %130 = vector.broadcast %122 : vector<16x1xf32> to vector<16x128xf32>
    %131 = arith.subf %116, %130 : vector<16x128xf32>
    %cst_56 = arith.constant 9.99999974E-6 : f32
    %132 = vector.broadcast %cst_56 : f32 to vector<16x1xf32>
    %133 = arith.addf %129, %132 : vector<16x1xf32>
    %134 = math.rsqrt %133 : vector<16x1xf32>
    %135 = vector.broadcast %134 : vector<16x1xf32> to vector<16x128xf32>
    %136 = arith.mulf %131, %135 : vector<16x128xf32>
    %137 = vector.broadcast %117 : vector<1x128xf32> to vector<16x128xf32>
    %138 = arith.mulf %136, %137 : vector<16x128xf32>
    %139 = vector.broadcast %118 : vector<1x128xf32> to vector<16x128xf32>
    %140 = arith.addf %138, %139 : vector<16x128xf32>
    %141 = arith.truncf %140 : vector<16x128xf32> to vector<16x128xbf16>
    %c0_57 = arith.constant 0 : index
    %c0_58 = arith.constant 0 : index
    %142 = vector.load %arg11[%c0_57, %c0_58] : memref<128x128xbf16, #tpu.memory_space<vmem>>, vector<128x128xbf16>
    %cst_59 = arith.constant dense<0.000000e+00> : vector<16x128xf32>
    %143 = tpu.matmul %141, %142, %cst_59 {dimension_numbers = #tpu.dot_dimension_numbers<[1], [0], [0], [1], [0, 0, 1, 1], [], []>} : vector<16x128xbf16>, vector<128x128xbf16>, vector<16x128xf32> -> vector<16x128xf32>
    %c0_60 = arith.constant 0 : index
    %c0_61 = arith.constant 0 : index
    %144 = vector.load %arg12[%c0_60, %c0_61] : memref<1x128xf32, #tpu.memory_space<vmem>>, vector<1x128xf32>
    %145 = vector.broadcast %144 : vector<1x128xf32> to vector<16x128xf32>
    %146 = arith.addf %143, %145 : vector<16x128xf32>
    %147 = arith.truncf %3 : vector<16x128xf32> to vector<16x128xbf16>
    %c0_62 = arith.constant 0 : index
    %c0_63 = arith.constant 0 : index
    %148 = vector.load %arg13[%c0_62, %c0_63] : memref<128x256xbf16, #tpu.memory_space<vmem>>, vector<128x256xbf16>
    %cst_64 = arith.constant dense<0.000000e+00> : vector<16x256xf32>
    %149 = tpu.matmul %147, %148, %cst_64 {dimension_numbers = #tpu.dot_dimension_numbers<[1], [0], [0], [1], [0, 0, 1, 1], [], []>} : vector<16x128xbf16>, vector<128x256xbf16>, vector<16x256xf32> -> vector<16x256xf32>
    %c0_65 = arith.constant 0 : index
    %c0_66 = arith.constant 0 : index
    %150 = vector.load %arg14[%c0_65, %c0_66] : memref<1x256xf32, #tpu.memory_space<vmem>>, vector<1x256xf32>
    %151 = vector.broadcast %150 : vector<1x256xf32> to vector<16x256xf32>
    %152 = arith.addf %149, %151 : vector<16x256xf32>
    %153 = vector.extract_strided_slice %152 {offsets = [0, 0], sizes = [16, 128], strides = [1, 1]} : vector<16x256xf32> to vector<16x128xf32>
    %154 = vector.extract_strided_slice %152 {offsets = [0, 128], sizes = [16, 128], strides = [1, 1]} : vector<16x256xf32> to vector<16x128xf32>
    %155 = arith.truncf %146 : vector<16x128xf32> to vector<16x128xbf16>
    %156 = arith.truncf %153 : vector<16x128xf32> to vector<16x128xbf16>
    %157 = arith.truncf %154 : vector<16x128xf32> to vector<16x128xbf16>
    %158 = vector.extract_strided_slice %155 {offsets = [0, 0], sizes = [16, 32], strides = [1, 1]} : vector<16x128xbf16> to vector<16x32xbf16>
    %159 = vector.extract_strided_slice %156 {offsets = [0, 0], sizes = [16, 32], strides = [1, 1]} : vector<16x128xbf16> to vector<16x32xbf16>
    %cst_67 = arith.constant dense<0.000000e+00> : vector<16x16xf32>
    %160 = tpu.matmul %158, %159, %cst_67 {dimension_numbers = #tpu.dot_dimension_numbers<[1], [1], [0], [0], [0, 0, 1, 0], [], []>} : vector<16x32xbf16>, vector<16x32xbf16>, vector<16x16xf32> -> vector<16x16xf32>
    %161 = vector.broadcast %17 : vector<1x16xf32> to vector<16x16xf32>
    %162 = arith.addf %160, %161 : vector<16x16xf32>
    %cst_68 = arith.constant dense<0xFF800000> : vector<16xf32>
    %163 = vector.multi_reduction <maximumf>, %162, %cst_68 [1] : vector<16x16xf32> to vector<16xf32>
    %164 = vector.shape_cast %163 : vector<16xf32> to vector<16x1xf32>
    %165 = vector.broadcast %164 : vector<16x1xf32> to vector<16x16xf32>
    %166 = arith.subf %162, %165 : vector<16x16xf32>
    %167 = math.exp %166 : vector<16x16xf32>
    %cst_69 = arith.constant dense<0.000000e+00> : vector<16xf32>
    %168 = vector.multi_reduction <add>, %167, %cst_69 [1] : vector<16x16xf32> to vector<16xf32>
    %169 = vector.shape_cast %168 : vector<16xf32> to vector<16x1xf32>
    %170 = vector.broadcast %169 : vector<16x1xf32> to vector<16x16xf32>
    %171 = arith.divf %167, %170 : vector<16x16xf32>
    %172 = arith.truncf %171 : vector<16x16xf32> to vector<16x16xbf16>
    %173 = vector.extract_strided_slice %157 {offsets = [0, 0], sizes = [16, 32], strides = [1, 1]} : vector<16x128xbf16> to vector<16x32xbf16>
    %cst_70 = arith.constant dense<0.000000e+00> : vector<16x32xf32>
    %174 = tpu.matmul %172, %173, %cst_70 {dimension_numbers = #tpu.dot_dimension_numbers<[1], [0], [0], [1], [0, 0, 1, 1], [], []>} : vector<16x16xbf16>, vector<16x32xbf16>, vector<16x32xf32> -> vector<16x32xf32>
    %175 = arith.truncf %174 : vector<16x32xf32> to vector<16x32xbf16>
    %c0_71 = arith.constant 0 : index
    %c0_72 = arith.constant 0 : index
    %176 = vector.load %arg15[%c0_71, %c0_72] : memref<128x128xbf16, #tpu.memory_space<vmem>>, vector<32x128xbf16>
    %cst_73 = arith.constant dense<0.000000e+00> : vector<16x128xf32>
    %177 = tpu.matmul %175, %176, %cst_73 {dimension_numbers = #tpu.dot_dimension_numbers<[1], [0], [0], [1], [0, 0, 1, 1], [], []>} : vector<16x32xbf16>, vector<32x128xbf16>, vector<16x128xf32> -> vector<16x128xf32>
    %178 = vector.extract_strided_slice %155 {offsets = [0, 32], sizes = [16, 32], strides = [1, 1]} : vector<16x128xbf16> to vector<16x32xbf16>
    %179 = vector.extract_strided_slice %156 {offsets = [0, 32], sizes = [16, 32], strides = [1, 1]} : vector<16x128xbf16> to vector<16x32xbf16>
    %cst_74 = arith.constant dense<0.000000e+00> : vector<16x16xf32>
    %180 = tpu.matmul %178, %179, %cst_74 {dimension_numbers = #tpu.dot_dimension_numbers<[1], [1], [0], [0], [0, 0, 1, 0], [], []>} : vector<16x32xbf16>, vector<16x32xbf16>, vector<16x16xf32> -> vector<16x16xf32>
    %181 = vector.broadcast %17 : vector<1x16xf32> to vector<16x16xf32>
    %182 = arith.addf %180, %181 : vector<16x16xf32>
    %cst_75 = arith.constant dense<0xFF800000> : vector<16xf32>
    %183 = vector.multi_reduction <maximumf>, %182, %cst_75 [1] : vector<16x16xf32> to vector<16xf32>
    %184 = vector.shape_cast %183 : vector<16xf32> to vector<16x1xf32>
    %185 = vector.broadcast %184 : vector<16x1xf32> to vector<16x16xf32>
    %186 = arith.subf %182, %185 : vector<16x16xf32>
    %187 = math.exp %186 : vector<16x16xf32>
    %cst_76 = arith.constant dense<0.000000e+00> : vector<16xf32>
    %188 = vector.multi_reduction <add>, %187, %cst_76 [1] : vector<16x16xf32> to vector<16xf32>
    %189 = vector.shape_cast %188 : vector<16xf32> to vector<16x1xf32>
    %190 = vector.broadcast %189 : vector<16x1xf32> to vector<16x16xf32>
    %191 = arith.divf %187, %190 : vector<16x16xf32>
    %192 = arith.truncf %191 : vector<16x16xf32> to vector<16x16xbf16>
    %193 = vector.extract_strided_slice %157 {offsets = [0, 32], sizes = [16, 32], strides = [1, 1]} : vector<16x128xbf16> to vector<16x32xbf16>
    %cst_77 = arith.constant dense<0.000000e+00> : vector<16x32xf32>
    %194 = tpu.matmul %192, %193, %cst_77 {dimension_numbers = #tpu.dot_dimension_numbers<[1], [0], [0], [1], [0, 0, 1, 1], [], []>} : vector<16x16xbf16>, vector<16x32xbf16>, vector<16x32xf32> -> vector<16x32xf32>
    %195 = arith.truncf %194 : vector<16x32xf32> to vector<16x32xbf16>
    %c32_78 = arith.constant 32 : index
    %c0_79 = arith.constant 0 : index
    %196 = vector.load %arg15[%c32_78, %c0_79] : memref<128x128xbf16, #tpu.memory_space<vmem>>, vector<32x128xbf16>
    %cst_80 = arith.constant dense<0.000000e+00> : vector<16x128xf32>
    %197 = tpu.matmul %195, %196, %cst_80 {dimension_numbers = #tpu.dot_dimension_numbers<[1], [0], [0], [1], [0, 0, 1, 1], [], []>} : vector<16x32xbf16>, vector<32x128xbf16>, vector<16x128xf32> -> vector<16x128xf32>
    %198 = arith.addf %177, %197 : vector<16x128xf32>
    %199 = vector.extract_strided_slice %155 {offsets = [0, 64], sizes = [16, 32], strides = [1, 1]} : vector<16x128xbf16> to vector<16x32xbf16>
    %200 = vector.extract_strided_slice %156 {offsets = [0, 64], sizes = [16, 32], strides = [1, 1]} : vector<16x128xbf16> to vector<16x32xbf16>
    %cst_81 = arith.constant dense<0.000000e+00> : vector<16x16xf32>
    %201 = tpu.matmul %199, %200, %cst_81 {dimension_numbers = #tpu.dot_dimension_numbers<[1], [1], [0], [0], [0, 0, 1, 0], [], []>} : vector<16x32xbf16>, vector<16x32xbf16>, vector<16x16xf32> -> vector<16x16xf32>
    %202 = vector.broadcast %17 : vector<1x16xf32> to vector<16x16xf32>
    %203 = arith.addf %201, %202 : vector<16x16xf32>
    %cst_82 = arith.constant dense<0xFF800000> : vector<16xf32>
    %204 = vector.multi_reduction <maximumf>, %203, %cst_82 [1] : vector<16x16xf32> to vector<16xf32>
    %205 = vector.shape_cast %204 : vector<16xf32> to vector<16x1xf32>
    %206 = vector.broadcast %205 : vector<16x1xf32> to vector<16x16xf32>
    %207 = arith.subf %203, %206 : vector<16x16xf32>
    %208 = math.exp %207 : vector<16x16xf32>
    %cst_83 = arith.constant dense<0.000000e+00> : vector<16xf32>
    %209 = vector.multi_reduction <add>, %208, %cst_83 [1] : vector<16x16xf32> to vector<16xf32>
    %210 = vector.shape_cast %209 : vector<16xf32> to vector<16x1xf32>
    %211 = vector.broadcast %210 : vector<16x1xf32> to vector<16x16xf32>
    %212 = arith.divf %208, %211 : vector<16x16xf32>
    %213 = arith.truncf %212 : vector<16x16xf32> to vector<16x16xbf16>
    %214 = vector.extract_strided_slice %157 {offsets = [0, 64], sizes = [16, 32], strides = [1, 1]} : vector<16x128xbf16> to vector<16x32xbf16>
    %cst_84 = arith.constant dense<0.000000e+00> : vector<16x32xf32>
    %215 = tpu.matmul %213, %214, %cst_84 {dimension_numbers = #tpu.dot_dimension_numbers<[1], [0], [0], [1], [0, 0, 1, 1], [], []>} : vector<16x16xbf16>, vector<16x32xbf16>, vector<16x32xf32> -> vector<16x32xf32>
    %216 = arith.truncf %215 : vector<16x32xf32> to vector<16x32xbf16>
    %c64_85 = arith.constant 64 : index
    %c0_86 = arith.constant 0 : index
    %217 = vector.load %arg15[%c64_85, %c0_86] : memref<128x128xbf16, #tpu.memory_space<vmem>>, vector<32x128xbf16>
    %cst_87 = arith.constant dense<0.000000e+00> : vector<16x128xf32>
    %218 = tpu.matmul %216, %217, %cst_87 {dimension_numbers = #tpu.dot_dimension_numbers<[1], [0], [0], [1], [0, 0, 1, 1], [], []>} : vector<16x32xbf16>, vector<32x128xbf16>, vector<16x128xf32> -> vector<16x128xf32>
    %219 = arith.addf %198, %218 : vector<16x128xf32>
    %220 = vector.extract_strided_slice %155 {offsets = [0, 96], sizes = [16, 32], strides = [1, 1]} : vector<16x128xbf16> to vector<16x32xbf16>
    %221 = vector.extract_strided_slice %156 {offsets = [0, 96], sizes = [16, 32], strides = [1, 1]} : vector<16x128xbf16> to vector<16x32xbf16>
    %cst_88 = arith.constant dense<0.000000e+00> : vector<16x16xf32>
    %222 = tpu.matmul %220, %221, %cst_88 {dimension_numbers = #tpu.dot_dimension_numbers<[1], [1], [0], [0], [0, 0, 1, 0], [], []>} : vector<16x32xbf16>, vector<16x32xbf16>, vector<16x16xf32> -> vector<16x16xf32>
    %223 = vector.broadcast %17 : vector<1x16xf32> to vector<16x16xf32>
    %224 = arith.addf %222, %223 : vector<16x16xf32>
    %cst_89 = arith.constant dense<0xFF800000> : vector<16xf32>
    %225 = vector.multi_reduction <maximumf>, %224, %cst_89 [1] : vector<16x16xf32> to vector<16xf32>
    %226 = vector.shape_cast %225 : vector<16xf32> to vector<16x1xf32>
    %227 = vector.broadcast %226 : vector<16x1xf32> to vector<16x16xf32>
    %228 = arith.subf %224, %227 : vector<16x16xf32>
    %229 = math.exp %228 : vector<16x16xf32>
    %cst_90 = arith.constant dense<0.000000e+00> : vector<16xf32>
    %230 = vector.multi_reduction <add>, %229, %cst_90 [1] : vector<16x16xf32> to vector<16xf32>
    %231 = vector.shape_cast %230 : vector<16xf32> to vector<16x1xf32>
    %232 = vector.broadcast %231 : vector<16x1xf32> to vector<16x16xf32>
    %233 = arith.divf %229, %232 : vector<16x16xf32>
    %234 = arith.truncf %233 : vector<16x16xf32> to vector<16x16xbf16>
    %235 = vector.extract_strided_slice %157 {offsets = [0, 96], sizes = [16, 32], strides = [1, 1]} : vector<16x128xbf16> to vector<16x32xbf16>
    %cst_91 = arith.constant dense<0.000000e+00> : vector<16x32xf32>
    %236 = tpu.matmul %234, %235, %cst_91 {dimension_numbers = #tpu.dot_dimension_numbers<[1], [0], [0], [1], [0, 0, 1, 1], [], []>} : vector<16x16xbf16>, vector<16x32xbf16>, vector<16x32xf32> -> vector<16x32xf32>
    %237 = arith.truncf %236 : vector<16x32xf32> to vector<16x32xbf16>
    %c96_92 = arith.constant 96 : index
    %c0_93 = arith.constant 0 : index
    %238 = vector.load %arg15[%c96_92, %c0_93] : memref<128x128xbf16, #tpu.memory_space<vmem>>, vector<32x128xbf16>
    %cst_94 = arith.constant dense<0.000000e+00> : vector<16x128xf32>
    %239 = tpu.matmul %237, %238, %cst_94 {dimension_numbers = #tpu.dot_dimension_numbers<[1], [0], [0], [1], [0, 0, 1, 1], [], []>} : vector<16x32xbf16>, vector<32x128xbf16>, vector<16x128xf32> -> vector<16x128xf32>
    %240 = arith.addf %219, %239 : vector<16x128xf32>
    %241 = tpu.concatenate %171, %191, %212, %233 in 0 : vector<16x16xf32>, vector<16x16xf32>, vector<16x16xf32>, vector<16x16xf32> -> vector<64x16xf32>
    %c0_95 = arith.constant 0 : index
    %c0_96 = arith.constant 0 : index
    %c0_97 = arith.constant 0 : index
    %242 = vector.load %arg26[%c0_95, %c0_96, %c0_97] : memref<1x64x16xf32, #tpu.memory_space<vmem>>, vector<1x64x16xf32>
    %243 = vector.shape_cast %242 : vector<1x64x16xf32> to vector<64x16xf32>
    %244 = vector.shape_cast %241 : vector<64x16xf32> to vector<1x64x16xf32>
    tpu.vector_store %arg26[%c0_95, %c0_96, %c0_97], %244 {strides = array<i32>} : memref<1x64x16xf32, #tpu.memory_space<vmem>>, vector<1x64x16xf32>,
    %245 = arith.addf %140, %240 : vector<16x128xf32>
    %c0_98 = arith.constant 0 : index
    %c0_99 = arith.constant 0 : index
    %246 = vector.load %arg16[%c0_98, %c0_99] : memref<1x128xf32, #tpu.memory_space<vmem>>, vector<1x128xf32>
    %247 = vector.broadcast %246 : vector<1x128xf32> to vector<16x128xf32>
    %248 = arith.addf %245, %247 : vector<16x128xf32>
    %c0_100 = arith.constant 0 : index
    %c0_101 = arith.constant 0 : index
    %249 = vector.load %arg17[%c0_100, %c0_101] : memref<1x128xf32, #tpu.memory_space<vmem>>, vector<1x128xf32>
    %c0_102 = arith.constant 0 : index
    %c0_103 = arith.constant 0 : index
    %250 = vector.load %arg18[%c0_102, %c0_103] : memref<1x128xf32, #tpu.memory_space<vmem>>, vector<1x128xf32>
    %cst_104 = arith.constant dense<0.000000e+00> : vector<16xf32>
    %251 = vector.multi_reduction <add>, %248, %cst_104 [1] : vector<16x128xf32> to vector<16xf32>
    %252 = vector.shape_cast %251 : vector<16xf32> to vector<16x1xf32>
    %cst_105 = arith.constant 1.280000e+02 : f32
    %253 = vector.broadcast %cst_105 : f32 to vector<16x1xf32>
    %254 = arith.divf %252, %253 : vector<16x1xf32>
    %255 = vector.broadcast %254 : vector<16x1xf32> to vector<16x128xf32>
    %256 = arith.subf %248, %255 : vector<16x128xf32>
    %257 = arith.mulf %256, %256 : vector<16x128xf32>
    %cst_106 = arith.constant dense<0.000000e+00> : vector<16xf32>
    %258 = vector.multi_reduction <add>, %257, %cst_106 [1] : vector<16x128xf32> to vector<16xf32>
    %259 = vector.shape_cast %258 : vector<16xf32> to vector<16x1xf32>
    %cst_107 = arith.constant 1.280000e+02 : f32
    %260 = vector.broadcast %cst_107 : f32 to vector<16x1xf32>
    %261 = arith.divf %259, %260 : vector<16x1xf32>
    %262 = vector.broadcast %254 : vector<16x1xf32> to vector<16x128xf32>
    %263 = arith.subf %248, %262 : vector<16x128xf32>
    %cst_108 = arith.constant 9.99999974E-6 : f32
    %264 = vector.broadcast %cst_108 : f32 to vector<16x1xf32>
    %265 = arith.addf %261, %264 : vector<16x1xf32>
    %266 = math.rsqrt %265 : vector<16x1xf32>
    %267 = vector.broadcast %266 : vector<16x1xf32> to vector<16x128xf32>
    %268 = arith.mulf %263, %267 : vector<16x128xf32>
    %269 = vector.broadcast %249 : vector<1x128xf32> to vector<16x128xf32>
    %270 = arith.mulf %268, %269 : vector<16x128xf32>
    %271 = vector.broadcast %250 : vector<1x128xf32> to vector<16x128xf32>
    %272 = arith.addf %270, %271 : vector<16x128xf32>
    %273 = arith.truncf %272 : vector<16x128xf32> to vector<16x128xbf16>
    %c0_109 = arith.constant 0 : index
    %c0_110 = arith.constant 0 : index
    %274 = vector.load %arg19[%c0_109, %c0_110] : memref<128x256xbf16, #tpu.memory_space<vmem>>, vector<128x256xbf16>
    %cst_111 = arith.constant dense<0.000000e+00> : vector<16x256xf32>
    %275 = tpu.matmul %273, %274, %cst_111 {dimension_numbers = #tpu.dot_dimension_numbers<[1], [0], [0], [1], [0, 0, 1, 1], [], []>} : vector<16x128xbf16>, vector<128x256xbf16>, vector<16x256xf32> -> vector<16x256xf32>
    %c0_112 = arith.constant 0 : index
    %c0_113 = arith.constant 0 : index
    %276 = vector.load %arg20[%c0_112, %c0_113] : memref<1x256xf32, #tpu.memory_space<vmem>>, vector<1x256xf32>
    %277 = vector.broadcast %276 : vector<1x256xf32> to vector<16x256xf32>
    %278 = arith.addf %275, %277 : vector<16x256xf32>
    %cst_114 = arith.constant 0.000000e+00 : f32
    %279 = vector.broadcast %cst_114 : f32 to vector<16x256xf32>
    %280 = arith.maximumf %278, %279 : vector<16x256xf32>
    %281 = arith.truncf %280 : vector<16x256xf32> to vector<16x256xbf16>
    %c0_115 = arith.constant 0 : index
    %c0_116 = arith.constant 0 : index
    %282 = vector.load %arg21[%c0_115, %c0_116] : memref<256x128xbf16, #tpu.memory_space<vmem>>, vector<256x128xbf16>
    %cst_117 = arith.constant dense<0.000000e+00> : vector<16x128xf32>
    %283 = tpu.matmul %281, %282, %cst_117 {dimension_numbers = #tpu.dot_dimension_numbers<[1], [0], [0], [1], [0, 0, 1, 1], [], []>} : vector<16x256xbf16>, vector<256x128xbf16>, vector<16x128xf32> -> vector<16x128xf32>
    %c0_118 = arith.constant 0 : index
    %c0_119 = arith.constant 0 : index
    %284 = vector.load %arg22[%c0_118, %c0_119] : memref<1x128xf32, #tpu.memory_space<vmem>>, vector<1x128xf32>
    %285 = vector.broadcast %284 : vector<1x128xf32> to vector<16x128xf32>
    %286 = arith.addf %283, %285 : vector<16x128xf32>
    %287 = arith.addf %272, %286 : vector<16x128xf32>
    %c0_120 = arith.constant 0 : index
    %c0_121 = arith.constant 0 : index
    %288 = vector.load %arg23[%c0_120, %c0_121] : memref<1x128xf32, #tpu.memory_space<vmem>>, vector<1x128xf32>
    %c0_122 = arith.constant 0 : index
    %c0_123 = arith.constant 0 : index
    %289 = vector.load %arg24[%c0_122, %c0_123] : memref<1x128xf32, #tpu.memory_space<vmem>>, vector<1x128xf32>
    %cst_124 = arith.constant dense<0.000000e+00> : vector<16xf32>
    %290 = vector.multi_reduction <add>, %287, %cst_124 [1] : vector<16x128xf32> to vector<16xf32>
    %291 = vector.shape_cast %290 : vector<16xf32> to vector<16x1xf32>
    %cst_125 = arith.constant 1.280000e+02 : f32
    %292 = vector.broadcast %cst_125 : f32 to vector<16x1xf32>
    %293 = arith.divf %291, %292 : vector<16x1xf32>
    %294 = vector.broadcast %293 : vector<16x1xf32> to vector<16x128xf32>
    %295 = arith.subf %287, %294 : vector<16x128xf32>
    %296 = arith.mulf %295, %295 : vector<16x128xf32>
    %cst_126 = arith.constant dense<0.000000e+00> : vector<16xf32>
    %297 = vector.multi_reduction <add>, %296, %cst_126 [1] : vector<16x128xf32> to vector<16xf32>
    %298 = vector.shape_cast %297 : vector<16xf32> to vector<16x1xf32>
    %cst_127 = arith.constant 1.280000e+02 : f32
    %299 = vector.broadcast %cst_127 : f32 to vector<16x1xf32>
    %300 = arith.divf %298, %299 : vector<16x1xf32>
    %301 = vector.broadcast %293 : vector<16x1xf32> to vector<16x128xf32>
    %302 = arith.subf %287, %301 : vector<16x128xf32>
    %cst_128 = arith.constant 9.99999974E-6 : f32
    %303 = vector.broadcast %cst_128 : f32 to vector<16x1xf32>
    %304 = arith.addf %300, %303 : vector<16x1xf32>
    %305 = math.rsqrt %304 : vector<16x1xf32>
    %306 = vector.broadcast %305 : vector<16x1xf32> to vector<16x128xf32>
    %307 = arith.mulf %302, %306 : vector<16x128xf32>
    %308 = vector.broadcast %288 : vector<1x128xf32> to vector<16x128xf32>
    %309 = arith.mulf %307, %308 : vector<16x128xf32>
    %310 = vector.broadcast %289 : vector<1x128xf32> to vector<16x128xf32>
    %311 = arith.addf %309, %310 : vector<16x128xf32>
    %c0_129 = arith.constant 0 : index
    %c0_130 = arith.constant 0 : index
    %c0_131 = arith.constant 0 : index
    %312 = vector.load %arg25[%c0_129, %c0_130, %c0_131] : memref<1x16x128xf32, #tpu.memory_space<vmem>>, vector<1x16x128xf32>
    %313 = vector.shape_cast %312 : vector<1x16x128xf32> to vector<16x128xf32>
    %314 = vector.shape_cast %311 : vector<16x128xf32> to vector<1x16x128xf32>
    tpu.vector_store %arg25[%c0_129, %c0_130, %c0_131], %314 {strides = array<i32>} : memref<1x16x128xf32, #tpu.memory_space<vmem>>, vector<1x16x128xf32>,
    return
  }
  func.func @transform_0(%arg0: i32) -> (i32, i32, i32) {
    %c0_i32 = arith.constant 0 : i32
    %c0_i32_0 = arith.constant 0 : i32
    %c0_i32_1 = arith.constant 0 : i32
    return %arg0, %c0_i32, %c0_i32_0 : i32, i32, i32
  }
  func.func @transform_1(%arg0: i32) -> (i32, i32, i32) {
    %c0_i32 = arith.constant 0 : i32
    %c0_i32_0 = arith.constant 0 : i32
    %c0_i32_1 = arith.constant 0 : i32
    return %arg0, %c0_i32, %c0_i32_0 : i32, i32, i32
  }
  func.func @transform_2(%arg0: i32) -> (i32, i32, i32) {
    %c0_i32 = arith.constant 0 : i32
    %c0_i32_0 = arith.constant 0 : i32
    %c0_i32_1 = arith.constant 0 : i32
    return %arg0, %c0_i32, %c0_i32_0 : i32, i32, i32
  }
  func.func @transform_3(%arg0: i32) -> (i32, i32, i32) {
    %c0_i32 = arith.constant 0 : i32
    %c0_i32_0 = arith.constant 0 : i32
    %c0_i32_1 = arith.constant 0 : i32
    return %arg0, %c0_i32, %c0_i32_0 : i32, i32, i32
  }
  func.func @transform_4(%arg0: i32) -> (i32, i32) {
    %c0_i32 = arith.constant 0 : i32
    %c0_i32_0 = arith.constant 0 : i32
    %c0_i32_1 = arith.constant 0 : i32
    return %c0_i32, %c0_i32_0 : i32, i32
  }
  func.func @transform_5(%arg0: i32) -> (i32, i32) {
    %c0_i32 = arith.constant 0 : i32
    %c0_i32_0 = arith.constant 0 : i32
    %c0_i32_1 = arith.constant 0 : i32
    return %c0_i32, %c0_i32_0 : i32, i32
  }
  func.func @transform_6(%arg0: i32) -> (i32, i32) {
    %c0_i32 = arith.constant 0 : i32
    %c0_i32_0 = arith.constant 0 : i32
    %c0_i32_1 = arith.constant 0 : i32
    return %c0_i32, %c0_i32_0 : i32, i32
  }
  func.func @transform_7(%arg0: i32) -> (i32, i32) {
    %c0_i32 = arith.constant 0 : i32
    %c0_i32_0 = arith.constant 0 : i32
    %c0_i32_1 = arith.constant 0 : i32
    return %c0_i32, %c0_i32_0 : i32, i32
  }
  func.func @transform_8(%arg0: i32) -> (i32, i32) {
    %c0_i32 = arith.constant 0 : i32
    %c0_i32_0 = arith.constant 0 : i32
    %c0_i32_1 = arith.constant 0 : i32
    return %c0_i32, %c0_i32_0 : i32, i32
  }
  func.func @transform_9(%arg0: i32) -> (i32, i32) {
    %c0_i32 = arith.constant 0 : i32
    %c0_i32_0 = arith.constant 0 : i32
    %c0_i32_1 = arith.constant 0 : i32
    return %c0_i32, %c0_i32_0 : i32, i32
  }
  func.func @transform_10(%arg0: i32) -> (i32, i32) {
    %c0_i32 = arith.constant 0 : i32
    %c0_i32_0 = arith.constant 0 : i32
    %c0_i32_1 = arith.constant 0 : i32
    return %c0_i32, %c0_i32_0 : i32, i32
  }
  func.func @transform_11(%arg0: i32) -> (i32, i32) {
    %c0_i32 = arith.constant 0 : i32
    %c0_i32_0 = arith.constant 0 : i32
    %c0_i32_1 = arith.constant 0 : i32
    return %c0_i32, %c0_i32_0 : i32, i32
  }
  func.func @transform_12(%arg0: i32) -> (i32, i32) {
    %c0_i32 = arith.constant 0 : i32
    %c0_i32_0 = arith.constant 0 : i32
    %c0_i32_1 = arith.constant 0 : i32
    return %c0_i32, %c0_i32_0 : i32, i32
  }
  func.func @transform_13(%arg0: i32) -> (i32, i32) {
    %c0_i32 = arith.constant 0 : i32
    %c0_i32_0 = arith.constant 0 : i32
    %c0_i32_1 = arith.constant 0 : i32
    return %c0_i32, %c0_i32_0 : i32, i32
  }
  func.func @transform_14(%arg0: i32) -> (i32, i32) {
    %c0_i32 = arith.constant 0 : i32
    %c0_i32_0 = arith.constant 0 : i32
    %c0_i32_1 = arith.constant 0 : i32
    return %c0_i32, %c0_i32_0 : i32, i32
  }
  func.func @transform_15(%arg0: i32) -> (i32, i32) {
    %c0_i32 = arith.constant 0 : i32
    %c0_i32_0 = arith.constant 0 : i32
    %c0_i32_1 = arith.constant 0 : i32
    return %c0_i32, %c0_i32_0 : i32, i32
  }
  func.func @transform_16(%arg0: i32) -> (i32, i32) {
    %c0_i32 = arith.constant 0 : i32
    %c0_i32_0 = arith.constant 0 : i32
    %c0_i32_1 = arith.constant 0 : i32
    return %c0_i32, %c0_i32_0 : i32, i32
  }
  func.func @transform_17(%arg0: i32) -> (i32, i32) {
    %c0_i32 = arith.constant 0 : i32
    %c0_i32_0 = arith.constant 0 : i32
    %c0_i32_1 = arith.constant 0 : i32
    return %c0_i32, %c0_i32_0 : i32, i32
  }
  func.func @transform_18(%arg0: i32) -> (i32, i32) {
    %c0_i32 = arith.constant 0 : i32
    %c0_i32_0 = arith.constant 0 : i32
    %c0_i32_1 = arith.constant 0 : i32
    return %c0_i32, %c0_i32_0 : i32, i32
  }
  func.func @transform_19(%arg0: i32) -> (i32, i32) {
    %c0_i32 = arith.constant 0 : i32
    %c0_i32_0 = arith.constant 0 : i32
    %c0_i32_1 = arith.constant 0 : i32
    return %c0_i32, %c0_i32_0 : i32, i32
  }
  func.func @transform_20(%arg0: i32) -> (i32, i32) {
    %c0_i32 = arith.constant 0 : i32
    %c0_i32_0 = arith.constant 0 : i32
    %c0_i32_1 = arith.constant 0 : i32
    return %c0_i32, %c0_i32_0 : i32, i32
  }
  func.func @transform_21(%arg0: i32) -> (i32, i32) {
    %c0_i32 = arith.constant 0 : i32
    %c0_i32_0 = arith.constant 0 : i32
    %c0_i32_1 = arith.constant 0 : i32
    return %c0_i32, %c0_i32_0 : i32, i32
  }
  func.func @transform_22(%arg0: i32) -> (i32, i32) {
    %c0_i32 = arith.constant 0 : i32
    %c0_i32_0 = arith.constant 0 : i32
    %c0_i32_1 = arith.constant 0 : i32
    return %c0_i32, %c0_i32_0 : i32, i32
  }
  func.func @transform_23(%arg0: i32) -> (i32, i32) {
    %c0_i32 = arith.constant 0 : i32
    %c0_i32_0 = arith.constant 0 : i32
    %c0_i32_1 = arith.constant 0 : i32
    return %c0_i32, %c0_i32_0 : i32, i32
  }
  func.func @transform_24(%arg0: i32) -> (i32, i32, i32) {
    %c0_i32 = arith.constant 0 : i32
    %c0_i32_0 = arith.constant 0 : i32
    %c0_i32_1 = arith.constant 0 : i32
    return %arg0, %c0_i32, %c0_i32_0 : i32, i32, i32
  }
  func.func @transform_25(%arg0: i32) -> (i32, i32, i32) {
    %c0_i32 = arith.constant 0 : i32
    %c0_i32_0 = arith.constant 0 : i32
    %c0_i32_1 = arith.constant 0 : i32
    return %arg0, %c0_i32, %c0_i32_0 : i32, i32, i32
  }
}

</mosaic_0001>

<bundles_post_ra>
// kernel: decoder_layer_forward.1
= control target key start
LH: loop header
LB: loop body
LE: loop exit
PB: predicated region body
PF: predicated region fallthrough
CT: control target
= control target key end

     0   :  { %s5882_s0 = inlined_call_operand.hbm [shape: f32[2,16,128], index: 0, kind: input, shape index: {}]   ;;  %s5883_s1 = inlined_call_operand.hbm [shape: f32[2,16,128], index: 1, kind: input, shape index: {}]   ;;  %s5884_s2 = inlined_call_operand.hbm [shape: f32[2,16,16], index: 2, kind: input, shape index: {}]   ;;  %s5885_s3 = inlined_call_operand.vmem [shape: f32[2,1,16], index: 3, kind: input, shape index: {}]   ;;  %s5886_s4 = inlined_call_operand.hbm [shape: bf16[128,384], index: 4, kind: input, shape index: {}]   ;;  %s5887_s5 = inlined_call_operand.vmem [shape: f32[1,384], index: 5, kind: input, shape index: {}]   ;;  %s5888_s6 = inlined_call_operand.hbm [shape: bf16[128,128], index: 6, kind: input, shape index: {}]   ;;  %s5889_s7 = inlined_call_operand.vmem [shape: f32[1,128], index: 7, kind: input, shape index: {}]   ;;  %s5890_s8 = inlined_call_operand.vmem [shape: f32[1,128], index: 8, kind: input, shape index: {}]   ;;  %s5891_s9 = inlined_call_operand.vmem [shape: f32[1,128], index: 9, kind: input, shape index: {}]   ;;  %s5892_s10 = inlined_call_operand.hbm [shape: bf16[128,128], index: 10, kind: input, shape index: {}]   ;;  %s5893_s11 = inlined_call_operand.vmem [shape: f32[1,128], index: 11, kind: input, shape index: {}]   ;;  %s5894_s12 = inlined_call_operand.hbm [shape: bf16[128,256], index: 12, kind: input, shape index: {}]   ;;  %s5895_s13 = inlined_call_operand.vmem [shape: f32[1,256], index: 13, kind: input, shape index: {}]   ;;  %s5896_s14 = inlined_call_operand.hbm [shape: bf16[128,128], index: 14, kind: input, shape index: {}]   ;;  %s5897_s15 = inlined_call_operand.vmem [shape: f32[1,128], index: 15, kind: input, shape index: {}]   ;;  %s5898_s16 = inlined_call_operand.vmem [shape: f32[1,128], index: 16, kind: input, shape index: {}]   ;;  %s5899_s17 = inlined_call_operand.vmem [shape: f32[1,128], index: 17, kind: input, shape index: {}]   ;;  %s5900_s18 = inlined_call_operand.hbm [shape: bf16[128,256], index: 18, kind: input, shape index: {}]   ;;  %s5901_s19 = inlined_call_operand.vmem [shape: f32[1,256], index: 19, kind: input, shape index: {}]   ;;  %s5902_s20 = inlined_call_operand.hbm [shape: bf16[256,128], index: 20, kind: input, shape index: {}]   ;;  %s5903_s21 = inlined_call_operand.vmem [shape: f32[1,128], index: 21, kind: input, shape index: {}]   ;;  %s5904_s22 = inlined_call_operand.vmem [shape: f32[1,128], index: 22, kind: input, shape index: {}]   ;;  %s5905_s23 = inlined_call_operand.vmem [shape: f32[1,128], index: 23, kind: input, shape index: {}]   ;;  %s5906_s24 = inlined_call_operand.hbm [shape: f32[2,16,128], index: 24, kind: output, shape index: {0}]   ;;  %s5907_s25 = inlined_call_operand.hbm [shape: f32[2,64,16], index: 25, kind: output, shape index: {1}]  }
   0x1   :  { %5938 = sst [smem:[#allocation36_spill]] %s5882_s0 }
   0x2   :  { %5939 = sst [smem:[#allocation37_spill]] %s5883_s1 }
   0x3   :  { %5940 = sst [smem:[#allocation38_spill]] %s5884_s2 }
   0x4   :  { %5941 = sst [smem:[#allocation39_spill]] %s5885_s3 }
   0x5   :  { %5942 = sst [smem:[#allocation40_spill]] %s5886_s4 }
   0x6   :  { %5943 = sst [smem:[#allocation41_spill]] %s5887_s5 }
   0x7   :  { %5944 = sst [smem:[#allocation42_spill]] %s5888_s6 }
   0x8   :  { %5945 = sst [smem:[#allocation43_spill]] %s5889_s7 }
   0x9   :  { %5946 = sst [smem:[#allocation44_spill]] %s5890_s8 }
   0xa   :  { %5947 = sst [smem:[#allocation45_spill]] %s5891_s9 }
   0xb   :  { %5948 = sst [smem:[#allocation46_spill]] %s5892_s10 }
   0xc   :  { %5949 = sst [smem:[#allocation47_spill]] %s5896_s14 }
   0xd   :  { %5950 = sst [smem:[#allocation48_spill]] %s5898_s16 }
   0xe   :  { %5951 = sst [smem:[#allocation49_spill]] %s5899_s17 }
   0xf   :  { %5952 = sst [smem:[#allocation50_spill]] %s5901_s19 }
  0x10   :  { %5953 = sst [smem:[#allocation51_spill]] %s5903_s21 }
  0x11   :  { %5954 = sst [smem:[#allocation52_spill]] %s5904_s22 }
  0x12   :  { %5955 = sst [smem:[#allocation53_spill]] %s5905_s23 }
  0x13   :  { %5956 = sst [smem:[#allocation54_spill]] %s5906_s24 }
  0x14   :  { %5957 = sst [smem:[#allocation55_spill]] %s5907_s25 }
  0x15   :  { %31 = vsyncpa [#allocation3], 0 }
  0x16   :  { %33 = vsyncpa [#allocation3 + $0x1], 0 }
  0x17   :  { %34 = vsyncpa [#allocation6], 0 }
  0x18   :  { %36 = vsyncpa [#allocation6 + $0x1], 0 }
  0x19   :  { %37 = vsyncpa [#allocation9], 0 }
  0x1a   :  { %38 = vsyncpa [#allocation12], 0 }
  0x1b   :  { %39 = vsyncpa [#allocation15], 0 }
  0x1c   :  { %40 = vsyncpa [#allocation18], 0 }
  0x1d   :  { %41 = vsyncpa [#allocation4], 0 }
  0x1e   :  { %43 = vsyncpa [#allocation4 + $0x1], 0 }
  0x1f   :  { %44 = vsyncpa [#allocation21], 0 }
  0x20   :  { %46 = vsyncpa [#allocation21 + $0x1], 0  ;;  %s5099_s29 = smov 0   ;;  %s5101_s2 = smov 0  }
  0x21   :  { %s5103_s6 = smov 0   ;;  %s5105_s30 = smov 0  }
  0x22 LB: > { %5958 = sst [smem:[#allocation30_spill]] %s4928_s29  ;;  %s4942_s7 = smov [#allocation8]   ;;  %s4940_s30 = sphi %s5105_s30, %s6016_s30   ;;  %s4936_s6 = sphi %s5103_s6, %s6020_s6   ;;  %s4932_s2 = sphi %s5101_s2, %s6019_s2   ;;  %s4928_s29 = sphi %s5099_s29, %s6018_s29  }
  0x23   : > { %5959 = sst [smem:[#allocation31_spill]] %s4940_s30  ;;  %s645_s3 = sshll.u32 %s4942_s7, 4  ;;  %s646_s3 = int_to_ptr.vmem [resolvable:$true] %s645_s3 }
  0x24   : > { %s5120_s26 = sadd.s32 4294967295, %s4940_s30   ;;  %p3747_p0 = scmp.ge.s32.totalorder %s4940_s30, 1 }
  0x25   : > { %p5926_p1 = scmp.eq.s32.totalorder %s5120_s26, 0  ;;  %p633_p2 = scmp.lt.s32.totalorder %s4940_s30, 3 }
  0x26   : > { %s4943_s27 = smov [#allocation11]   ;;  %s4944_s28 = smov [#allocation14]  }
  0x27   : > { %p5125_p3 = pnand %p3747_p0, %p633_p2  ;;  %s683_s4 = sshll.u32 %s4943_s27, 4  ;;  %s5138_s4 = int_to_ptr.vmem [resolvable:$true] %s683_s4 }
  0x28   : > { %s5140_s9 = sshll.u32 %s4944_s28, 4  ;;  %s4571_s0 = scalar_lea.vmem %s646_s3, 3072  ;;  %s716_s9 = int_to_ptr.vmem [resolvable:$true] %s5140_s9 }
  0x29   : > { %s5960_s1 = scalar_select %p5125_p3, 1, 0 }
  0x2a   : > { %p4255_p5 = pneg %p5125_p3  ;;  %p4572_p8 = scmp.ne.s32.totalorder %s646_s3, %s4571_s0 }
  0x2b   : > { %p4579_p11 = scmp.lt.s32.totalorder %s646_s3, %s646_s3  ;;  %p4580_p12 = scmp.lt.s32.totalorder %s4571_s0, %s4571_s0 }
  0x2c   : > { %p5134_p6 = pnand %p4255_p5, %p5926_p1 }
  0x2d   : > { %p4581_p13 = por %p4580_p12, %p4579_p11 }
  0x2e   : > { %s5961_s8 = scalar_select %p5134_p6, 1, 0 }
  0x2f   : > { %p5144_p7 = pneg %p5134_p6 }
  0x31   : > { %s5962_s5 = scalar_select %p5144_p7, 1, 0 }
  0x32   : > { %p4574_p9 = pnand %p4572_p8, %p5144_p7 }
  0x34   : > { %p4575_p10 = pneg %p4574_p9 }
  0x36   : > { %p4582_p0 = pnand %p4581_p13, %p4575_p10 }
  0x38   : > { %4585 = shalt.err (!%p4582_p0)
}
  0x39   : > { %s4945_s7 = smov 192   ;;  %s4946_s27 = smov 12  }
  0x3a   : > { %s5963_s23 = sld [smem:[#allocation40_spill]]  ;;  %s4597_s22 = scalar_lea.vmem %s5138_s4, 1024 }
  0x3b   : > { %p4598_p2 = scmp.ne.s32.totalorder %s5138_s4, %s4597_s22  ;;  %p4605_p9 = scmp.lt.s32.totalorder %s5138_s4, %s5138_s4 }
  0x3c   : > { %p4606_p10 = scmp.lt.s32.totalorder %s4597_s22, %s4597_s22 }
  0x3d   : > { %p4600_p5 = pnand %p4598_p2, %p5144_p7 }
  0x3e   : > { %p4607_p11 = por %p4606_p10, %p4605_p9 }
  0x3f   : > { %p4601_p8 = pneg %p4600_p5 }
  0x40   : > { %4258 = dma.hbm_to_vmem [thread:$0]  (!%p5134_p6), %s5963_s23, 3072, %s646_s3, [#allocation9], %s4945_s7, %s4945_s7, %s4946_s27  }
  0x41   : > { %p4608_p12 = pnand %p4607_p11, %p4601_p8 }
  0x43   : > { %4611 = shalt.err (!%p4608_p12)
}
  0x44   : > { %s5914_s0 = smov 64   ;;  %s5916_s25 = smov 4  }
  0x45   : > { %s5964_s10 = sld [smem:[#allocation46_spill]]  ;;  %s4623_s3 = scalar_lea.vmem %s716_s9, 1024 }
  0x46   : > { %p4624_p13 = scmp.ne.s32.totalorder %s716_s9, %s4623_s3  ;;  %p4631_p5 = scmp.lt.s32.totalorder %s716_s9, %s716_s9 }
  0x47   : > { %p4632_p8 = scmp.lt.s32.totalorder %s4623_s3, %s4623_s3 }
  0x48   : > { %p4626_p0 = pnand %p4624_p13, %p5144_p7 }
  0x49   : > { %p4633_p9 = por %p4632_p8, %p4631_p5 }
  0x4a   : > { %p4627_p2 = pneg %p4626_p0 }
  0x4b   : > { %4264 = dma.hbm_to_vmem [thread:$0]  (!%p5134_p6), %s5964_s10, 1024, %s5138_s4, [#allocation12], %s5914_s0, %s5914_s0, %s5916_s25  }
  0x4c   : > { %p4634_p10 = pnand %p4633_p9, %p4627_p2 }
  0x4e   : > { %4637 = shalt.err (!%p4634_p10)
}
  0x4f   : > { %s5965_s14 = sld [smem:[#allocation47_spill]]  ;;  %s3746_s4 = sadd.s32 4294967294, %s4940_s30  }
  0x50   : > { %s5183_s27 = sadd.s32 1, %s4940_s30   ;;  %s59_s28 = sadd.s32 1, %s4936_s6 }
  0x51   : > { %5966 = sst [smem:[#allocation32_spill]] %s5183_s27  ;;  %s56_s23 = ssub.s32 %s4940_s30, %s5183_s27 }
  0x52   : > { %p66_p11 = scmp.ne.s32.totalorder %s4936_s6, %s4932_s2  ;;  %p57_p12 = scmp.eq.s32.totalorder %s56_s23, 0 }
  0x53   : > { %p67_p13 = scmp.eq.s32.totalorder %s4940_s30, 0  ;;  %p72_p0 = scmp.ne.s32.totalorder %s4932_s2, %s4928_s29 }
  0x54   : > { %p594_p2 = scmp.eq.s32.totalorder %s5120_s26, 1  ;;  %p600_p10 = scmp.eq.s32.totalorder %s3746_s4, 1 }
  0x55   : > { %4270 = dma.hbm_to_vmem [thread:$0]  (!%p5134_p6), %s5965_s14, 1024, %s716_s9, [#allocation15], %s5914_s0, %s5914_s0, %s5916_s25  }
  0x56   : > { %s5195_s24 = scalar_select %p57_p12, %s4936_s6, %s59_s28  }
  0x57   : > { %p68_p5 = por %p67_p13, %p66_p11  ;;  %p5199_p8 = por %p5926_p1, %p72_p0 }
  0x58   : > { %5967 = sst [smem:[#allocation33_spill]] %s5195_s24  ;;  %p5203_p9 = por %p594_p2, %p66_p11 }
  0x59   : > { %s5968_s9 = scalar_select %p5199_p8, 1, 0 }
  0x5a   : > { %s5969_s3 = scalar_select %p5203_p9, 1, 0 }
  0x5b   : > { %p5207_p4 = por %p600_p10, %p72_p0  ;;  %p4301_p3 = scmp.lt.s32.totalorder %s4940_s30, 2 }
  0x5c   : > { %5970 = sst [smem:[#allocation34_spill]] %s5969_s3  ;;  %s5921_s7 = sand.u32 1, %s4936_s6  }
  0x5d   : > { %s5971_s22 = scalar_select %p5207_p4, 1, 0 }
  0x5e   : > { %s5214_s23 = sshll.u32 %s4940_s30, 8  ;;  %s5218_s28 = sshll.u32 %s5921_s7, 4 }
  0x5f   : > { %5972 = sst [smem:[#allocation35_spill]] %s5971_s22  ;;  %p5220_p12 = pnand %p4301_p3, %p68_p5 }
  0x60   : > { %s797_s25 = sand.u32 1, %s4940_s30   ;;  %s5974_s14 = sld [smem:[#allocation37_spill]] }
  0x61   : > { %s801_s27 = scalar_lea.vmem [#allocation5], %s5218_s28  ;;  %s5234_s7 = scalar_lea.sflag [#allocation6], %s797_s25 }
  0x62   : > { %s808_s22 = sshll.u32 %s801_s27, 4  ;;  %p5240_p11 = pneg %p5220_p12  ;;  %s5232_s22 = int_to_ptr.vmem [resolvable:$true] %s808_s22 }
  0x66   : > { %s5229_s24 = scalar_lea.hbm %s5974_s14, %s5214_s23  ;;  %s4643_s30 = scalar_lea.hbm %s5974_s14, 512 }
  0x67   : > { %s4638_s29 = scalar_lea.hbm %s5229_s24, 256  ;;  %p4644_p2 = scmp.lt.s32.totalorder %s5229_s24, %s5974_s14 }
  0x68   : > { %p4639_p3 = scmp.ne.s32.totalorder %s5229_s24, %s4638_s29  ;;  %p4645_p5 = scmp.lt.s32.totalorder %s4643_s30, %s4638_s29 }
  0x6a   : > { %p4641_p13 = pnand %p5240_p11, %p4639_p3  ;;  %p4646_p10 = por %p4645_p5, %p4644_p2 }
  0x6c   : > { %p4642_p0 = pneg %p4641_p13 }
  0x6e   : > { %p4647_p1 = pnand %p4646_p10, %p4642_p0 }
  0x70   : > { %4650 = shalt.err (!%p4647_p1)
}
  0x71   : > { %s4651_s25 = scalar_lea.vmem %s5232_s22, 256  ;;  %s4949_s19 = smov [#allocation5]  }
  0x72   : > { %p4652_p4 = scmp.ne.s32.totalorder %s5232_s22, %s4651_s25  ;;  %s4656_s10 = sshll.u32 %s4949_s19, 4  ;;  %s4657_s10 = int_to_ptr.vmem [resolvable:$false] %s4656_s10 }
  0x73   : > { %s4658_s4 = scalar_lea.vmem %s4657_s10, 512  ;;  %p4659_p9 = scmp.lt.s32.totalorder %s5232_s22, %s4657_s10 }
  0x74   : > { %p4654_p3 = pnand %p4652_p4, %p5240_p11  ;;  %p4660_p8 = scmp.lt.s32.totalorder %s4658_s4, %s4651_s25 }
  0x76   : > { %p4655_p13 = pneg %p4654_p3  ;;  %p4661_p6 = por %p4660_p8, %p4659_p9 }
  0x78   : > { %p4662_p7 = pnand %p4661_p6, %p4655_p13 }
  0x7a   : > { %4665 = shalt.err (!%p4662_p7)
}
  0x7b   : > { %s5934_s21 = smov 128   ;;  %s5936_s29 = smov 8  }
  0x7c   : > { %4283 = dma.hbm_to_vmem [thread:$0]  (!%p5220_p12), %s5229_s24, 256, %s5232_s22, %s5234_s7, %s5934_s21, %s5934_s21, %s5936_s29  }
  0x7d   : > { %s4952_s19 = smov [#allocation10]   ;;  %s4953_s27 = smov [#allocation13]  }
  0x7e   : > { %s661_s30 = sshll.u32 %s4952_s19, 4  ;;  %s699_s25 = sshll.u32 %s4953_s27, 4  ;;  %s662_s30 = int_to_ptr.vmem [resolvable:$true] %s661_s30  ;;  %s700_s25 = int_to_ptr.vmem [resolvable:$true] %s699_s25 }
  0x7f   : > { %s4677_s10 = scalar_lea.vmem %s662_s30, 1024  ;;  %p5976_p4 = scmp.ne.s32.totalorder %s5962_s5, 0 }
  0x80   : > { %p4678_p1 = scmp.ne.s32.totalorder %s662_s30, %s4677_s10  ;;  %p4685_p8 = scmp.lt.s32.totalorder %s662_s30, %s662_s30 }
  0x81   : > { %p4686_p9 = scmp.lt.s32.totalorder %s4677_s10, %s4677_s10 }
  0x82   : > { %p4680_p6 = pnand %p4678_p1, %p5976_p4 }
  0x83   : > { %p4687_p0 = por %p4686_p9, %p4685_p8 }
  0x84   : > { %p4681_p7 = pneg %p4680_p6 }
  0x86   : > { %p4688_p2 = pnand %p4687_p0, %p4681_p7 }
  0x88   : > { %4691 = shalt.err (!%p4688_p2)
}
  0x89   : > { %p5977_p5 = scmp.ne.s32.totalorder %s5961_s8, 0  ;;  %s5978_s4 = smov 4  }
  0x8a   : > { %s5979_s14 = smov 64   ;;  %s5980_s19 = sld [smem:[#allocation42_spill]] }
  0x8b   : > { %s4703_s27 = scalar_lea.vmem %s700_s25, 2048  ;;  %p4711_p1 = scmp.lt.s32.totalorder %s700_s25, %s700_s25 }
  0x8c   : > { %p4704_p10 = scmp.ne.s32.totalorder %s700_s25, %s4703_s27  ;;  %p4712_p6 = scmp.lt.s32.totalorder %s4703_s27, %s4703_s27 }
  0x8e   : > { %p4706_p3 = pnand %p4704_p10, %p5976_p4  ;;  %p4713_p7 = por %p4712_p6, %p4711_p1 }
  0x90   : > { %4261 = dma.hbm_to_vmem [thread:$0]  (!%p5977_p5), %s5980_s19, 1024, %s662_s30, [#allocation9], %s5979_s14, %s5979_s14, %s5978_s4  }
  0x91   : > { %p4707_p13 = pneg %p4706_p3 }
  0x93   : > { %p4714_p8 = pnand %p4713_p7, %p4707_p13 }
  0x95   : > { %4717 = shalt.err (!%p4714_p8)
}
  0x96   : > { %4267 = dma.hbm_to_vmem [thread:$0]  (!%p5977_p5), %s5894_s12, 2048, %s700_s25, [#allocation12], %s5934_s21, %s5934_s21, %s5936_s29  }
  0x97   : > { %s4954_s30 = smov [#allocation16]   ;;  %s4955_s19 = smov [#allocation17]  }
  0x98   : > { %s737_s22 = sshll.u32 %s4954_s30, 4  ;;  %s753_s17 = sshll.u32 %s4955_s19, 4  ;;  %s738_s22 = int_to_ptr.vmem [resolvable:$true] %s737_s22  ;;  %s754_s17 = int_to_ptr.vmem [resolvable:$true] %s753_s17 }
  0x99   : > { %s4729_s16 = scalar_lea.vmem %s738_s22, 2048  ;;  %p4737_p10 = scmp.lt.s32.totalorder %s738_s22, %s738_s22 }
  0x9a   : > { %p4730_p9 = scmp.ne.s32.totalorder %s738_s22, %s4729_s16  ;;  %p4738_p3 = scmp.lt.s32.totalorder %s4729_s16, %s4729_s16 }
  0x9c   : > { %p4732_p0 = pnand %p4730_p9, %p5976_p4  ;;  %p4739_p13 = por %p4738_p3, %p4737_p10 }
  0x9e   : > { %p4733_p2 = pneg %p4732_p0 }
  0xa0   : > { %p4740_p1 = pnand %p4739_p13, %p4733_p2 }
  0xa2   : > { %4743 = shalt.err (!%p4740_p1)
}
  0xa3   : > { %4273 = dma.hbm_to_vmem [thread:$0]  (!%p5977_p5), %s5900_s18, 2048, %s738_s22, [#allocation15], %s5934_s21, %s5934_s21, %s5936_s29  }
  0xa4   : > { %s4755_s10 = scalar_lea.vmem %s754_s17, 2048  ;;  %p4763_p9 = scmp.lt.s32.totalorder %s754_s17, %s754_s17 }
  0xa5   : > { %p4756_p6 = scmp.ne.s32.totalorder %s754_s17, %s4755_s10  ;;  %p4764_p0 = scmp.lt.s32.totalorder %s4755_s10, %s4755_s10 }
  0xa7   : > { %p4758_p7 = pnand %p4756_p6, %p5976_p4  ;;  %p4765_p2 = por %p4764_p0, %p4763_p9 }
  0xa9   : > { %p4759_p8 = pneg %p4758_p7 }
  0xab   : > { %p4766_p10 = pnand %p4765_p2, %p4759_p8 }
  0xad   : > { %4769 = shalt.err (!%p4766_p10)
}
  0xae   : > { %4276 = dma.hbm_to_vmem [thread:$0]  (!%p5977_p5), %s5902_s20, 2048, %s754_s17, [#allocation18], %s5979_s14, %s5979_s14, %s5978_s4  }
  0xaf   : > { %s5981_s22 = sld [smem:[#allocation36_spill]]  ;;  %s780_s8 = scalar_lea.vmem [#allocation2], %s5218_s28 }
  0xb0   : > { %s787_s25 = sshll.u32 %s780_s8, 4  ;;  %s5982_s16 = sld [smem:[#allocation38_spill]]  ;;  %s5313_s25 = int_to_ptr.vmem [resolvable:$true] %s787_s25 }
  0xb1   : > { %s5983_s21 = sand.u32 1, %s4936_s6  }
  0xb2   : > { %s777_s29 = scalar_lea.sflag [#allocation3], %s5983_s21 }
  0xb5   : > { %s5310_s19 = scalar_lea.hbm %s5981_s22, %s5214_s23  ;;  %s4775_s5 = scalar_lea.hbm %s5981_s22, 512 }
  0xb6   : > { %s5319_s24 = scalar_lea.hbm %s5982_s16, %s5214_s23  ;;  %s4770_s14 = scalar_lea.hbm %s5310_s19, 256 }
  0xb7   : > { %p4771_p4 = scmp.ne.s32.totalorder %s5310_s19, %s4770_s14  ;;  %p4776_p13 = scmp.lt.s32.totalorder %s5310_s19, %s5981_s22 }
  0xb8   : > { %p4777_p1 = scmp.lt.s32.totalorder %s4775_s5, %s4770_s14 }
  0xb9   : > { %p4773_p5 = pnand %p4771_p4, %p5240_p11 }
  0xba   : > { %p4778_p6 = por %p4777_p1, %p4776_p13 }
  0xbb   : > { %p4774_p3 = pneg %p4773_p5 }
  0xbd   : > { %p4779_p7 = pnand %p4778_p6, %p4774_p3 }
  0xbf   : > { %4782 = shalt.err (!%p4779_p7)
}
  0xc0   : > { %s4783_s23 = scalar_lea.vmem %s5313_s25, 256  ;;  %s4956_s21 = smov [#allocation2]  }
  0xc1   : > { %p4784_p8 = scmp.ne.s32.totalorder %s5313_s25, %s4783_s23  ;;  %s4788_s27 = sshll.u32 %s4956_s21, 4  ;;  %s4789_s27 = int_to_ptr.vmem [resolvable:$false] %s4788_s27 }
  0xc2   : > { %s4790_s10 = scalar_lea.vmem %s4789_s27, 512  ;;  %p4791_p2 = scmp.lt.s32.totalorder %s5313_s25, %s4789_s27 }
  0xc3   : > { %p4786_p9 = pnand %p4784_p8, %p5240_p11  ;;  %p4792_p10 = scmp.lt.s32.totalorder %s4790_s10, %s4783_s23 }
  0xc5   : > { %p4787_p0 = pneg %p4786_p9  ;;  %p4793_p4 = por %p4792_p10, %p4791_p2 }
  0xc7   : > { %p4794_p5 = pnand %p4793_p4, %p4787_p0 }
  0xc9   : > { %4797 = shalt.err (!%p4794_p5)
}
  0xca   : > { %s5984_s14 = smov 8   ;;  %s5985_s17 = smov 128  }
  0xcb   : > { %4280 = dma.hbm_to_vmem [thread:$0]  (!%p5220_p12), %s5310_s19, 256, %s5313_s25, %s777_s29, %s5985_s17, %s5985_s17, %s5984_s14  }
  0xcc   : > { %s822_s4 = scalar_lea.vmem [#allocation7], %s5218_s28  ;;  %s4798_s30 = scalar_lea.hbm %s5319_s24, 256 }
  0xcd   : > { %s829_s5 = sshll.u32 %s822_s4, 4  ;;  %p4799_p3 = scmp.ne.s32.totalorder %s5319_s24, %s4798_s30  ;;  %s830_s5 = int_to_ptr.vmem [resolvable:$true] %s829_s5 }
  0xce   : > { %s4803_s21 = scalar_lea.hbm %s5982_s16, 512  ;;  %p4804_p6 = scmp.lt.s32.totalorder %s5319_s24, %s5982_s16 }
  0xcf   : > { %p4801_p13 = pnand %p4799_p3, %p5240_p11  ;;  %p4805_p7 = scmp.lt.s32.totalorder %s4803_s21, %s4798_s30 }
  0xd1   : > { %p4802_p1 = pneg %p4801_p13  ;;  %p4806_p8 = por %p4805_p7, %p4804_p6 }
  0xd3   : > { %p4807_p9 = pnand %p4806_p8, %p4802_p1 }
  0xd5   : > { %4810 = shalt.err (!%p4807_p9)
}
  0xd6   : > { %s4811_s28 = scalar_lea.vmem %s830_s5, 256  ;;  %s4957_s29 = smov [#allocation7]  }
  0xd7   : > { %p4812_p0 = scmp.ne.s32.totalorder %s830_s5, %s4811_s28  ;;  %s4816_s19 = sshll.u32 %s4957_s29, 4  ;;  %s4817_s19 = int_to_ptr.vmem [resolvable:$false] %s4816_s19 }
  0xd8   : > { %s4818_s25 = scalar_lea.vmem %s4817_s19, 512  ;;  %p4819_p4 = scmp.lt.s32.totalorder %s830_s5, %s4817_s19 }
  0xd9   : > { %p4814_p2 = pnand %p4812_p0, %p5240_p11  ;;  %p4820_p5 = scmp.lt.s32.totalorder %s4818_s25, %s4811_s28 }
  0xdb   : > { %p4815_p10 = pneg %p4814_p2  ;;  %p4821_p3 = por %p4820_p5, %p4819_p4 }
  0xdd   : > { %p4822_p13 = pnand %p4821_p3, %p4815_p10 }
  0xdf   : > { %4825 = shalt.err (!%p4822_p13)
}
  0xe0   : > { %4286 = dma.hbm_to_vmem [thread:$0]  (!%p5220_p12), %s5319_s24, 256, %s830_s5, %s5234_s7, %s5985_s17, %s5985_s17, %s5984_s14  }
  0xe1   : > { %p5986_p11 = scmp.ne.s32.totalorder %s5960_s1, 0 }
  0xe2   : > { %s5370_s3 = sand.u32 (!%p5986_p11), 1, %s4932_s2   ;;  %p5987_p1 = scmp.ne.s32.totalorder (!%p5986_p11), %s5968_s9, 0 }
  0xe3   : > { %847 = sbr.rel (%p5986_p11) target bundleno = 6582 (0x19b6), region = 116  ;;  %s5373_s4 = sshll.u32 (!%p5986_p11), %s5370_s3, 4 }
  0xe4   : > { %s850_s30 = scalar_lea.sflag (!%p5986_p11), [#allocation3], %s5370_s3  ;;  %s853_s0 = scalar_lea.vmem (!%p5986_p11), [#allocation2], %s5373_s4 }
  0xe8   : > { %4895 = dma.done.wait (%p5987_p1), %s850_s30, 256  }
  0xe9   : > { %4897 = vsyncadd (%p5987_p1), %s850_s30, 4294967040  ;;  %s858_s1 = sand.u32 1, %s5120_s26   ;;  %s862_s24 = scalar_lea.vmem [#allocation5], %s5373_s4 }
  0xea   : > { %s859_s7 = scalar_lea.sflag [#allocation6], %s858_s1 }
  0xeb   : > { %4899 = dma.done.wait (%p5987_p1), %s859_s7, 512  }
  0xec   : > { %4901 = vsyncadd (%p5987_p1), %s859_s7, 4294966784  ;;  %s871_s14 = scalar_lea.vmem [#allocation7], %s5373_s4  ;;  %p5988_p12 = scmp.eq.s32.totalorder %s5120_s26, 0 }
  0xee   : > { %4903 = dma.done.wait (%p5988_p12), [#allocation9], 4096   ;;  %p5989_p6 = pmov %p5988_p12 }
  0xf0   : > { %4905 = vsyncadd (%p5989_p6), [#allocation9], 4294963200  ;;  %p5990_p7 = pmov %p5989_p6 }
  0xf1   : > { %p5991_p8 = pmov %p5989_p6 }
  0xf2   : > { %4907 = dma.done.wait (%p5990_p7), [#allocation12], 3072  }
  0xf3   : > { %4909 = vsyncadd (%p5991_p8), [#allocation12], 4294964224  ;;  %p5992_p9 = pmov %p5989_p6 }
  0xf4   : > { %p5993_p0 = pmov %p5989_p6 }
  0xf5   : > { %4911 = dma.done.wait (%p5992_p9), [#allocation15], 3072  }
  0xf6   : > { %4913 = vsyncadd (%p5993_p0), [#allocation15], 4294964224  ;;  %p5994_p2 = pmov %p5993_p0 }
  0xf7   : > { %p5995_p10 = pmov %p5993_p0 }
  0xf8   : > { %4915 = dma.done.wait (%p5994_p2), [#allocation18], 2048  }
  0xf9   : > { %4917 = vsyncadd (%p5995_p10), [#allocation18], 4294965248  ;;  %v4958_v0 = vmov 0   ;;  %v4364_v1 = vld [vmem:[#allocation8 + $0xac] ss:$12 sps:$4 sm:$0xff]   ;;  %v5407_v17 = vld [vmem:[%s853_s0] sm:$0xff]  ;;  %v1036_v21 = vlaneseq }
  0xfa   : > { %1211 = vmatprep.mubr.bf16.mxu0 %v4958_v0  ;;  %v4366_v2 = vld [vmem:[#allocation8 + $0xa8] ss:$12 sps:$4 sm:$0xff]   ;;  %1179 = vmatprep.subr.bf16.mxu0 %v4364_v1  ;;  %v4369_v4 = vld [vmem:[#allocation8 + $0x90] ss:$12 sps:$4 sm:$0xff]   ;;  %v4372_v6 = vld [vmem:[#allocation8 + $0x78] ss:$12 sps:$4 sm:$0xff]  }
  0xfb   : > { %v4367_v3 = vld [vmem:[#allocation8 + $0x94] ss:$12 sps:$4 sm:$0xff]   ;;  %1180 = vmatpush1.bf16.msra.mxu0 %v4366_v2  ;;  %v4370_v5 = vld [vmem:[#allocation8 + $0x7c] ss:$12 sps:$4 sm:$0xff]   ;;  %v4373_v7 = vld [vmem:[#allocation8 + $0x64] ss:$12 sps:$4 sm:$0xff]  }
  0xfc   : > { %1181 = vmatprep.subr.bf16.mxu0 %v4367_v3  ;;  %v4375_v8 = vld [vmem:[#allocation8 + $0x60] ss:$12 sps:$4 sm:$0xff]   ;;  %v4378_v10 = vld [vmem:[#allocation8 + $0x48] ss:$12 sps:$4 sm:$0xff]   ;;  %v4381_v12 = vld [vmem:[#allocation8 + $0x30] ss:$12 sps:$4 sm:$0xff]  }
  0xfd   : > { %v4376_v9 = vld [vmem:[#allocation8 + $0x4c] ss:$12 sps:$4 sm:$0xff]   ;;  %v4379_v11 = vld [vmem:[#allocation8 + $0x34] ss:$12 sps:$4 sm:$0xff]   ;;  %v4382_v13 = vld [vmem:[#allocation8 + $0x1c] ss:$12 sps:$4 sm:$0xff]  }
  0xfe   : > { %v4384_v14 = vld [vmem:[#allocation8 + $0x18] ss:$12 sps:$4 sm:$0xff]   ;;  %v4387_v16 = vld [vmem:[#allocation8] ss:$12 sps:$4 sm:$0xff]   ;;  %v4959_v20 = vmov 0.0   ;;  %vm4960_vm0 = vmmov 0  }
  0xff   : > { %1182 = vmatpush1.bf16.msra.mxu0 %v4369_v4  ;;  %v4385_v15 = vld [vmem:[#allocation8 + $0x4] ss:$12 sps:$4 sm:$0xff]   ;;  %v5411_v18 = vld [vmem:[%s853_s0 + $0x8] sm:$0xff]  ;;  %4017 = vmatprep.subr.bf16.mxu1 %v4959_v20  ;;  %v5421_v22 = vshrl.u32 %v1036_v21, 7  ;;  %s5996_s5 = sld [smem:[#allocation41_spill]]  ;;  %vm1266_vm1 = vcmask 261120  }
 0x100   : > { %1183 = vmatprep.subr.bf16.mxu0 %v4370_v5  ;;  %v1001_v19 = vpack.c.bf16 %v5411_v18, %v5407_v17  ;;  %4033 = vmatprep.mubr.msk.bf16.mxu1 %vm4960_vm0, %v4959_v20  ;;  %s4961_s8 = smov 96   ;;  %v4388_v39 = vld [vmem:[#allocation8 + $0xb0] ss:$12 sps:$4 sm:$0xff]   ;;  %v4389_v40 = vld [vmem:[#allocation8 + $0x98] ss:$12 sps:$4 sm:$0xff]   ;;  %vm1314_vm4 = vcmask 130048  }
 0x101   : > { %v5424_v23 = vsub.s32 1, %v5421_v22  ;;  %v5432_v27 = vsub.s32 0, %v5421_v22  ;;  %4018 = vmatpush3.bf16.msra.mxu1 %v4388_v39  ;;  %v4390_v41 = vld [vmem:[#allocation8 + $0x80] ss:$12 sps:$4 sm:$0xff]   ;;  %v4391_v42 = vld [vmem:[#allocation8 + $0x68] ss:$12 sps:$4 sm:$0xff]  }
 0x102   : > { %4019 = vmatprep.subr.bf16.mxu1 %v4959_v20  ;;  %v4392_v43 = vld [vmem:[#allocation8 + $0x50] ss:$12 sps:$4 sm:$0xff]   ;;  %v4393_v44 = vld [vmem:[#allocation8 + $0x38] ss:$12 sps:$4 sm:$0xff]   ;;  %v4394_v45 = vld [vmem:[#allocation8 + $0x20] ss:$12 sps:$4 sm:$0xff]  }
 0x103   : > { %1184 = vmatpush1.bf16.msra.mxu0 %v4372_v6  ;;  %v4395_v46 = vld [vmem:[#allocation8 + $0x8] ss:$12 sps:$4 sm:$0xff]   ;;  %v4962_v52 = vmov -1e+10   ;;  %s4963_s23 = smov 64   ;;  %s4964_s21 = smov 32  }
 0x104   : > { %1185 = vmatprep.subr.bf16.mxu0 %v4373_v7  ;;  %v992_v50 = vld [vmem:[%s871_s14] sm:$0xff]  ;;  %v993_v51 = vld [vmem:[%s871_s14 + $0x8] sm:$0xff]  ;;  %s5997_s28 = sld [smem:[#allocation43_spill]]  ;;  %p984_p4 = scmp.lt.s32.totalorder %s5120_s26, 1 }
 0x105   : > { %v5429_v25 = vld [vmem:[%s5996_s5] sm:$0x7]  ;;  %4020 = vmatpush3.bf16.msra.mxu1 %v4389_v40  ;;  %vm994_vm2 = vcmp.ne.f32.partialorder %v992_v50, 0.0  ;;  %vm995_vm3 = vcmp.ne.f32.partialorder %v993_v51, 0.0  ;;  %v4398_v51 = vld [vmem:[#allocation10 + $0x18] sm:$0xff]   ;;  %s5998_s25 = sld [smem:[#allocation44_spill]] }
 0x106   : > { %v1043_v28 = vrot.slane %v5429_v25, %v5424_v23  ;;  %v1039_v31 = vrot.slane %v5429_v25, %v5432_v27  ;;  %4021 = vmatprep.subr.bf16.mxu1 %v4959_v20  ;;  %v5473_v53 = vsel %vm994_vm2, 0.0, %v4962_v52  ;;  %v5477_v57 = vsel %vm995_vm3, 0.0, %v4962_v52  ;;  %s5999_s1 = sld [smem:[#allocation45_spill]]  ;;  %s3777_s29 = sshll.u32 %s5370_s3, 6 }
 0x107   : > { %1186 = vmatpush1.bf16.msra.mxu0 %v4375_v8  ;;  %s985_s17 = scalar_select %p984_p4, %s5120_s26, 1 }
 0x108   : > { %1187 = vmatprep.subr.bf16.mxu0 %v4376_v9  ;;  %s6000_s10 = sld [smem:[#allocation39_spill]]  ;;  %s5671_s19 = scalar_lea.vmem [#allocation20], %s3777_s29 }
 0x109   : > { %4022 = vmatpush3.bf16.msra.mxu1 %v4390_v41  ;;  %s6001_s30 = sld [smem:[#allocation48_spill]]  ;;  %s3522_s29 = sshll.u32 %s5671_s19, 4  ;;  %s5797_s29 = int_to_ptr.vmem [resolvable:$true] %s3522_s29 }
 0x10a   : > { %4023 = vmatprep.subr.bf16.mxu1 %v4959_v20  ;;  %s6002_s7 = sld [smem:[#allocation49_spill]]  ;;  %s4826_s0 = scalar_lea.vmem %s5797_s29, 1024 }
 0x10b   : > { %1188 = vmatpush1.bf16.msra.mxu0 %v4378_v10  ;;  %s6003_s9 = sld [smem:[#allocation50_spill]]  ;;  %p4827_p5 = scmp.ne.s32.totalorder %s5797_s29, %s4826_s0 }
 0x10c   : > { %1189 = vmatprep.subr.bf16.mxu0 %v4379_v11  ;;  %s6004_s27 = sld [smem:[#allocation51_spill]] }
 0x10d   : > { %4024 = vmatpush3.bf16.msra.mxu1 %v4391_v42 }
 0x10e   : > { %4025 = vmatprep.subr.bf16.mxu1 %v4959_v20 }
 0x10f   : > { %1190 = vmatpush1.bf16.msra.mxu0 %v4381_v12 }
 0x110   : > { %1191 = vmatprep.subr.bf16.mxu0 %v4382_v13 }
 0x111   : > { %4026 = vmatpush3.bf16.msra.mxu1 %v4392_v43 }
 0x112   : > { %4027 = vmatprep.subr.bf16.mxu1 %v4959_v20 }
 0x113   : > { %1192 = vmatpush1.bf16.msra.mxu0 %v4384_v14  ;;  %v1046_v14 = vsub.s32 2, %v5421_v22 }
 0x114   : > { %1193 = vmatprep.subr.bf16.mxu0 %v4385_v15 }
 0x115   : > { %4028 = vmatpush3.bf16.msra.mxu1 %v4393_v44 }
 0x116   : > { %4029 = vmatprep.subr.bf16.mxu1 %v4959_v20 }
 0x117   : > { %1194 = vmatpush1.bf16.msra.mxu0 %v4387_v16  ;;  %v1047_v16 = vrot.slane %v5429_v25, %v1046_v14 }
 0x118   : > { %4037 = vmatprep.subr.bf16.mxu0 %v4959_v20 }
 0x119   : > { %4030 = vmatpush3.bf16.msra.mxu1 %v4394_v45 }
 0x11a   : > { %1212 = vmatmul.mubr.bf16.vlgmr.msra.gmra.mxu0 %v1001_v19  ;;  %4031 = vmatprep.subr.bf16.mxu1 %v4959_v20 }
 0x11b   : > { %4039 = vmatprep.mubr.msk.bf16.mxu0 %vm4960_vm0, %v4959_v20 }
 0x11d   : > { %4032 = vmatpush3.bf16.msra.mxu1 %v4395_v46 }
 0x11e   : > { %4043 = vmatprep.subr.bf16.mxu1 %v4959_v20 }
 0x120   : > { %4034 = vmatmul.mubr.bf16.vlgmr.msra.gmra.mxu1 %v1001_v19 }
 0x121   : > { %4045 = vmatprep.mubr.msk.bf16.mxu1 %vm4960_vm0, %v4959_v20 }
 0x1da   : > { %v1213_v24 = vpop.f32.mrf.mxu0 }
 0x1db   : > { %v1214_v36 = vadd.f32 %v1213_v24, %v1039_v31 }
 0x1dc   : > { %v1215_v26 = vpop.f32.mrf.mxu0 }
 0x1dd   : > { %v1216_v32 = vadd.f32 %v1215_v26, %v1043_v28 }
 0x1de   : > { %v1217_v29 = vpop.f32.mrf.mxu0 }
 0x1df   : > { %v1218_v34 = vadd.f32 %v1217_v29, %v1039_v31 }
 0x1e0   : > { %v1219_v30 = vpop.f32.mrf.mxu0  ;;  %v1256_v15 = vpop.f32.mrf.mxu1 }
 0x1e1   : > { %v1220_v33 = vadd.f32 %v1219_v30, %v1043_v28  ;;  %v5444_v38 = vpack.c.bf16 %v1218_v34, %v1214_v36  ;;  %v1257_v21 = vadd.f32 %v1256_v15, %v1047_v16 }
 0x1e2   : > { %v4035_v19 = vpop.f32.mrf.mxu1 }
 0x1e3   : > { %v5438_v35 = vpack.c.bf16 %v1220_v33, %v1216_v32 }
 0x1e4   : > { %v1259_v24 = vpop.f32.mrf.mxu1 }
 0x1e5   : > { %1391 = vrot.lane.b32.xlu0 %v5438_v35, %s4961_s8  ;;  %v1271_v37 = vsel %vm1266_vm1, %v5438_v35, 0  ;;  %v1260_v26 = vadd.f32 %v1259_v24, %v1047_v16 }
 0x1e6   : > { %4038 = vmatpush3.bf16.xpose.msra.mxu0 %v1271_v37  ;;  %v4036_v28 = vpop.f32.mrf.mxu1 }
 0x1e7   : > { %4049 = vmatprep.subr.bf16.mxu0 %v4959_v20  ;;  %v5490_v30 = vpack.c.bf16 %v1260_v26, %v1257_v21 }
 0x1e9   : > { %1388 = vrot.lane.b32.xlu0 %v5444_v38, %s4961_s8  ;;  %4044 = vmatpush3.bf16.msra.mxu1 %v5490_v30 }
 0x1ea   : > { %4055 = vmatprep.subr.bf16.mxu1 %v4959_v20 }
 0x1ed   : > { %4040 = vmatmul.mubr.msk.bf16.vlgmr.msra.gmra.mxu0 %vm1266_vm1, %v5444_v38 }
 0x1ee   : > { %4051 = vmatprep.mubr.msk.bf16.mxu0 %vm4960_vm0, %v4959_v20 }
 0x257   : > { %v1392_v47 = vpop.permute.xlu0 %1391 }
 0x258   : > { %v1397_v48 = vsel %vm1266_vm1, %v1392_v47, 0 }
 0x259   : > { %4050 = vmatpush3.bf16.xpose.msra.mxu0 %v1397_v48 }
 0x25a   : > { %4061 = vmatprep.subr.bf16.mxu0 %v4959_v20 }
 0x25b   : > { %v1389_v49 = vpop.permute.xlu0 %1388 }
 0x260   : > { %4052 = vmatmul.mubr.msk.bf16.vlgmr.msra.gmra.mxu0 %vm1266_vm1, %v1389_v49 }
 0x261   : > { %4065 = vmatprep.mubr.msk.bf16.mxu0 %vm4960_vm0, %v4959_v20  ;;  %4062 = vmatpush3.bf16.msra.mxu0 %v4398_v51 }
 0x262   : > { %4063 = vmatprep.subr.bf16.mxu0 %v4959_v20 }
 0x2ad   : > { %v1307_v54 = vpop.f32.mrf.mxu0 }
 0x2ae   : > { %v1308_v55 = vadd.f32 %v1307_v54, %v5473_v53 }
 0x2af   : > { %v4041_v56 = vpop.f32.mrf.mxu0 }
 0x2b0   : > { %v1315_v58 = vsel %vm1314_vm4, %v1308_v55, -inf }
 0x2b1   : > { %1316 = vmax.xlane.f32.xlu1 %v1315_v58  ;;  %v1310_v59 = vpop.f32.mrf.mxu0 }
 0x2b2   : > { %v1311_v60 = vadd.f32 %v1310_v59, %v5477_v57 }
 0x2b3   : > { %v4042_v61 = vpop.f32.mrf.mxu0 }
 0x2b4   : > { %v1318_v62 = vsel %vm1314_vm4, %v1311_v60, -inf }
 0x2b5   : > { %1319 = vmax.xlane.f32.xlu1 %v1318_v62  ;;  %v4396_v62 = vld [vmem:[#allocation10 + $0x8] sm:$0xff]  }
 0x320   : > { %v1433_v63 = vpop.f32.mrf.mxu0 }
 0x321   : > { %v1434_v1 = vadd.f32 %v1433_v63, %v5473_v53 }
 0x322   : > { %v4053_v2 = vpop.f32.mrf.mxu0 }
 0x323   : > { %v1440_v3 = vsel %vm1314_vm4, %v1434_v1, -inf  ;;  %v4399_v2 = vld [vmem:[#allocation10 + $0x10] sm:$0xff]  }
 0x324   : > { %1441 = vmax.xlane.f32.xlu0 %v1440_v3  ;;  %v1436_v4 = vpop.f32.mrf.mxu0  ;;  %4064 = vmatpush3.bf16.msra.mxu0 %v4399_v2 }
 0x325   : > { %v1437_v5 = vadd.f32 %v1436_v4, %v5477_v57  ;;  %4077 = vmatprep.subr.bf16.mxu0 %v4959_v20 }
 0x326   : > { %v4054_v6 = vpop.f32.mrf.mxu0 }
 0x327   : > { %v1443_v7 = vsel %vm1314_vm4, %v1437_v5, -inf }
 0x328   : > { %1444 = vmax.xlane.f32.xlu1 %v1443_v7 }
 0x33a   : > { %v1317_v8 = vpop.xlane.xlu1 %1316  ;;  %1630 = vrot.lane.b32.xlu0 %v5438_v35, %s4963_s23 }
 0x33b   : > { %v1321_v9 = vsub.f32 %v1308_v55, %v1317_v8 }
 0x33d   : > { %v1323_v10 = vmul.f32 1.442695, %v1321_v9 }
 0x33e   : > { %v1320_v11 = vpop.xlane.xlu1 %1319 }
 0x33f   : > { %4484 = vpow2.f32 %v1323_v10  ;;  %v1322_v12 = vsub.f32 %v1311_v60, %v1320_v11 }
 0x341   : > { %v1325_v13 = vmul.f32 1.442695, %v1322_v12 }
 0x343   : > { %4486 = vpow2.f32 %v1325_v13 }
 0x34c   : > { %v4485_v29 = vpop.eup %4484 }
 0x34d   : > { %v1327_v31 = vsel %vm1314_vm4, %v4485_v29, 0.0 }
 0x34e   : > { %1328 = vadd.xlane.f32.xlu1 %v1327_v31 }
 0x350   : > { %v4487_v32 = vpop.eup %4486 }
 0x351   : > { %v1330_v22 = vsel %vm1314_vm4, %v4487_v32, 0.0 }
 0x352   : > { %1331 = vadd.xlane.f32.xlu1 %v1330_v22 }
 0x3ad   : > { %v1442_v25 = vpop.xlane.xlu0 %1441 }
 0x3ae   : > { %v1446_v33 = vsub.f32 %v1434_v1, %v1442_v25  ;;  %v4397_v1 = vld [vmem:[#allocation10] sm:$0xff]  }
 0x3b0   : > { %v1448_v34 = vmul.f32 1.442695, %v1446_v33 }
 0x3b1   : > { %v1445_v36 = vpop.xlane.xlu1 %1444  ;;  %v1631_v10 = vpop.permute.xlu0 %1630 }
 0x3b2   : > { %4488 = vpow2.f32 %v1448_v34  ;;  %v1447_v37 = vsub.f32 %v1437_v5, %v1445_v36  ;;  %v1636_v14 = vsel %vm1266_vm1, %v1631_v10, 0 }
 0x3b4   : > { %v1450_v39 = vmul.f32 1.442695, %v1447_v37 }
 0x3b6   : > { %4490 = vpow2.f32 %v1450_v39 }
 0x3bf   : > { %v4489_v40 = vpop.eup %4488 }
 0x3c0   : > { %v1452_v41 = vsel %vm1314_vm4, %v4489_v40, 0.0 }
 0x3c1   : > { %1453 = vadd.xlane.f32.xlu1 %v1452_v41 }
 0x3c3   : > { %v4491_v42 = vpop.eup %4490 }
 0x3c4   : > { %v1455_v43 = vsel %vm1314_vm4, %v4491_v42, 0.0 }
 0x3c5   : > { %1456 = vadd.xlane.f32.xlu1 %v1455_v43 }
 0x3d6   : > { %1464 = vrot.lane.b32.xlu1 %v5490_v30, %s4961_s8 }
 0x3d7   : > { %v1329_v44 = vpop.xlane.xlu1 %1328 }
 0x3d8   : > { %4492 = vrcp.f32 %v1329_v44 }
 0x3da   : > { %1628 = vrot.lane.b32.xlu1 %v5444_v38, %s4963_s23 }
 0x3db   : > { %v1332_v45 = vpop.xlane.xlu1 %1331 }
 0x3dc   : > { %4494 = vrcp.f32 %v1332_v45 }
 0x3e5   : > { %v4493_v46 = vpop.eup %4492 }
 0x3e6   : > { %v1335_v48 = vmul.f32 %v4493_v46, %v4485_v29 }
 0x3e9   : > { %v4495_v47 = vpop.eup %4494 }
 0x3ea   : > { %v1336_v49 = vmul.f32 %v4495_v47, %v4487_v32 }
 0x3ec   : > { %v1337_v50 = vpack.c.bf16 %v1336_v49, %v1335_v48 }
 0x3ee   : > { %4046 = vmatmul.mubr.msk.bf16.vlgmr.msra.gmra.mxu1 %vm1314_vm4, %v1337_v50 }
 0x3ef   : > { %4057 = vmatprep.mubr.msk.bf16.mxu1 %vm4960_vm0, %v4959_v20 }
 0x44a   : > { %v1454_v54 = vpop.xlane.xlu1 %1453 }
 0x44b   : > { %4496 = vrcp.f32 %v1454_v54 }
 0x44e   : > { %v1457_v55 = vpop.xlane.xlu1 %1456 }
 0x44f   : > { %4498 = vrcp.f32 %v1457_v55 }
 0x452   : > { %v1465_v56 = vpop.permute.xlu1 %1464 }
 0x453   : > { %4056 = vmatpush3.bf16.msra.mxu1 %v1465_v56 }
 0x454   : > { %4069 = vmatprep.subr.bf16.mxu1 %v4959_v20 }
 0x456   : > { %v1629_v15 = vpop.permute.xlu1 %1628 }
 0x458   : > { %v4497_v58 = vpop.eup %4496 }
 0x459   : > { %v1460_v60 = vmul.f32 %v4497_v58, %v4489_v40 }
 0x45c   : > { %v4499_v59 = vpop.eup %4498 }
 0x45d   : > { %v1461_v61 = vmul.f32 %v4499_v59, %v4491_v42 }
 0x45f   : > { %v1462_v63 = vpack.c.bf16 %v1461_v61, %v1460_v60 }
 0x461   : > { %4058 = vmatmul.mubr.msk.bf16.vlgmr.msra.gmra.mxu1 %vm1314_vm4, %v1462_v63  ;;  %v4401_v63 = vld [vmem:[#allocation10 + $0x20] sm:$0xff]  }
 0x462   : > { %4070 = vmatpush3.bf16.msra.mxu1 %v4396_v62  ;;  %4073 = vmatprep.mubr.msk.bf16.mxu1 %vm4960_vm0, %v4959_v20 }
 0x463   : > { %4071 = vmatprep.subr.bf16.mxu1 %v4959_v20 }
 0x466   : > { %4072 = vmatpush3.bf16.msra.mxu1 %v4397_v1 }
 0x467   : > { %4083 = vmatprep.subr.bf16.mxu1 %v4959_v20 }
 0x4ae   : > { %v1375_v3 = vpop.f32.mrf.mxu1 }
 0x4b0   : > { %v4047_v4 = vpop.f32.mrf.mxu1 }
 0x4b2   : > { %v1378_v5 = vpop.f32.mrf.mxu1 }
 0x4b3   : > { %v1382_v6 = vpack.c.bf16 %v1378_v5, %v1375_v3 }
 0x4b4   : > { %v4048_v7 = vpop.f32.mrf.mxu1 }
 0x4b5   : > { %4074 = vmatmul.mubr.msk.bf16.vlgmr.msra.gmra.mxu1 %vm1266_vm1, %v1382_v6 }
 0x4b6   : > { %4085 = vmatprep.mubr.msk.bf16.mxu1 %vm4960_vm0, %v4959_v20 }
 0x521   : > { %v1504_v8 = vpop.f32.mrf.mxu1 }
 0x523   : > { %v4059_v9 = vpop.f32.mrf.mxu1 }
 0x525   : > { %v1507_v11 = vpop.f32.mrf.mxu1 }
 0x526   : > { %v1511_v12 = vpack.c.bf16 %v1507_v11, %v1504_v8 }
 0x527   : > { %v4060_v13 = vpop.f32.mrf.mxu1 }
 0x528   : > { %4066 = vmatmul.mubr.msk.bf16.vlgmr.msra.gmra.mxu0 %vm1266_vm1, %v1511_v12 }
 0x529   : > { %4078 = vmatpush3.bf16.xpose.msra.mxu0 %v1636_v14  ;;  %4079 = vmatprep.mubr.msk.bf16.mxu0 %vm4960_vm0, %v4959_v20 }
 0x52a   : > { %4089 = vmatprep.subr.bf16.mxu0 %v4959_v20 }
 0x530   : > { %4080 = vmatmul.mubr.msk.bf16.vlgmr.msra.gmra.mxu0 %vm1266_vm1, %v1629_v15 }
 0x531   : > { %4093 = vmatprep.mubr.msk.bf16.mxu0 %vm4960_vm0, %v4959_v20 }
 0x575   : > { %v5524_v16 = vpop.f32.mrf.mxu1 }
 0x577   : > { %v4075_v19 = vpop.f32.mrf.mxu1 }
 0x579   : > { %v5526_v21 = vpop.f32.mrf.mxu1 }
 0x57b   : > { %v4076_v24 = vpop.f32.mrf.mxu1 }
 0x5e8   : > { %v5528_v26 = vpop.f32.mrf.mxu0 }
 0x5ea   : > { %v4067_v28 = vpop.f32.mrf.mxu0 }
 0x5ec   : > { %v5530_v29 = vpop.f32.mrf.mxu0 }
 0x5ee   : > { %v4068_v31 = vpop.f32.mrf.mxu0 }
 0x5f0   : > { %v1672_v32 = vpop.f32.mrf.mxu0 }
 0x5f1   : > { %v1673_v22 = vadd.f32 %v1672_v32, %v5473_v53 }
 0x5f2   : > { %v4081_v25 = vpop.f32.mrf.mxu0 }
 0x5f3   : > { %v1679_v33 = vsel %vm1314_vm4, %v1673_v22, -inf }
 0x5f4   : > { %1680 = vmax.xlane.f32.xlu1 %v1679_v33  ;;  %v1675_v34 = vpop.f32.mrf.mxu0 }
 0x5f5   : > { %v1676_v36 = vadd.f32 %v1675_v34, %v5477_v57 }
 0x5f6   : > { %v4082_v37 = vpop.f32.mrf.mxu0 }
 0x5f7   : > { %v1682_v39 = vsel %vm1314_vm4, %v1676_v36, -inf  ;;  %v1625_v37 = vadd.f32 %v5526_v21, %v5530_v29  ;;  %v4403_v21 = vld [vmem:[#allocation10 + $0x30] sm:$0xff]  }
 0x5f8   : > { %1683 = vmax.xlane.f32.xlu0 %v1682_v39 }
 0x60e   : > { %1702 = vrot.lane.b32.xlu0 %v5490_v30, %s4963_s23 }
 0x67d   : > { %v1681_v40 = vpop.xlane.xlu1 %1680 }
 0x67e   : > { %v1685_v41 = vsub.f32 %v1673_v22, %v1681_v40 }
 0x680   : > { %v1687_v42 = vmul.f32 1.442695, %v1685_v41 }
 0x681   : > { %v1684_v43 = vpop.xlane.xlu0 %1683 }
 0x682   : > { %4500 = vpow2.f32 %v1687_v42  ;;  %v1686_v44 = vsub.f32 %v1676_v36, %v1684_v43 }
 0x684   : > { %v1689_v45 = vmul.f32 1.442695, %v1686_v44 }
 0x685   : > { %v1703_v46 = vpop.permute.xlu0 %1702 }
 0x686   : > { %4502 = vpow2.f32 %v1689_v45  ;;  %4084 = vmatpush3.bf16.msra.mxu1 %v1703_v46 }
 0x687   : > { %4097 = vmatprep.subr.bf16.mxu1 %v4959_v20 }
 0x68f   : > { %v4501_v47 = vpop.eup %4500 }
 0x690   : > { %v1691_v48 = vsel %vm1314_vm4, %v4501_v47, 0.0 }
 0x691   : > { %1692 = vadd.xlane.f32.xlu1 %v1691_v48 }
 0x693   : > { %v4503_v49 = vpop.eup %4502 }
 0x694   : > { %v1694_v50 = vsel %vm1314_vm4, %v4503_v49, 0.0 }
 0x695   : > { %1695 = vadd.xlane.f32.xlu1 %v1694_v50 }
 0x6a6   : > { %1814 = vrot.lane.b32.xlu1 %v5438_v35, %s4964_s21 }
 0x6aa   : > { %1812 = vrot.lane.b32.xlu1 %v5444_v38, %s4964_s21  ;;  %v4400_v38 = vld [vmem:[#allocation10 + $0x28] sm:$0xff]  }
 0x6ab   : > { %4090 = vmatpush3.bf16.msra.mxu0 %v4400_v38 }
 0x6ac   : > { %4091 = vmatprep.subr.bf16.mxu0 %v4959_v20 }
 0x6af   : > { %4092 = vmatpush3.bf16.msra.mxu0 %v4401_v63 }
 0x6b0   : > { %4103 = vmatprep.subr.bf16.mxu0 %v4959_v20 }
 0x71a   : > { %v1693_v51 = vpop.xlane.xlu1 %1692 }
 0x71b   : > { %4504 = vrcp.f32 %v1693_v51 }
 0x71e   : > { %v1696_v54 = vpop.xlane.xlu1 %1695 }
 0x71f   : > { %4506 = vrcp.f32 %v1696_v54 }
 0x722   : > { %v1815_v60 = vpop.permute.xlu1 %1814 }
 0x723   : > { %v1820_v62 = vsel %vm1266_vm1, %v1815_v60, 0 }
 0x726   : > { %v1813_v35 = vpop.permute.xlu1 %1812 }
 0x728   : > { %v4505_v55 = vpop.eup %4504 }
 0x729   : > { %v1699_v58 = vmul.f32 %v4505_v55, %v4501_v47 }
 0x72c   : > { %v4507_v56 = vpop.eup %4506 }
 0x72d   : > { %v1700_v59 = vmul.f32 %v4507_v56, %v4503_v49 }
 0x72f   : > { %v1701_v61 = vpack.c.bf16 %v1700_v59, %v1699_v58  ;;  %v3822_v58 = vld [vmem:[%s5997_s28] ss:$0 sm:$0xff]  ;;  %s986_s28 = scalar_lea.vmem %s6000_s10, %s985_s17  ;;  %s6005_s10 = sld [smem:[#allocation34_spill]] }
 0x731   : > { %4086 = vmatmul.mubr.msk.bf16.vlgmr.msra.gmra.mxu1 %vm1314_vm4, %v1701_v61 }
 0x732   : > { %4098 = vmatpush3.bf16.xpose.msra.mxu1 %v1820_v62  ;;  %4099 = vmatprep.mubr.msk.bf16.mxu1 %vm4960_vm0, %v4959_v20 }
 0x733   : > { %4109 = vmatprep.subr.bf16.mxu1 %v4959_v20 }
 0x735   : > { %p6007_p3 = scmp.ne.s32.totalorder %s6005_s10, 0 }
 0x737   : > { %p4828_p13 = pnand %p4827_p5, %p6007_p3 }
 0x739   : > { %4100 = vmatmul.mubr.msk.bf16.vlgmr.msra.gmra.mxu1 %vm1266_vm1, %v1813_v35  ;;  %p4829_p11 = pneg %p4828_p13 }
 0x73a   : > { %4113 = vmatprep.mubr.msk.bf16.mxu1 %vm4960_vm0, %v4959_v20 }
 0x7f1   : > { %v1742_v1 = vpop.f32.mrf.mxu1 }
 0x7f3   : > { %v4087_v2 = vpop.f32.mrf.mxu1 }
 0x7f4   : > { %v4406_v2 = vld [vmem:[#allocation13 + $0x74] ss:$8 sps:$4 sm:$0xff]  }
 0x7f5   : > { %v1745_v3 = vpop.f32.mrf.mxu1 }
 0x7f6   : > { %v1749_v4 = vpack.c.bf16 %v1745_v3, %v1742_v1  ;;  %v4404_v1 = vld [vmem:[#allocation13 + $0x70] ss:$8 sps:$4 sm:$0xff]   ;;  %v4409_v3 = vld [vmem:[#allocation13 + $0x64] ss:$8 sps:$4 sm:$0xff]  }
 0x7f7   : > { %v4088_v5 = vpop.f32.mrf.mxu1 }
 0x7f8   : > { %4094 = vmatmul.mubr.msk.bf16.vlgmr.msra.gmra.mxu0 %vm1266_vm1, %v1749_v4  ;;  %v4416_v4 = vld [vmem:[#allocation11 + $0x38] sm:$0xff]   ;;  %v4407_v5 = vld [vmem:[#allocation13 + $0x60] ss:$8 sps:$4 sm:$0xff]  }
 0x7f9   : > { %v1856_v6 = vpop.f32.mrf.mxu1  ;;  %4105 = vmatprep.mubr.msk.bf16.mxu0 %vm4960_vm0, %v4959_v20 }
 0x7fa   : > { %v1857_v7 = vadd.f32 %v1856_v6, %v5473_v53  ;;  %v4412_v6 = vld [vmem:[#allocation13 + $0x54] ss:$8 sps:$4 sm:$0xff]  }
 0x7fb   : > { %v4101_v8 = vpop.f32.mrf.mxu1 }
 0x7fc   : > { %v1863_v9 = vsel %vm1314_vm4, %v1857_v7, -inf }
 0x7fd   : > { %1864 = vmax.xlane.f32.xlu0 %v1863_v9  ;;  %v1859_v10 = vpop.f32.mrf.mxu1 }
 0x7fe   : > { %v1860_v11 = vadd.f32 %v1859_v10, %v5477_v57 }
 0x7ff   : > { %v4102_v12 = vpop.f32.mrf.mxu1 }
 0x800   : > { %v1866_v13 = vsel %vm1314_vm4, %v1860_v11, -inf }
 0x801   : > { %1867 = vmax.xlane.f32.xlu1 %v1866_v13 }
 0x812   : > { %1886 = vrot.lane.b32.xlu1 %v5490_v30, %s4964_s21  ;;  %v1622_v30 = vadd.f32 %v5524_v16, %v5528_v26  ;;  %v4402_v16 = vld [vmem:[#allocation10 + $0x38] sm:$0xff]  }
 0x813   : > { %4110 = vmatpush3.bf16.msra.mxu1 %v4402_v16 }
 0x814   : > { %4111 = vmatprep.subr.bf16.mxu1 %v4959_v20 }
 0x817   : > { %4112 = vmatpush3.bf16.msra.mxu1 %v4403_v21 }
 0x818   : > { %2270 = vmatprep.subr.bf16.mxu1 %v4406_v2 }
 0x886   : > { %v1865_v14 = vpop.xlane.xlu0 %1864 }
 0x887   : > { %v1869_v15 = vsub.f32 %v1857_v7, %v1865_v14  ;;  %v4415_v7 = vld [vmem:[#allocation13 + $0x44] ss:$8 sps:$4 sm:$0xff]  }
 0x889   : > { %v1871_v19 = vmul.f32 1.442695, %v1869_v15 }
 0x88a   : > { %v1868_v24 = vpop.xlane.xlu1 %1867 }
 0x88b   : > { %4508 = vpow2.f32 %v1871_v19  ;;  %v1870_v53 = vsub.f32 %v1860_v11, %v1868_v24  ;;  %v4419_v19 = vld [vmem:[#allocation13 + $0x34] ss:$8 sps:$4 sm:$0xff]   ;;  %v4417_v24 = vld [vmem:[#allocation13 + $0x30] ss:$8 sps:$4 sm:$0xff]  }
 0x88d   : > { %v1873_v28 = vmul.f32 1.442695, %v1870_v53  ;;  %v4420_v53 = vld [vmem:[#allocation11 + $0x30] sm:$0xff]  }
 0x88e   : > { %v1887_v31 = vpop.permute.xlu1 %1886 }
 0x88f   : > { %4510 = vpow2.f32 %v1873_v28  ;;  %4104 = vmatpush3.bf16.msra.mxu0 %v1887_v31  ;;  %v4423_v28 = vld [vmem:[#allocation13 + $0x24] ss:$8 sps:$4 sm:$0xff]   ;;  %v4421_v31 = vld [vmem:[#allocation13 + $0x20] ss:$8 sps:$4 sm:$0xff]  }
 0x890   : > { %4117 = vmatprep.subr.bf16.mxu0 %v4959_v20 }
 0x898   : > { %v4509_v57 = vpop.eup %4508 }
 0x899   : > { %v1875_v32 = vsel %vm1314_vm4, %v4509_v57, 0.0 }
 0x89a   : > { %1876 = vadd.xlane.f32.xlu0 %v1875_v32  ;;  %v4427_v32 = vld [vmem:[#allocation13 + $0x14] ss:$8 sps:$4 sm:$0xff]  }
 0x89c   : > { %v4511_v22 = vpop.eup %4510 }
 0x89d   : > { %v1878_v25 = vsel %vm1314_vm4, %v4511_v22, 0.0 }
 0x89e   : > { %1879 = vadd.xlane.f32.xlu0 %v1878_v25  ;;  %v4428_v25 = vld [vmem:[#allocation11 + $0x20] sm:$0xff]  }
 0x8b8   : > { %v1803_v33 = vpop.f32.mrf.mxu0 }
 0x8b9   : > { %v1810_v34 = vadd.f32 %v1803_v33, %v1622_v30  ;;  %v4431_v30 = vld [vmem:[#allocation13 + $0x4] ss:$8 sps:$4 sm:$0xff]   ;;  %v4429_v33 = vld [vmem:[#allocation13] ss:$8 sps:$4 sm:$0xff]  }
 0x8ba   : > { %v4095_v36 = vpop.f32.mrf.mxu0 }
 0x8bb   : > { %v991_v36 = vld [vmem:[%s862_s24 + $0x8] sm:$0xff] }
 0x8bc   : > { %v1806_v39 = vpop.f32.mrf.mxu0 }
 0x8bd   : > { %v1811_v40 = vadd.f32 %v1806_v39, %v1625_v37  ;;  %v4432_v37 = vld [vmem:[#allocation11 + $0x18] sm:$0xff]  }
 0x8be   : > { %v4096_v41 = vpop.f32.mrf.mxu0 }
 0x8bf   : > { %v4434_v41 = vld [vmem:[#allocation11 + $0x8] sm:$0xff]  }
 0x923   : > { %v1877_v42 = vpop.xlane.xlu0 %1876 }
 0x924   : > { %4512 = vrcp.f32 %v1877_v42  ;;  %v4435_v42 = vld [vmem:[#allocation11] sm:$0xff]  }
 0x927   : > { %v1880_v43 = vpop.xlane.xlu0 %1879 }
 0x928   : > { %4514 = vrcp.f32 %v1880_v43 }
 0x931   : > { %v4513_v44 = vpop.eup %4512 }
 0x932   : > { %v1883_v46 = vmul.f32 %v4513_v44, %v4509_v57  ;;  %v4424_v57 = vld [vmem:[#allocation11 + $0x28] sm:$0xff]  }
 0x935   : > { %v4515_v45 = vpop.eup %4514 }
 0x936   : > { %v1884_v47 = vmul.f32 %v4515_v45, %v4511_v22  ;;  %v4425_v22 = vld [vmem:[#allocation13 + $0x10] ss:$8 sps:$4 sm:$0xff]  }
 0x938   : > { %v1885_v48 = vpack.c.bf16 %v1884_v47, %v1883_v46 }
 0x93a   : > { %4106 = vmatmul.mubr.msk.bf16.vlgmr.msra.gmra.mxu0 %vm1314_vm4, %v1885_v48 }
 0x93b   : > { %4133 = vmatprep.mubr.msk.bf16.mxu0 %vm4960_vm0, %v4959_v20  ;;  %4118 = vmatpush3.bf16.msra.mxu0 %v4416_v4 }
 0x93c   : > { %4119 = vmatprep.subr.bf16.mxu0 %v4959_v20 }
 0x93f   : > { %4120 = vmatpush3.bf16.msra.mxu0 %v4420_v53 }
 0x940   : > { %4121 = vmatprep.subr.bf16.mxu0 %v4959_v20 }
 0x943   : > { %4122 = vmatpush3.bf16.msra.mxu0 %v4424_v57 }
 0x944   : > { %4123 = vmatprep.subr.bf16.mxu0 %v4959_v20 }
 0x947   : > { %4124 = vmatpush3.bf16.msra.mxu0 %v4428_v25 }
 0x948   : > { %4125 = vmatprep.subr.bf16.mxu0 %v4959_v20 }
 0x94b   : > { %4126 = vmatpush3.bf16.msra.mxu0 %v4432_v37 }
 0x94c   : > { %4127 = vmatprep.subr.bf16.mxu0 %v4959_v20 }
 0x9fa   : > { %v1926_v26 = vpop.f32.mrf.mxu0 }
 0x9fc   : > { %v4107_v29 = vpop.f32.mrf.mxu0 }
 0x9fe   : > { %v1929_v49 = vpop.f32.mrf.mxu0 }
 0x9ff   : > { %v1933_v50 = vpack.c.bf16 %v1929_v49, %v1926_v26  ;;  %v3823_v26 = vld [vmem:[%s5998_s25] ss:$0 sm:$0xff] }
 0xa00   : > { %v4108_v51 = vpop.f32.mrf.mxu0 }
 0xa01   : > { %4114 = vmatmul.mubr.msk.bf16.vlgmr.msra.gmra.mxu1 %vm1266_vm1, %v1933_v50  ;;  %v3824_v51 = vld [vmem:[%s5999_s1] ss:$0 sm:$0xff]  ;;  %s4965_s1 = smov [#allocation20]  }
 0xa02   : > { %2302 = vmatprep.mubr.bf16.mxu1 %v4958_v0  ;;  %2271 = vmatpush1.bf16.msra.mxu1 %v4404_v1 }
 0xa03   : > { %2272 = vmatprep.subr.bf16.mxu1 %v4409_v3 }
 0xa06   : > { %2273 = vmatpush1.bf16.msra.mxu1 %v4407_v5 }
 0xa07   : > { %2274 = vmatprep.subr.bf16.mxu1 %v4412_v6 }
 0xac1   : > { %v1987_v54 = vpop.f32.mrf.mxu1 }
 0xac2   : > { %v1994_v55 = vadd.f32 %v1987_v54, %v1810_v34  ;;  %v990_v34 = vld [vmem:[%s862_s24] sm:$0xff] }
 0xac3   : > { %v4115_v56 = vpop.f32.mrf.mxu1  ;;  %v2161_v39 = vpack.c.bf16 %v991_v36, %v990_v34 }
 0xac4   : > { %v1996_v59 = vadd.f32 %v1994_v55, %v5407_v17  ;;  %v4410_v17 = vld [vmem:[#allocation13 + $0x50] ss:$8 sps:$4 sm:$0xff]  }
 0xac5   : > { %v1990_v60 = vpop.f32.mrf.mxu1  ;;  %2275 = vmatpush1.bf16.msra.mxu1 %v4410_v17 }
 0xac6   : > { %v1995_v61 = vadd.f32 %v1990_v60, %v1811_v40  ;;  %v2005_v62 = vadd.f32 %v3822_v58, %v1996_v59  ;;  %2276 = vmatprep.subr.bf16.mxu1 %v4415_v7  ;;  %v4433_v40 = vld [vmem:[#allocation11 + $0x10] sm:$0xff]   ;;  %v2178_v59 = vld [vmem:[%s5895_s13] sm:$0x3] }
 0xac7   : > { %v4116_v35 = vpop.f32.mrf.mxu1  ;;  %4128 = vmatpush3.bf16.msra.mxu0 %v4433_v40  ;;  %v2183_v60 = vrot.slane %v2178_v59, %v5432_v27 }
 0xac8   : > { %v1997_v38 = vadd.f32 %v1995_v61, %v5411_v18  ;;  %2009 = vadd.xlane.f32.xlu0 %v2005_v62  ;;  %v4413_v18 = vld [vmem:[#allocation13 + $0x40] ss:$8 sps:$4 sm:$0xff]   ;;  %4129 = vmatprep.subr.bf16.mxu0 %v4959_v20 }
 0xac9   : > { %2277 = vmatpush1.bf16.msra.mxu1 %v4413_v18  ;;  %v3825_v18 = vld [vmem:[%s5893_s11] ss:$0 sm:$0xff] }
 0xaca   : > { %v2006_v63 = vadd.f32 %v3822_v58, %v1997_v38  ;;  %2278 = vmatprep.subr.bf16.mxu1 %v4419_v19 }
 0xacb   : > { %4130 = vmatpush3.bf16.msra.mxu0 %v4434_v41 }
 0xacc   : > { %2011 = vadd.xlane.f32.xlu0 %v2006_v63  ;;  %4131 = vmatprep.subr.bf16.mxu0 %v4959_v20 }
 0xacd   : > { %2279 = vmatpush1.bf16.msra.mxu1 %v4417_v24  ;;  %v998_v24 = vld [vmem:[%s986_s28] sm:$0x1]  ;;  %s3920_s28 = sshll.u32 %s5120_s26, 10 }
 0xace   : > { %2280 = vmatprep.subr.bf16.mxu1 %v4423_v28  ;;  %vm999_vm5 = vcmp.ne.f32.partialorder %v998_v24, 0.0 }
 0xacf   : > { %4132 = vmatpush3.bf16.msra.mxu0 %v4435_v42  ;;  %v1000_v53 = vsel %vm999_vm5, 0.0, %v4962_v52 }
 0xad0   : > { %4137 = vmatprep.subr.bf16.mxu0 %v4959_v20  ;;  %v5650_v28 = vrot.slane %v1000_v53, %v5432_v27  ;;  %v4437_v53 = vld [vmem:[#allocation14] sm:$0xff]  }
 0xad1   : > { %2281 = vmatpush1.bf16.msra.mxu1 %v4421_v31 }
 0xad2   : > { %2282 = vmatprep.subr.bf16.mxu1 %v4427_v32 }
 0xad5   : > { %2283 = vmatpush1.bf16.msra.mxu1 %v4425_v22 }
 0xad6   : > { %2284 = vmatprep.subr.bf16.mxu1 %v4431_v30 }
 0xad9   : > { %2285 = vmatpush1.bf16.msra.mxu1 %v4429_v33 }
 0xada   : > { %4143 = vmatprep.subr.bf16.mxu1 %v4959_v20 }
 0xadc   : > { %2303 = vmatmul.mubr.bf16.vlgmr.msra.gmra.mxu1 %v2161_v39 }
 0xadd   : > { %4145 = vmatprep.mubr.msk.bf16.mxu1 %vm4960_vm0, %v4959_v20 }
 0xb51   : > { %v2010_v8 = vpop.xlane.xlu0 %2009 }
 0xb52   : > { %v2014_v9 = vmul.f32 0.0078125, %v2010_v8 }
 0xb54   : > { %v2016_v10 = vsub.f32 %v2005_v62, %v2014_v9  ;;  %v2187_v62 = vrot.slane %v2178_v59, %v5424_v23 }
 0xb55   : > { %v2012_v11 = vpop.xlane.xlu0 %2011 }
 0xb56   : > { %v2015_v12 = vmul.f32 0.0078125, %v2012_v11  ;;  %v2018_v13 = vmul.f32 %v2016_v10, %v2016_v10 }
 0xb58   : > { %v2017_v14 = vsub.f32 %v2006_v63, %v2015_v12  ;;  %2020 = vadd.xlane.f32.xlu0 %v2018_v13 }
 0xb5a   : > { %v2019_v15 = vmul.f32 %v2017_v14, %v2017_v14 }
 0xb5c   : > { %2022 = vadd.xlane.f32.xlu0 %v2019_v15 }
 0xb9c   : > { %v2304_v61 = vpop.f32.mrf.mxu1 }
 0xb9d   : > { %v2305_v38 = vadd.f32 %v2304_v61, %v2183_v60 }
 0xb9e   : > { %v2306_v35 = vpop.f32.mrf.mxu1 }
 0xb9f   : > { %v2307_v1 = vadd.f32 %v2306_v35, %v2187_v62 }
 0xba0   : > { %v2308_v63 = vpop.f32.mrf.mxu1 }
 0xba1   : > { %v2309_v2 = vadd.f32 %v2308_v63, %v2183_v60 }
 0xba2   : > { %v2310_v3 = vpop.f32.mrf.mxu1 }
 0xba3   : > { %v5616_v4 = vpack.c.bf16 %v2309_v2, %v2305_v38  ;;  %v2311_v5 = vadd.f32 %v2310_v3, %v2187_v62 }
 0xba5   : > { %v5618_v6 = vpack.c.bf16 %v2311_v5, %v2307_v1  ;;  %2445 = vrot.lane.b32.xlu1 %v5616_v4, %s4961_s8  ;;  %v2326_v17 = vsel %vm1266_vm1, %v5616_v4, 0 }
 0xba7   : > { %4144 = vmatpush3.bf16.msra.mxu1 %v5618_v6 }
 0xba8   : > { %4155 = vmatprep.subr.bf16.mxu1 %v4959_v20 }
 0xbe1   : > { %v2021_v43 = vpop.xlane.xlu0 %2020 }
 0xbe2   : > { %v2024_v44 = vmul.f32 0.0078125, %v2021_v43 }
 0xbe4   : > { %v2026_v45 = vadd.f32 1e-05, %v2024_v44 }
 0xbe5   : > { %v2023_v46 = vpop.xlane.xlu0 %2022 }
 0xbe6   : > { %4516 = vrsqrt.f32 %v2026_v45  ;;  %v2025_v47 = vmul.f32 0.0078125, %v2023_v46 }
 0xbe8   : > { %v2027_v48 = vadd.f32 1e-05, %v2025_v47 }
 0xbea   : > { %4518 = vrsqrt.f32 %v2027_v48 }
 0xbf3   : > { %v4517_v16 = vpop.eup %4516 }
 0xbf4   : > { %v2030_v21 = vmul.f32 %v4517_v16, %v2016_v10 }
 0xbf6   : > { %v2038_v50 = vmul.f32 %v3823_v26, %v2030_v21 }
 0xbf7   : > { %v4519_v29 = vpop.eup %4518 }
 0xbf8   : > { %v2031_v49 = vmul.f32 %v4519_v29, %v2017_v14  ;;  %v5603_v55 = vadd.f32 %v3824_v51, %v2038_v50 }
 0xbfa   : > { %v2039_v54 = vmul.f32 %v3823_v26, %v2031_v49 }
 0xbfc   : > { %v5605_v56 = vadd.f32 %v3824_v51, %v2039_v54 }
 0xbfe   : > { %v2048_v58 = vpack.c.bf16 %v5605_v56, %v5603_v55 }
 0xc00   : > { %4134 = vmatmul.mubr.bf16.vlgmr.msra.gmra.mxu0 %v2048_v58 }
 0xc01   : > { %4139 = vmatprep.mubr.msk.bf16.mxu0 %vm4960_vm0, %v4959_v20  ;;  %4138 = vmatpush3.bf16.xpose.msra.mxu0 %v2326_v17 }
 0xc02   : > { %4149 = vmatprep.subr.bf16.mxu0 %v4959_v20 }
 0xc17   : > { %v2446_v10 = vpop.permute.xlu1 %2445 }
 0xc18   : > { %v2451_v15 = vsel %vm1266_vm1, %v2446_v10, 0 }
 0xcc0   : > { %v2154_v7 = vpop.f32.mrf.mxu0 }
 0xcc1   : > { %v2155_v11 = vadd.f32 %v3825_v18, %v2154_v7 }
 0xcc2   : > { %v4135_v8 = vpop.f32.mrf.mxu0 }
 0xcc4   : > { %v2157_v9 = vpop.f32.mrf.mxu0 }
 0xcc5   : > { %v2158_v12 = vadd.f32 %v3825_v18, %v2157_v9  ;;  %v4438_v18 = vld [vmem:[#allocation14 + $0x18] sm:$0xff]  }
 0xcc6   : > { %v4136_v13 = vpop.f32.mrf.mxu0 }
 0xcc7   : > { %v5630_v14 = vpack.c.bf16 %v2158_v12, %v2155_v11 }
 0xcc9   : > { %2442 = vrot.lane.b32.xlu0 %v5630_v14, %s4961_s8  ;;  %4140 = vmatmul.mubr.msk.bf16.vlgmr.msra.gmra.mxu0 %vm1266_vm1, %v5630_v14 }
 0xcca   : > { %4150 = vmatpush3.bf16.xpose.msra.mxu0 %v2451_v15  ;;  %4151 = vmatprep.mubr.msk.bf16.mxu0 %vm4960_vm0, %v4959_v20 }
 0xccb   : > { %4161 = vmatprep.subr.bf16.mxu0 %v4959_v20 }
 0xd3b   : > { %v2443_v19 = vpop.permute.xlu0 %2442 }
 0xd3c   : > { %4152 = vmatmul.mubr.msk.bf16.vlgmr.msra.gmra.mxu0 %vm1266_vm1, %v2443_v19  ;;  %v4436_v19 = vld [vmem:[#allocation14 + $0x8] sm:$0xff]  }
 0xd3d   : > { %4165 = vmatprep.mubr.msk.bf16.mxu0 %vm4960_vm0, %v4959_v20  ;;  %4162 = vmatpush3.bf16.msra.mxu0 %v4438_v18 }
 0xd3e   : > { %4163 = vmatprep.subr.bf16.mxu0 %v4959_v20 }
 0xd89   : > { %v2362_v31 = vpop.f32.mrf.mxu0 }
 0xd8a   : > { %v2363_v57 = vadd.f32 %v2362_v31, %v5650_v28  ;;  %v4439_v31 = vld [vmem:[#allocation14 + $0x10] sm:$0xff]  }
 0xd8b   : > { %v4141_v32 = vpop.f32.mrf.mxu0  ;;  %4164 = vmatpush3.bf16.msra.mxu0 %v4439_v31 }
 0xd8c   : > { %v2369_v22 = vsel %vm1314_vm4, %v2363_v57, -inf  ;;  %4177 = vmatprep.subr.bf16.mxu0 %v4959_v20 }
 0xd8d   : > { %2370 = vmax.xlane.f32.xlu1 %v2369_v22  ;;  %v2365_v25 = vpop.f32.mrf.mxu0 }
 0xd8e   : > { %v2366_v30 = vadd.f32 %v2365_v25, %v5650_v28 }
 0xd8f   : > { %v4142_v33 = vpop.f32.mrf.mxu0 }
 0xd90   : > { %v2372_v34 = vsel %vm1314_vm4, %v2366_v30, -inf }
 0xd91   : > { %2373 = vmax.xlane.f32.xlu0 %v2372_v34 }
 0xdfc   : > { %v2487_v36 = vpop.f32.mrf.mxu0 }
 0xdfd   : > { %v2488_v52 = vadd.f32 %v2487_v36, %v5650_v28 }
 0xdfe   : > { %v4153_v37 = vpop.f32.mrf.mxu0 }
 0xdff   : > { %v2494_v39 = vsel %vm1314_vm4, %v2488_v52, -inf }
 0xe00   : > { %2495 = vmax.xlane.f32.xlu1 %v2494_v39  ;;  %v2490_v40 = vpop.f32.mrf.mxu0 }
 0xe01   : > { %v2491_v41 = vadd.f32 %v2490_v40, %v5650_v28 }
 0xe02   : > { %v4154_v42 = vpop.f32.mrf.mxu0 }
 0xe03   : > { %v2497_v43 = vsel %vm1314_vm4, %v2491_v41, -inf }
 0xe04   : > { %2498 = vmax.xlane.f32.xlu1 %v2497_v43 }
 0xe16   : > { %v2371_v44 = vpop.xlane.xlu1 %2370 }
 0xe17   : > { %v2375_v45 = vsub.f32 %v2363_v57, %v2371_v44 }
 0xe19   : > { %v2377_v46 = vmul.f32 1.442695, %v2375_v45 }
 0xe1a   : > { %v2374_v47 = vpop.xlane.xlu0 %2373 }
 0xe1b   : > { %4520 = vpow2.f32 %v2377_v46  ;;  %v2376_v48 = vsub.f32 %v2366_v30, %v2374_v47 }
 0xe1d   : > { %v2379_v16 = vmul.f32 1.442695, %v2376_v48 }
 0xe1f   : > { %4522 = vpow2.f32 %v2379_v16 }
 0xe28   : > { %v4521_v21 = vpop.eup %4520 }
 0xe29   : > { %v2381_v26 = vsel %vm1314_vm4, %v4521_v21, 0.0 }
 0xe2a   : > { %2382 = vadd.xlane.f32.xlu1 %v2381_v26 }
 0xe2c   : > { %v4523_v29 = vpop.eup %4522 }
 0xe2d   : > { %v2384_v49 = vsel %vm1314_vm4, %v4523_v29, 0.0 }
 0xe2e   : > { %2385 = vadd.xlane.f32.xlu1 %v2384_v49 }
 0xe89   : > { %v2496_v50 = vpop.xlane.xlu1 %2495 }
 0xe8a   : > { %v2500_v51 = vsub.f32 %v2488_v52, %v2496_v50 }
 0xe8c   : > { %v2502_v54 = vmul.f32 1.442695, %v2500_v51 }
 0xe8d   : > { %v2499_v58 = vpop.xlane.xlu1 %2498 }
 0xe8e   : > { %4524 = vpow2.f32 %v2502_v54  ;;  %v2501_v59 = vsub.f32 %v2491_v41, %v2499_v58 }
 0xe90   : > { %v2504_v60 = vmul.f32 1.442695, %v2501_v59 }
 0xe92   : > { %4526 = vpow2.f32 %v2504_v60 }
 0xe9b   : > { %v4525_v61 = vpop.eup %4524 }
 0xe9c   : > { %v2506_v62 = vsel %vm1314_vm4, %v4525_v61, 0.0 }
 0xe9d   : > { %2507 = vadd.xlane.f32.xlu0 %v2506_v62 }
 0xe9f   : > { %v4527_v35 = vpop.eup %4526 }
 0xea0   : > { %v2509_v38 = vsel %vm1314_vm4, %v4527_v35, 0.0 }
 0xea1   : > { %2510 = vadd.xlane.f32.xlu1 %v2509_v38 }
 0xeb2   : > { %2684 = vrot.lane.b32.xlu1 %v5616_v4, %s4963_s23 }
 0xeb3   : > { %2518 = vrot.lane.b32.xlu0 %v5618_v6, %s4961_s8  ;;  %v2383_v63 = vpop.xlane.xlu1 %2382 }
 0xeb4   : > { %4528 = vrcp.f32 %v2383_v63 }
 0xeb6   : > { %2682 = vrot.lane.b32.xlu1 %v5630_v14, %s4963_s23 }
 0xeb7   : > { %v2386_v1 = vpop.xlane.xlu1 %2385 }
 0xeb8   : > { %4530 = vrcp.f32 %v2386_v1 }
 0xec1   : > { %v4529_v2 = vpop.eup %4528 }
 0xec2   : > { %v2388_v3 = vmul.f32 %v4529_v2, %v4521_v21 }
 0xec4   : > { %3050 = vst.msk [vmem:[%s5671_s19] sm:$0xff] %vm1314_vm4, %v2388_v3 }
 0xec5   : > { %v4531_v5 = vpop.eup %4530 }
 0xec6   : > { %v2390_v17 = vmul.f32 %v4531_v5, %v4523_v29 }
 0xec8   : > { %v2391_v7 = vpack.c.bf16 %v2390_v17, %v2388_v3  ;;  %3051 = vst.msk [vmem:[%s5671_s19 + $0x8] sm:$0xff] %vm1314_vm4, %v2390_v17 }
 0xeca   : > { %4146 = vmatmul.mubr.msk.bf16.vlgmr.msra.gmra.mxu1 %vm1314_vm4, %v2391_v7 }
 0xecb   : > { %4157 = vmatprep.mubr.msk.bf16.mxu1 %vm4960_vm0, %v4959_v20 }
 0xf26   : > { %v2508_v8 = vpop.xlane.xlu0 %2507 }
 0xf27   : > { %4532 = vrcp.f32 %v2508_v8 }
 0xf2a   : > { %v2519_v9 = vpop.permute.xlu0 %2518  ;;  %v2511_v10 = vpop.xlane.xlu1 %2510 }
 0xf2b   : > { %4534 = vrcp.f32 %v2511_v10  ;;  %4156 = vmatpush3.bf16.msra.mxu1 %v2519_v9 }
 0xf2c   : > { %4169 = vmatprep.subr.bf16.mxu1 %v4959_v20 }
 0xf2e   : > { %v2685_v36 = vpop.permute.xlu1 %2684 }
 0xf2f   : > { %v2690_v40 = vsel %vm1266_vm1, %v2685_v36, 0 }
 0xf32   : > { %v2683_v41 = vpop.permute.xlu1 %2682 }
 0xf34   : > { %v4533_v11 = vpop.eup %4532 }
 0xf35   : > { %v2513_v12 = vmul.f32 %v4533_v11, %v4525_v61 }
 0xf37   : > { %3052 = vst.msk [vmem:[%s5671_s19 + $0x10] sm:$0xff] %vm1314_vm4, %v2513_v12 }
 0xf38   : > { %v4535_v13 = vpop.eup %4534 }
 0xf39   : > { %v2515_v15 = vmul.f32 %v4535_v13, %v4527_v35  ;;  %v4440_v13 = vld [vmem:[#allocation14 + $0x28] sm:$0xff]  }
 0xf3b   : > { %v2516_v24 = vpack.c.bf16 %v2515_v15, %v2513_v12  ;;  %3053 = vst.msk [vmem:[%s5671_s19 + $0x18] sm:$0xff] %vm1314_vm4, %v2515_v15  ;;  %v4441_v15 = vld [vmem:[#allocation14 + $0x20] sm:$0xff]  }
 0xf3d   : > { %4158 = vmatmul.mubr.msk.bf16.vlgmr.msra.gmra.mxu1 %vm1314_vm4, %v2516_v24 }
 0xf3e   : > { %4170 = vmatpush3.bf16.msra.mxu1 %v4436_v19  ;;  %4173 = vmatprep.mubr.msk.bf16.mxu1 %vm4960_vm0, %v4959_v20 }
 0xf3f   : > { %4171 = vmatprep.subr.bf16.mxu1 %v4959_v20 }
 0xf42   : > { %4172 = vmatpush3.bf16.msra.mxu1 %v4437_v53 }
 0xf43   : > { %4183 = vmatprep.subr.bf16.mxu1 %v4959_v20 }
 0xf8a   : > { %v2429_v57 = vpop.f32.mrf.mxu1 }
 0xf8c   : > { %v4147_v32 = vpop.f32.mrf.mxu1 }
 0xf8e   : > { %v2432_v22 = vpop.f32.mrf.mxu1 }
 0xf8f   : > { %v2436_v25 = vpack.c.bf16 %v2432_v22, %v2429_v57 }
 0xf90   : > { %v4148_v30 = vpop.f32.mrf.mxu1 }
 0xf91   : > { %4174 = vmatmul.mubr.msk.bf16.vlgmr.msra.gmra.mxu1 %vm1266_vm1, %v2436_v25 }
 0xf92   : > { %4185 = vmatprep.mubr.msk.bf16.mxu1 %vm4960_vm0, %v4959_v20 }
 0xffd   : > { %v2558_v33 = vpop.f32.mrf.mxu1 }
 0xfff   : > { %v4159_v34 = vpop.f32.mrf.mxu1 }
0x1001   : > { %v2561_v52 = vpop.f32.mrf.mxu1 }
0x1002   : > { %v2565_v37 = vpack.c.bf16 %v2561_v52, %v2558_v33 }
0x1003   : > { %v4160_v39 = vpop.f32.mrf.mxu1 }
0x1004   : > { %4166 = vmatmul.mubr.msk.bf16.vlgmr.msra.gmra.mxu0 %vm1266_vm1, %v2565_v37 }
0x1005   : > { %4178 = vmatpush3.bf16.xpose.msra.mxu0 %v2690_v40  ;;  %4179 = vmatprep.mubr.msk.bf16.mxu0 %vm4960_vm0, %v4959_v20 }
0x1006   : > { %4189 = vmatprep.subr.bf16.mxu0 %v4959_v20 }
0x100c   : > { %4180 = vmatmul.mubr.msk.bf16.vlgmr.msra.gmra.mxu0 %vm1266_vm1, %v2683_v41 }
0x100d   : > { %4193 = vmatprep.mubr.msk.bf16.mxu0 %vm4960_vm0, %v4959_v20  ;;  %4190 = vmatpush3.bf16.msra.mxu0 %v4440_v13  ;;  %v4446_v13 = vld [vmem:[#allocation16 + $0x74] ss:$8 sps:$4 sm:$0xff]  }
0x100e   : > { %4191 = vmatprep.subr.bf16.mxu0 %v4959_v20 }
0x1011   : > { %4192 = vmatpush3.bf16.msra.mxu0 %v4441_v15 }
0x1012   : > { %4203 = vmatprep.subr.bf16.mxu0 %v4959_v20 }
0x1051   : > { %v5703_v42 = vpop.f32.mrf.mxu1 }
0x1053   : > { %v4175_v43 = vpop.f32.mrf.mxu1 }
0x1055   : > { %v5705_v44 = vpop.f32.mrf.mxu1 }
0x1057   : > { %v4176_v45 = vpop.f32.mrf.mxu1 }
0x10c4   : > { %v5707_v46 = vpop.f32.mrf.mxu0 }
0x10c6   : > { %v4167_v47 = vpop.f32.mrf.mxu0 }
0x10c8   : > { %v5709_v48 = vpop.f32.mrf.mxu0 }
0x10ca   : > { %v4168_v16 = vpop.f32.mrf.mxu0 }
0x10cc   : > { %v2726_v21 = vpop.f32.mrf.mxu0 }
0x10cd   : > { %v2727_v26 = vadd.f32 %v2726_v21, %v5650_v28 }
0x10ce   : > { %v4181_v29 = vpop.f32.mrf.mxu0 }
0x10cf   : > { %v2733_v49 = vsel %vm1314_vm4, %v2727_v26, -inf }
0x10d0   : > { %2734 = vmax.xlane.f32.xlu0 %v2733_v49  ;;  %v2729_v50 = vpop.f32.mrf.mxu0 }
0x10d1   : > { %v2730_v51 = vadd.f32 %v2729_v50, %v5650_v28 }
0x10d2   : > { %v4182_v54 = vpop.f32.mrf.mxu0 }
0x10d3   : > { %v2736_v58 = vsel %vm1314_vm4, %v2730_v51, -inf }
0x10d4   : > { %2737 = vmax.xlane.f32.xlu1 %v2736_v58 }
0x10e5   : > { %2756 = vrot.lane.b32.xlu1 %v5618_v6, %s4963_s23 }
0x10e9   : > { %2866 = vrot.lane.b32.xlu1 %v5630_v14, %s4964_s21 }
0x1159   : > { %v2735_v59 = vpop.xlane.xlu0 %2734 }
0x115a   : > { %v2739_v60 = vsub.f32 %v2727_v26, %v2735_v59 }
0x115c   : > { %v2741_v61 = vmul.f32 1.442695, %v2739_v60 }
0x115d   : > { %v2738_v62 = vpop.xlane.xlu1 %2737 }
0x115e   : > { %4536 = vpow2.f32 %v2741_v61  ;;  %v2740_v35 = vsub.f32 %v2730_v51, %v2738_v62  ;;  %v2679_v51 = vadd.f32 %v5705_v44, %v5709_v48  ;;  %v4442_v44 = vld [vmem:[#allocation14 + $0x38] sm:$0xff]   ;;  %v4443_v48 = vld [vmem:[#allocation14 + $0x30] sm:$0xff]  }
0x1160   : > { %v2743_v38 = vmul.f32 1.442695, %v2740_v35 }
0x1161   : > { %v2757_v63 = vpop.permute.xlu1 %2756 }
0x1162   : > { %4538 = vpow2.f32 %v2743_v38  ;;  %4184 = vmatpush3.bf16.msra.mxu1 %v2757_v63 }
0x1163   : > { %4197 = vmatprep.subr.bf16.mxu1 %v4959_v20 }
0x116b   : > { %v4537_v1 = vpop.eup %4536 }
0x116c   : > { %v2745_v2 = vsel %vm1314_vm4, %v4537_v1, 0.0 }
0x116d   : > { %2746 = vadd.xlane.f32.xlu0 %v2745_v2 }
0x116f   : > { %v4539_v3 = vpop.eup %4538 }
0x1170   : > { %v2748_v14 = vsel %vm1314_vm4, %v4539_v3, 0.0 }
0x1171   : > { %2749 = vadd.xlane.f32.xlu0 %v2748_v14 }
0x1187   : > { %2868 = vrot.lane.b32.xlu0 %v5616_v4, %s4964_s21  ;;  %v2867_v4 = vpop.permute.xlu1 %2866 }
0x11f6   : > { %v2747_v5 = vpop.xlane.xlu0 %2746 }
0x11f7   : > { %4540 = vrcp.f32 %v2747_v5 }
0x11fa   : > { %v2750_v17 = vpop.xlane.xlu0 %2749 }
0x11fb   : > { %4542 = vrcp.f32 %v2750_v17 }
0x11fe   : > { %v2869_v10 = vpop.permute.xlu0 %2868 }
0x11ff   : > { %v2874_v12 = vsel %vm1266_vm1, %v2869_v10, 0 }
0x1204   : > { %v4541_v7 = vpop.eup %4540 }
0x1205   : > { %v2752_v18 = vmul.f32 %v4541_v7, %v4537_v1 }
0x1207   : > { %3054 = vst.msk [vmem:[%s5671_s19 + $0x20] sm:$0xff] %vm1314_vm4, %v2752_v18 }
0x1208   : > { %v4543_v8 = vpop.eup %4542 }
0x1209   : > { %v2754_v9 = vmul.f32 %v4543_v8, %v4539_v3 }
0x120b   : > { %v2755_v11 = vpack.c.bf16 %v2754_v9, %v2752_v18  ;;  %3055 = vst.msk [vmem:[%s5671_s19 + $0x28] sm:$0xff] %vm1314_vm4, %v2754_v9 }
0x120d   : > { %4186 = vmatmul.mubr.msk.bf16.vlgmr.msra.gmra.mxu1 %vm1314_vm4, %v2755_v11 }
0x120e   : > { %4198 = vmatpush3.bf16.xpose.msra.mxu1 %v2874_v12  ;;  %4199 = vmatprep.mubr.msk.bf16.mxu1 %vm4960_vm0, %v4959_v20 }
0x120f   : > { %4209 = vmatprep.subr.bf16.mxu1 %v4959_v20 }
0x1215   : > { %4200 = vmatmul.mubr.msk.bf16.vlgmr.msra.gmra.mxu1 %vm1266_vm1, %v2867_v4  ;;  %v4444_v4 = vld [vmem:[#allocation16 + $0x70] ss:$8 sps:$4 sm:$0xff]  }
0x1216   : > { %4213 = vmatprep.mubr.msk.bf16.mxu1 %vm4960_vm0, %v4959_v20  ;;  %4210 = vmatpush3.bf16.msra.mxu1 %v4442_v44 }
0x1217   : > { %4211 = vmatprep.subr.bf16.mxu1 %v4959_v20 }
0x121a   : > { %4212 = vmatpush3.bf16.msra.mxu1 %v4443_v48 }
0x12cd   : > { %v2796_v19 = vpop.f32.mrf.mxu1 }
0x12cf   : > { %v4187_v24 = vpop.f32.mrf.mxu1 }
0x12d1   : > { %v2799_v53 = vpop.f32.mrf.mxu1 }
0x12d2   : > { %v2803_v31 = vpack.c.bf16 %v2799_v53, %v2796_v19 }
0x12d3   : > { %v4188_v57 = vpop.f32.mrf.mxu1 }
0x12d4   : > { %4194 = vmatmul.mubr.msk.bf16.vlgmr.msra.gmra.mxu0 %vm1266_vm1, %v2803_v31 }
0x12d5   : > { %v2910_v32 = vpop.f32.mrf.mxu1  ;;  %4205 = vmatprep.mubr.msk.bf16.mxu0 %vm4960_vm0, %v4959_v20 }
0x12d6   : > { %v2911_v22 = vadd.f32 %v2910_v32, %v5650_v28  ;;  %v4449_v32 = vld [vmem:[#allocation16 + $0x64] ss:$8 sps:$4 sm:$0xff]  }
0x12d7   : > { %v4201_v25 = vpop.f32.mrf.mxu1 }
0x12d8   : > { %v2917_v30 = vsel %vm1314_vm4, %v2911_v22, -inf  ;;  %v4452_v25 = vld [vmem:[#allocation16 + $0x54] ss:$8 sps:$4 sm:$0xff]  }
0x12d9   : > { %2918 = vmax.xlane.f32.xlu1 %v2917_v30  ;;  %v2913_v33 = vpop.f32.mrf.mxu1  ;;  %v4450_v30 = vld [vmem:[#allocation16 + $0x50] ss:$8 sps:$4 sm:$0xff]  }
0x12da   : > { %v2914_v34 = vadd.f32 %v2913_v33, %v5650_v28  ;;  %v2676_v28 = vadd.f32 %v5703_v42, %v5707_v46  ;;  %v4453_v33 = vld [vmem:[#allocation16 + $0x40] ss:$8 sps:$4 sm:$0xff]  }
0x12db   : > { %v4202_v36 = vpop.f32.mrf.mxu1 }
0x12dc   : > { %v2920_v52 = vsel %vm1314_vm4, %v2914_v34, -inf  ;;  %v4458_v36 = vld [vmem:[#allocation16 + $0x34] ss:$8 sps:$4 sm:$0xff]  }
0x12dd   : > { %2921 = vmax.xlane.f32.xlu0 %v2920_v52  ;;  %v4456_v52 = vld [vmem:[#allocation16 + $0x30] ss:$8 sps:$4 sm:$0xff]  }
0x1362   : > { %v2919_v37 = vpop.xlane.xlu1 %2918 }
0x1363   : > { %v2923_v39 = vsub.f32 %v2911_v22, %v2919_v37  ;;  %v4447_v22 = vld [vmem:[#allocation16 + $0x60] ss:$8 sps:$4 sm:$0xff]   ;;  %v4461_v37 = vld [vmem:[#allocation16 + $0x24] ss:$8 sps:$4 sm:$0xff]  }
0x1365   : > { %v2925_v40 = vmul.f32 1.442695, %v2923_v39  ;;  %v4459_v39 = vld [vmem:[#allocation16 + $0x20] ss:$8 sps:$4 sm:$0xff]  }
0x1366   : > { %v2922_v41 = vpop.xlane.xlu0 %2921 }
0x1367   : > { %4544 = vpow2.f32 %v2925_v40  ;;  %v2924_v43 = vsub.f32 %v2914_v34, %v2922_v41  ;;  %v4455_v34 = vld [vmem:[#allocation16 + $0x44] ss:$8 sps:$4 sm:$0xff]   ;;  %v4464_v40 = vld [vmem:[#allocation16 + $0x14] ss:$8 sps:$4 sm:$0xff]   ;;  %v4462_v41 = vld [vmem:[#allocation16 + $0x10] ss:$8 sps:$4 sm:$0xff]  }
0x1369   : > { %v2927_v45 = vmul.f32 1.442695, %v2924_v43  ;;  %v4467_v43 = vld [vmem:[#allocation16 + $0x4] ss:$8 sps:$4 sm:$0xff]  }
0x136b   : > { %4546 = vpow2.f32 %v2927_v45  ;;  %v4465_v45 = vld [vmem:[#allocation16] ss:$8 sps:$4 sm:$0xff]  }
0x1374   : > { %v4545_v47 = vpop.eup %4544 }
0x1375   : > { %v2929_v16 = vsel %vm1314_vm4, %v4545_v47, 0.0 }
0x1376   : > { %2930 = vadd.xlane.f32.xlu0 %v2929_v16  ;;  %v4469_v16 = vld [vmem:[#allocation17 + $0x38] sm:$0xff]  }
0x1378   : > { %v4547_v21 = vpop.eup %4546 }
0x1379   : > { %v2932_v26 = vsel %vm1314_vm4, %v4547_v21, 0.0 }
0x137a   : > { %2933 = vadd.xlane.f32.xlu1 %v2932_v26  ;;  %v4471_v26 = vld [vmem:[#allocation17 + $0x30] sm:$0xff]  }
0x138c   : > { %2940 = vrot.lane.b32.xlu0 %v5618_v6, %s4964_s21  ;;  %s6006_s21 = sld [smem:[#allocation55_spill]] }
0x1392   : > { %s5795_s25 = scalar_lea.hbm %s6006_s21, %s3920_s28 }
0x1394   : > { %v2857_v29 = vpop.f32.mrf.mxu0 }
0x1395   : > { %v2864_v49 = vadd.f32 %v2857_v29, %v2676_v28  ;;  %v4472_v28 = vld [vmem:[#allocation17 + $0x68] sm:$0xff]  }
0x1396   : > { %v4195_v50 = vpop.f32.mrf.mxu0  ;;  %v4473_v29 = vld [vmem:[#allocation17 + $0x28] sm:$0xff]  }
0x1397   : > { %v4475_v50 = vld [vmem:[#allocation17 + $0x20] sm:$0xff]  }
0x1398   : > { %v2860_v54 = vpop.f32.mrf.mxu0 }
0x1399   : > { %v2865_v58 = vadd.f32 %v2860_v54, %v2679_v51  ;;  %v4476_v51 = vld [vmem:[#allocation17 + $0x58] sm:$0xff]  }
0x139a   : > { %v4196_v59 = vpop.f32.mrf.mxu0  ;;  %v4477_v54 = vld [vmem:[#allocation17 + $0x18] sm:$0xff]  }
0x13ff   : > { %v2931_v60 = vpop.xlane.xlu0 %2930 }
0x1400   : > { %4548 = vrcp.f32 %v2931_v60 }
0x1403   : > { %v2934_v61 = vpop.xlane.xlu1 %2933  ;;  %v2941_v62 = vpop.permute.xlu0 %2940 }
0x1404   : > { %4550 = vrcp.f32 %v2934_v61  ;;  %4204 = vmatpush3.bf16.msra.mxu0 %v2941_v62 }
0x1405   : > { %3218 = vmatprep.subr.bf16.mxu0 %v4446_v13 }
0x140d   : > { %v4549_v6 = vpop.eup %4548 }
0x140e   : > { %v2936_v35 = vmul.f32 %v4549_v6, %v4545_v47  ;;  %v4468_v47 = vld [vmem:[#allocation17 + $0x78] sm:$0xff]  }
0x140f   : > { %3995 = vmatprep.subr.bf16.mxu1 %v4468_v47 }
0x1410   : > { %3056 = vst.msk [vmem:[%s5671_s19 + $0x30] sm:$0xff] %vm1314_vm4, %v2936_v35 }
0x1411   : > { %v4551_v42 = vpop.eup %4550 }
0x1412   : > { %v2938_v46 = vmul.f32 %v4551_v42, %v4547_v21  ;;  %v4470_v21 = vld [vmem:[#allocation17 + $0x70] sm:$0xff]  }
0x1414   : > { %v2939_v38 = vpack.c.bf16 %v2938_v46, %v2936_v35  ;;  %3057 = vst.msk [vmem:[%s5671_s19 + $0x38] sm:$0xff] %vm1314_vm4, %v2938_v46  ;;  %v3871_v46 = vld [vmem:[%s6001_s30] ss:$0 sm:$0xff]  ;;  %s3493_s30 = scalar_lea.sflag [#allocation21], %s5370_s3 }
0x1416   : > { %4206 = vmatmul.mubr.msk.bf16.vlgmr.msra.gmra.mxu0 %vm1314_vm4, %v2939_v38 }
0x1417   : > { %3250 = vmatprep.mubr.bf16.mxu0 %v4958_v0  ;;  %v3870_v0 = vld [vmem:[%s5897_s15] ss:$0 sm:$0xff]  ;;  %3219 = vmatpush1.bf16.msra.mxu0 %v4444_v4 }
0x1418   : > { %3220 = vmatprep.subr.bf16.mxu0 %v4449_v32 }
0x141b   : > { %3221 = vmatpush1.bf16.msra.mxu0 %v4447_v22 }
0x141c   : > { %3222 = vmatprep.subr.bf16.mxu0 %v4452_v25 }
0x141f   : > { %3223 = vmatpush1.bf16.msra.mxu0 %v4450_v30 }
0x1420   : > { %3224 = vmatprep.subr.bf16.mxu0 %v4455_v34 }
0x1423   : > { %3225 = vmatpush1.bf16.msra.mxu0 %v4453_v33 }
0x1424   : > { %3226 = vmatprep.subr.bf16.mxu0 %v4458_v36 }
0x1427   : > { %3227 = vmatpush1.bf16.msra.mxu0 %v4456_v52 }
0x1428   : > { %3228 = vmatprep.subr.bf16.mxu0 %v4461_v37 }
0x142b   : > { %3229 = vmatpush1.bf16.msra.mxu0 %v4459_v39 }
0x142c   : > { %3230 = vmatprep.subr.bf16.mxu0 %v4464_v40 }
0x142f   : > { %3231 = vmatpush1.bf16.msra.mxu0 %v4462_v41 }
0x1430   : > { %3232 = vmatprep.subr.bf16.mxu0 %v4467_v43 }
0x1433   : > { %3233 = vmatpush1.bf16.msra.mxu0 %v4465_v45 }
0x14d6   : > { %v2980_v63 = vpop.f32.mrf.mxu0 }
0x14d8   : > { %v4207_v1 = vpop.f32.mrf.mxu0 }
0x14da   : > { %v2983_v2 = vpop.f32.mrf.mxu0 }
0x14db   : > { %v2987_v3 = vpack.c.bf16 %v2983_v2, %v2980_v63  ;;  %v3872_v63 = vld [vmem:[%s6002_s7] ss:$0 sm:$0xff]  ;;  %s4830_s7 = sshll.u32 %s4965_s1, 4  ;;  %s4831_s7 = int_to_ptr.vmem [resolvable:$false] %s4830_s7 }
0x14dc   : > { %v4208_v14 = vpop.f32.mrf.mxu0  ;;  %s4832_s19 = scalar_lea.vmem %s4831_s7, 2048  ;;  %p4833_p1 = scmp.lt.s32.totalorder %s5797_s29, %s4831_s7 }
0x14dd   : > { %4214 = vmatmul.mubr.msk.bf16.vlgmr.msra.gmra.mxu1 %vm1266_vm1, %v2987_v3  ;;  %p4834_p12 = scmp.lt.s32.totalorder %s4832_s19, %s4826_s0 }
0x14de   : > { %3996 = vmatpush3.bf16.msra.mxu1 %v4469_v16 }
0x14df   : > { %3997 = vmatprep.subr.bf16.mxu1 %v4470_v21  ;;  %p4835_p6 = por %p4834_p12, %p4833_p1 }
0x14e1   : > { %p4836_p7 = pnand %p4835_p6, %p4829_p11 }
0x14e2   : > { %3998 = vmatpush3.bf16.msra.mxu1 %v4471_v26 }
0x14e3   : > { %3999 = vmatprep.subr.bf16.mxu1 %v4472_v28 }
0x14e6   : > { %4000 = vmatpush3.bf16.msra.mxu1 %v4473_v29 }
0x159d   : > { %v3041_v5 = vpop.f32.mrf.mxu1 }
0x159e   : > { %v3048_v17 = vadd.f32 %v3041_v5, %v2864_v49  ;;  %v4474_v49 = vld [vmem:[#allocation17 + $0x60] sm:$0xff]   ;;  %v4478_v5 = vld [vmem:[#allocation17 + $0x50] sm:$0xff]  }
0x159f   : > { %v4215_v7 = vpop.f32.mrf.mxu1  ;;  %4001 = vmatprep.subr.bf16.mxu1 %v4474_v49 }
0x15a0   : > { %v3058_v18 = vadd.f32 %v3048_v17, %v5603_v55  ;;  %4002 = vmatpush3.bf16.msra.mxu1 %v4475_v50  ;;  %v4479_v17 = vld [vmem:[#allocation17 + $0x10] sm:$0xff]   ;;  %v4480_v7 = vld [vmem:[#allocation17 + $0x48] sm:$0xff]  }
0x15a1   : > { %v3044_v8 = vpop.f32.mrf.mxu1  ;;  %4003 = vmatprep.subr.bf16.mxu1 %v4476_v51 }
0x15a2   : > { %v3049_v20 = vadd.f32 %v3044_v8, %v2865_v58  ;;  %v3067_v9 = vadd.f32 %v3870_v0, %v3058_v18  ;;  %v4482_v18 = vld [vmem:[#allocation17 + $0x40] sm:$0xff]  }
0x15a3   : > { %v4216_v10 = vpop.f32.mrf.mxu1  ;;  %v4483_v8 = vld [vmem:[#allocation17] sm:$0xff]  }
0x15a4   : > { %v3059_v11 = vadd.f32 %v3049_v20, %v5605_v56  ;;  %3071 = vadd.xlane.f32.xlu1 %v3067_v9  ;;  %4004 = vmatpush3.bf16.msra.mxu1 %v4477_v54  ;;  %v3126_v20 = vld [vmem:[%s6003_s9] sm:$0x3] }
0x15a5   : > { %4005 = vmatprep.subr.bf16.mxu1 %v4478_v5  ;;  %v3135_v10 = vrot.slane %v3126_v20, %v5424_v23  ;;  %v3889_v23 = vld [vmem:[%s6004_s27] ss:$0 sm:$0xff] }
0x15a6   : > { %v3068_v12 = vadd.f32 %v3870_v0, %v3059_v11  ;;  %v4481_v0 = vld [vmem:[#allocation17 + $0x8] sm:$0xff]   ;;  %v3131_v11 = vrot.slane %v3126_v20, %v5432_v27 }
0x15a8   : > { %3073 = vadd.xlane.f32.xlu1 %v3068_v12  ;;  %4006 = vmatpush3.bf16.msra.mxu1 %v4479_v17 }
0x15a9   : > { %4007 = vmatprep.subr.bf16.mxu1 %v4480_v7 }
0x15ac   : > { %4008 = vmatpush3.bf16.msra.mxu1 %v4481_v0 }
0x15ad   : > { %4009 = vmatprep.subr.bf16.mxu1 %v4482_v18 }
0x15b0   : > { %4010 = vmatpush3.bf16.msra.mxu1 %v4483_v8 }
0x162d   : > { %v3072_v15 = vpop.xlane.xlu1 %3071 }
0x162e   : > { %v3075_v19 = vmul.f32 0.0078125, %v3072_v15 }
0x1630   : > { %v5766_v24 = vsub.f32 %v3067_v9, %v3075_v19 }
0x1631   : > { %v3074_v53 = vpop.xlane.xlu1 %3073 }
0x1632   : > { %v3076_v31 = vmul.f32 0.0078125, %v3074_v53  ;;  %v3079_v55 = vmul.f32 %v5766_v24, %v5766_v24 }
0x1634   : > { %v5770_v57 = vsub.f32 %v3068_v12, %v3076_v31  ;;  %3081 = vadd.xlane.f32.xlu1 %v3079_v55 }
0x1636   : > { %v3080_v56 = vmul.f32 %v5770_v57, %v5770_v57 }
0x1638   : > { %3083 = vadd.xlane.f32.xlu1 %v3080_v56 }
0x16bd   : > { %v3082_v58 = vpop.xlane.xlu1 %3081 }
0x16be   : > { %v3085_v59 = vmul.f32 0.0078125, %v3082_v58 }
0x16c0   : > { %v3087_v60 = vadd.f32 1e-05, %v3085_v59 }
0x16c1   : > { %v3084_v61 = vpop.xlane.xlu1 %3083 }
0x16c2   : > { %4552 = vrsqrt.f32 %v3087_v60  ;;  %v3086_v62 = vmul.f32 0.0078125, %v3084_v61 }
0x16c4   : > { %v3088_v6 = vadd.f32 1e-05, %v3086_v62 }
0x16c6   : > { %4554 = vrsqrt.f32 %v3088_v6 }
0x16cf   : > { %v4553_v35 = vpop.eup %4552 }
0x16d0   : > { %v3091_v42 = vmul.f32 %v4553_v35, %v5766_v24 }
0x16d2   : > { %v3099_v48 = vmul.f32 %v3871_v46, %v3091_v42 }
0x16d3   : > { %v4555_v38 = vpop.eup %4554 }
0x16d4   : > { %v3092_v44 = vmul.f32 %v4555_v38, %v5770_v57  ;;  %v3107_v2 = vadd.f32 %v3872_v63, %v3099_v48 }
0x16d6   : > { %v3100_v1 = vmul.f32 %v3871_v46, %v3092_v44 }
0x16d8   : > { %v3108_v3 = vadd.f32 %v3872_v63, %v3100_v1 }
0x16da   : > { %v3109_v14 = vpack.c.bf16 %v3108_v3, %v3107_v2 }
0x16dc   : > { %3251 = vmatmul.mubr.bf16.vlgmr.msra.gmra.mxu0 %v3109_v14 }
0x179c   : > { %v3252_v9 = vpop.f32.mrf.mxu0 }
0x179d   : > { %v3253_v19 = vadd.f32 %v3252_v9, %v3131_v11 }
0x179e   : > { %v3254_v12 = vpop.f32.mrf.mxu0 }
0x179f   : > { %v3255_v13 = vadd.f32 %v3254_v12, %v3135_v10  ;;  %v3261_v56 = vmax.f32 %v3253_v19, 0.0 }
0x17a0   : > { %v3256_v4 = vpop.f32.mrf.mxu0 }
0x17a1   : > { %v3257_v15 = vadd.f32 %v3256_v4, %v3131_v11  ;;  %v3262_v55 = vmax.f32 %v3255_v13, 0.0 }
0x17a2   : > { %v3258_v24 = vpop.f32.mrf.mxu0 }
0x17a3   : > { %v3259_v53 = vadd.f32 %v3258_v24, %v3135_v10  ;;  %v3263_v31 = vmax.f32 %v3257_v15, 0.0 }
0x17a5   : > { %v3264_v57 = vmax.f32 %v3259_v53, 0.0  ;;  %v3265_v22 = vpack.c.bf16 %v3263_v31, %v3261_v56 }
0x17a7   : > { %v3266_v32 = vpack.c.bf16 %v3264_v57, %v3262_v55 }
0x17a9   : > { %3434 = vmatprep.mubr.bf16.mxu1 %v3266_v32 }
0x17aa   : > { %3435 = vmatmul.mubr.bf16.vlgmr.msra.gmra.mxu1 %v3265_v22 }
0x186a   : > { %v4011_v25 = vpop.f32.mrf.mxu1 }
0x186c   : > { %v4012_v27 = vpop.f32.mrf.mxu1 }
0x186d   : > { %v4013_v30 = vadd.f32 %v4012_v27, %v4011_v25 }
0x186e   : > { %v4014_v33 = vpop.f32.mrf.mxu1 }
0x186f   : > { %v3437_v34 = vadd.f32 %v4013_v30, %v3889_v23 }
0x1870   : > { %v4015_v36 = vpop.f32.mrf.mxu1 }
0x1871   : > { %v4016_v52 = vadd.f32 %v4015_v36, %v4014_v33  ;;  %v3443_v37 = vadd.f32 %v3437_v34, %v3107_v2 }
0x1873   : > { %v3440_v39 = vadd.f32 %v4016_v52, %v3889_v23  ;;  %3447 = vadd.xlane.f32.xlu1 %v3443_v37 }
0x1875   : > { %v3444_v40 = vadd.f32 %v3440_v39, %v3108_v3 }
0x1877   : > { %3449 = vadd.xlane.f32.xlu1 %v3444_v40 }
0x18fc   : > { %v3448_v41 = vpop.xlane.xlu1 %3447 }
0x18fd   : > { %v3451_v43 = vmul.f32 0.0078125, %v3448_v41 }
0x18ff   : > { %v3453_v45 = vsub.f32 %v3443_v37, %v3451_v43 }
0x1900   : > { %v3450_v47 = vpop.xlane.xlu1 %3449 }
0x1901   : > { %v3452_v16 = vmul.f32 0.0078125, %v3450_v47  ;;  %v3455_v21 = vmul.f32 %v3453_v45, %v3453_v45 }
0x1903   : > { %v3454_v26 = vsub.f32 %v3444_v40, %v3452_v16  ;;  %3457 = vadd.xlane.f32.xlu0 %v3455_v21 }
0x1905   : > { %v3456_v28 = vmul.f32 %v3454_v26, %v3454_v26 }
0x1907   : > { %3459 = vadd.xlane.f32.xlu1 %v3456_v28 }
0x1908   : > { %4839 = shalt.err (!%p4836_p7)
}
0x1909   : > { %s4840_s24 = scalar_lea.hbm %s5795_s25, 1024  ;;  %s4844_s17 = scalar_lea.hbm %s6006_s21, 2048 }
0x190a   : > { %p4841_p8 = scmp.ne.s32.totalorder %s5795_s25, %s4840_s24  ;;  %p4845_p2 = scmp.lt.s32.totalorder %s5795_s25, %s6006_s21 }
0x190b   : > { %p4846_p10 = scmp.lt.s32.totalorder %s4844_s17, %s4840_s24 }
0x190c   : > { %p4842_p9 = pnand %p4841_p8, %p6007_p3 }
0x190d   : > { %p4847_p4 = por %p4846_p10, %p4845_p2 }
0x190e   : > { %p4843_p0 = pneg %p4842_p9 }
0x1910   : > { %p4848_p5 = pnand %p4847_p4, %p4843_p0 }
0x1912   : > { %4851 = shalt.err (!%p4848_p5)
}
0x1913   : > { %s4966_s28 = smov 128   ;;  %s4967_s8 = smov 8  }
0x1914   : > { %4252 = dma.vmem_to_hbm [thread:$0]  (%p6007_p3), %s5797_s29, 1024, %s5795_s25, %s3493_s30, %s4966_s28, %s4966_s28, %s4967_s8  }
0x1915   : > { %s6008_s1 = sld [smem:[#allocation52_spill]]  ;;  %s3919_s25 = sshll.u32 %s5120_s26, 8 }
0x1916   : > { %s6009_s29 = sld [smem:[#allocation53_spill]]  ;;  %s976_s30 = scalar_lea.vmem [#allocation19], %s5373_s4 }
0x1917   : > { %s3506_s24 = sshll.u32 %s976_s30, 4  ;;  %s6010_s17 = sld [smem:[#allocation54_spill]]  ;;  %s5838_s24 = int_to_ptr.vmem [resolvable:$true] %s3506_s24 }
0x1918   : > { %s3488_s27 = scalar_lea.sflag [#allocation4], %s5370_s3  ;;  %s4852_s23 = scalar_lea.vmem %s5838_s24, 256 }
0x1919   : > { %p4853_p13 = scmp.ne.s32.totalorder %s5838_s24, %s4852_s23  ;;  %s4968_s26 = smov [#allocation19]  }
0x191a   : > { %s4856_s4 = sshll.u32 %s4968_s26, 4  ;;  %s4857_s4 = int_to_ptr.vmem [resolvable:$false] %s4856_s4 }
0x191b   : > { %v3906_v60 = vld [vmem:[%s6008_s1] ss:$0 sm:$0xff]  ;;  %p4854_p11 = pnand %p4853_p13, %p6007_p3  ;;  %s4858_s0 = scalar_lea.vmem %s4857_s4, 512 }
0x191c   : > { %v3907_v62 = vld [vmem:[%s6009_s29] ss:$0 sm:$0xff]  ;;  %p4859_p12 = scmp.lt.s32.totalorder %s5838_s24, %s4857_s4  ;;  %p4860_p6 = scmp.lt.s32.totalorder %s4858_s0, %s4852_s23 }
0x191d   : > { %s5836_s5 = scalar_lea.hbm %s6010_s17, %s3919_s25  ;;  %p4855_p1 = pneg %p4854_p11 }
0x191e   : > { %p4861_p7 = por %p4860_p6, %p4859_p12 }
0x1920   : > { %p4862_p8 = pnand %p4861_p7, %p4855_p1 }
0x198c   : > { %v3458_v29 = vpop.xlane.xlu0 %3457 }
0x198d   : > { %v3461_v49 = vmul.f32 0.0078125, %v3458_v29 }
0x198f   : > { %v3463_v50 = vadd.f32 1e-05, %v3461_v49 }
0x1990   : > { %v3460_v51 = vpop.xlane.xlu1 %3459 }
0x1991   : > { %4556 = vrsqrt.f32 %v3463_v50  ;;  %v3462_v54 = vmul.f32 0.0078125, %v3460_v51 }
0x1993   : > { %v3464_v58 = vadd.f32 1e-05, %v3462_v54 }
0x1995   : > { %4558 = vrsqrt.f32 %v3464_v58 }
0x199e   : > { %v4557_v59 = vpop.eup %4556 }
0x199f   : > { %v3467_v61 = vmul.f32 %v4557_v59, %v3453_v45 }
0x19a1   : > { %v3475_v6 = vmul.f32 %v3906_v60, %v3467_v61 }
0x19a2   : > { %v4559_v35 = vpop.eup %4558 }
0x19a3   : > { %v3483_v42 = vadd.f32 %v3907_v62, %v3475_v6  ;;  %v3468_v46 = vmul.f32 %v4559_v35, %v3454_v26 }
0x19a5   : > { %v3476_v38 = vmul.f32 %v3906_v60, %v3468_v46  ;;  %3485 = vst [vmem:[%s976_s30] sm:$0xff] %v3483_v42 }
0x19a7   : > { %v3484_v44 = vadd.f32 %v3907_v62, %v3476_v38 }
0x19a9   : > { %3486 = vst [vmem:[%s976_s30 + $0x8] sm:$0xff] %v3484_v44 }
0x19aa   : > { %4865 = shalt.err (!%p4862_p8)
}
0x19ab   : > { %s4866_s1 = scalar_lea.hbm %s5836_s5, 256  ;;  %s4870_s19 = scalar_lea.hbm %s6010_s17, 512 }
0x19ac   : > { %p4867_p9 = scmp.ne.s32.totalorder %s5836_s5, %s4866_s1  ;;  %p4871_p10 = scmp.lt.s32.totalorder %s5836_s5, %s6010_s17 }
0x19ad   : > { %p4872_p4 = scmp.lt.s32.totalorder %s4870_s19, %s4866_s1 }
0x19ae   : > { %p4868_p0 = pnand %p4867_p9, %p6007_p3 }
0x19af   : > { %p4873_p5 = por %p4872_p4, %p4871_p10 }
0x19b0   : > { %p4869_p2 = pneg %p4868_p0 }
0x19b2   : > { %p4874_p13 = pnand %p4873_p5, %p4869_p2 }
0x19b4   : > { %4877 = shalt.err (!%p4874_p13)
}
0x19b5   : > { %4251 = dma.vmem_to_hbm [thread:$0]  (%p6007_p3), %s5838_s24, 256, %s5836_s5, %s3488_s27, %s4966_s28, %s4966_s28, %s4967_s8  }
0x19b6 PF: > { %s6011_s30 = sld [smem:[#allocation30_spill]] }
0x19b7   : > { %s6012_s14 = sld [smem:[#allocation35_spill]] }
0x19b8   : > { %s6013_s9 = sld [smem:[#allocation31_spill]] }
0x19bc   : > { %s3537_s23 = sand.u32 1, %s6011_s30  }
0x19bd   : > { %p6014_p11 = scmp.ne.s32.totalorder %s6012_s14, 0  ;;  %s3538_s26 = scalar_lea.sflag [#allocation4], %s3537_s23 }
0x19be   : > { %p6015_p1 = scmp.ge.s32.totalorder %s6013_s9, 2 }
0x19c0   : > { %p4288_p12 = pnand %p6015_p1, %p6014_p11 }
0x19c2   : > { %p4289_p6 = pneg %p4288_p12 }
0x19c4   : > { %4919 = dma.done.wait (%p4289_p6), %s3538_s26, 256  }
0x19c5   : > { %4921 = vsyncadd (%p4289_p6), %s3538_s26, 4294967040  ;;  %s3547_s4 = scalar_lea.sflag [#allocation21], %s3537_s23 }
0x19c6   : > { %4923 = dma.done.wait (%p4289_p6), %s3547_s4, 1024  }
0x19c7   : > { %4925 = vsyncadd (%p4289_p6), %s3547_s4, 4294966272  ;;  %s6016_s30 = sld [smem:[#allocation32_spill]]  ;;  %s6018_s29 = smov %s4932_s2 }
0x19c8   : > { %s6017_s10 = sld [smem:[#allocation33_spill]]  ;;  %s6019_s2 = smov %s4936_s6 }
0x19cd   : > { %p49_p3 = scmp.ge.s32.totalorder %s6016_s30, 4  }
0x19ce   : > { %s6020_s6 = smov %s6017_s10 }
0x19cf   :  { %51 = sbr.rel (!%p49_p3) target bundleno = 34 (0x22), region = 233 }
0x19d4   :  { %3552 = vsyncpa [#allocation3], 1 }
0x19d5   :  { %3554 = vsyncpa [#allocation3 + $0x1], 1 }
0x19d6   :  { %3555 = vsyncpa [#allocation6], 1 }
0x19d7   :  { %3557 = vsyncpa [#allocation6 + $0x1], 1 }
0x19d8   :  { %3558 = vsyncpa [#allocation9], 1 }
0x19d9   :  { %3559 = vsyncpa [#allocation12], 1 }
0x19da   :  { %3560 = vsyncpa [#allocation15], 1 }
0x19db   :  { %3561 = vsyncpa [#allocation18], 1 }
0x19dc   :  { %3562 = vsyncpa [#allocation4], 1 }
0x19dd   :  { %3564 = vsyncpa [#allocation4 + $0x1], 1 }
0x19de   :  { %3565 = vsyncpa [#allocation21], 1 }
0x19df   :  { %3567 = vsyncpa [#allocation21 + $0x1], 1 }

</bundles_post_ra>
